<compile_context>
chip_gen: v6e
topology: v6e:2x2x1
jax: 0.10.0
libtpu: 0.0.40
codegen_flags: <defaults>
</compile_context>

<pallas_src>
import numpy as np
import jax
import jax.numpy as jnp
from jax import lax
from jax.experimental import pallas as pl
from jax.experimental.pallas import tpu as pltpu

_LANE = 128


def _ru(x, m):
    return ((x + m - 1) // m) * m


def _vmem_budget():
    """(physical VMEM per core, usable budget) — generation aware."""
    try:
        cap = int(pltpu.get_tpu_info().vmem_capacity_bytes)
    except Exception:                 # not queryable -> assume smallest (v7x)
        cap = 64 << 20
    return cap, max(32 << 20, cap - (16 << 20))


def _pick_row_tile(OH, OW, OCP, out_bytes, max_tile_bytes, sub_out):
    """Largest divisor of OH fitting the byte cap, preferring aligned tiles."""
    fallback = None
    for th in range(OH, 0, -1):
        if OH % th:
            continue
        if th * OW * OCP * out_bytes > max_tile_bytes:
            continue
        if (th * OW) % sub_out == 0:
            return th
        if fallback is None:
            fallback = th
    return fallback if fallback is not None else 1


def _pick_chunk_rows(TH, OW, OCP):
    """Rows per M-chunk so the f32 partial stays ~<=128 KiB (vreg friendly)."""
    target_rows = max(64, min(512, (128 * 1024) // (OCP * 4)))
    best = 1
    for d in range(1, TH + 1):
        if TH % d == 0 and d * OW <= target_rows:
            best = d
    return best


def _make_conv_kernel(K, TH, OW, IC, OCP, group, ch_rows, n_chunks, out_dtype,
                      resident):
    """Shifted-window KxK conv with tap folding and M-chunked accumulation."""
    G = (K * K) // group
    CH = ch_rows * OW

    def kernel(x_ref, w_ref, b_ref, o_ref):
        # x_ref: (1, HP|BH, WP, IC) bf16   padded image (or halo'd row band)
        # w_ref: (G, group*IC, OCP) bf16   WS-scaled weights, taps folded
        # b_ref: (1, OCP) f32
        # o_ref: (TH*OW, OCP)              flat output rows (lane dense)
        base = pl.program_id(1) * TH if resident else 0
        bias = b_ref[...]
        for c in range(n_chunks):                       # static unroll
            r0 = c * ch_rows
            acc = jnp.broadcast_to(bias, (CH, OCP))     # bias-initialised f32
            for g in range(G):
                parts = []
                for t in range(group):
                    tap = g * group + t
                    kh, kw = tap // K, tap % K
                    win = x_ref[0, pl.ds(base + r0 + kh, ch_rows),
                                pl.ds(kw, OW), :]
                    parts.append(win.reshape(CH, IC))
                a = parts[0] if group == 1 else jnp.concatenate(parts, axis=-1)
                acc = acc + jnp.dot(a, w_ref[g],
                                    preferred_element_type=jnp.float32)
            o_ref[pl.ds(c * CH, CH), :] = acc.astype(out_dtype)

    return kernel


def _pick_hw_tile(HW, IC, oc8, out_bytes, cmp_bytes, max_bytes=4 << 20):
    per_col = 2 * IC * cmp_bytes + 2 * oc8 * out_bytes
    cap = max(_LANE, max_bytes // per_col)
    if HW <= cap:
        return HW
    t = (cap // _LANE) * _LANE
    while t >= _LANE:
        if HW % t == 0:
            return t
        t -= _LANE
    return HW


def _make_1x1_kernel(out_dtype):
    def kernel(x_ref, w_ref, b_ref, o_ref):
        # x_ref: (1, IC, T) bf16, w_ref: (OC8, IC) bf16, b_ref: (OC8, 1) f32
        y = jnp.dot(w_ref[...], x_ref[0], preferred_element_type=jnp.float32)
        o_ref[0] = (y + b_ref[...]).astype(out_dtype)
    return kernel


def _wsconv1x1(x_nchw, weight_oihw, bias, scale, compute_dtype):
    """1x1/padding=0 WSConv2d (AdaIN transforms, to_rgb): stays NCHW, no
    128-lane OC padding, single matmul per (image, HW-tile)."""
    N, IC, H, W = x_nchw.shape
    OC = weight_oihw.shape[0]
    HW = H * W
    out_dtype = x_nchw.dtype
    out_bytes = jnp.dtype(out_dtype).itemsize
    cmp_bytes = jnp.dtype(compute_dtype).itemsize
    OC8 = _ru(max(OC, 8), 8)

    w = weight_oihw.astype(jnp.float32)[:, :, 0, 0] * scale
    w = jnp.pad(w, ((0, OC8 - OC), (0, 0))).astype(compute_dtype)
    b = jnp.pad(bias.astype(jnp.float32), (0, OC8 - OC)).reshape(OC8, 1)
    x = x_nchw.reshape(N, IC, HW).astype(compute_dtype)

    T = _pick_hw_tile(HW, IC, OC8, out_bytes, cmp_bytes)
    grid = (N, HW // T)

    cost = pl.CostEstimate(
        flops=int(2 * N * HW * IC * OC8), transcendentals=0,
        bytes_accessed=int(x.size * cmp_bytes + w.size * cmp_bytes
                           + b.size * 4 + N * OC8 * HW * out_bytes))

    out = pl.pallas_call(
        _make_1x1_kernel(out_dtype),
        out_shape=jax.ShapeDtypeStruct((N, OC8, HW), out_dtype),
        grid=grid,
        in_specs=[
            pl.BlockSpec((1, IC, T), lambda n, t: (n, 0, t)),
            pl.BlockSpec((OC8, IC), lambda n, t: (0, 0)),
            pl.BlockSpec((OC8, 1), lambda n, t: (0, 0)),
        ],
        out_specs=pl.BlockSpec((1, OC8, T), lambda n, t: (n, 0, t)),
        compiler_params=pltpu.CompilerParams(
            dimension_semantics=("parallel", "parallel")),
        cost_estimate=cost,
    )(x, w, b)
    return out[:, :OC, :].reshape(N, OC, H, W)


def wsconv2d(x_nchw, weight_oihw, bias, stride=1, padding=1,
             gain=float(np.sqrt(2.0)), compute_dtype=jnp.bfloat16,
             force_banded=False, row_tile=None):
    """WSConv2d forward: conv2d(x, weight * gain/sqrt(fan_in), bias). NCHW."""
    if stride != 1:
        raise NotImplementedError("fused WSConv2d kernel supports stride=1 only")

    N, IC, H, W = x_nchw.shape
    OC, IC2, K, K2 = weight_oihw.shape
    assert IC == IC2 and K == K2
    scale = np.float32(gain / np.sqrt(IC * K * K))

    if K == 1 and padding == 0:
        return _wsconv1x1(x_nchw, weight_oihw, bias, scale, compute_dtype)

    out_dtype = x_nchw.dtype
    out_bytes = jnp.dtype(out_dtype).itemsize
    cmp_bytes = jnp.dtype(compute_dtype).itemsize
    sub_in = max(8, 32 // cmp_bytes)
    sub_out = max(8, 32 // out_bytes)

    HP, WP = H + 2 * padding, W + 2 * padding
    OH, OW = HP - K + 1, WP - K + 1
    cap, budget = _vmem_budget()

    # Lane-dense output columns (padded cols sliced off afterwards).
    OCP = max(_LANE, _ru(OC, _LANE))

    # Fold conv taps into the MXU contraction dim until depth >= ~128.
    if IC >= _LANE:
        group = 1
    elif K * IC >= _LANE:
        group = K
    else:
        group = K * K
    G = (K * K) // group
    D = group * IC

    # Weights: WS scale folded in f32 before the bf16 cast; (kh,kw)-major taps
    # regrouped to (G, group*IC, OCP) to match the in-kernel slab layout.
    w = jnp.transpose(weight_oihw.astype(jnp.float32) * scale, (2, 3, 1, 0))
    w = w.reshape(K * K, IC, OC).reshape(G, D, OC)
    w = jnp.pad(w, ((0, 0), (0, 0), (0, OCP - OC))).astype(compute_dtype)
    b = jnp.pad(bias.astype(jnp.float32).reshape(1, OC), ((0, 0), (0, OCP - OC)))

    # NHWC + zero padding; the conv never materializes im2col patches in HBM.
    x = jnp.transpose(x_nchw, (0, 2, 3, 1)).astype(compute_dtype)
    xp = jnp.pad(x, ((0, 0), (padding, padding), (padding, padding), (0, 0)))

    max_tile_bytes = (2 << 20) if cap <= (80 << 20) else (6 << 20)
    TH = _pick_row_tile(OH, OW, OCP, out_bytes, max_tile_bytes, sub_out)
    if row_tile is not None:
        assert OH % row_tile == 0
        TH = row_tile

    # VMEM footprint with (sublane, lane) tiling padding accounted for.
    w_vmem = 2 * G * _ru(D, sub_in) * OCP * cmp_bytes
    b_vmem = 2 * 8 * OCP * 4

    def footprint(img_rows, th):
        crs = _pick_chunk_rows(th, OW, OCP)
        ch = crs * OW
        img = 2 * img_rows * _ru(WP, sub_in) * _ru(IC, _LANE) * cmp_bytes
        out_tile = 2 * _ru(th * OW, sub_out) * OCP * out_bytes
        tmp = ch * _ru(D, _LANE) * cmp_bytes * 2 + ch * OCP * 4
        return img + w_vmem + b_vmem + out_tile + tmp + (2 << 20)

    resident = (not force_banded) and footprint(HP, TH) <= budget
    if resident:
        R = OH // TH
        est = footprint(HP, TH)
        x_in = xp
        img_spec = pl.BlockSpec((1, HP, WP, IC), lambda n, r: (n, 0, 0, 0))
        # Image block is invariant across r: keep r off the megacore split so
        # each TensorCore does not hold / re-stream its own full copy.
        semantics = ("parallel", "arbitrary") if R > 1 else ("parallel", "parallel")
    else:
        th = TH
        while th > 1 and footprint(th + K - 1, th) > budget:
            th = max(d for d in range(1, th) if OH % d == 0)
        TH = th
        R = OH // TH
        BH = TH + K - 1
        est = footprint(BH, TH)
        # Halo'd row bands: each grid step only keeps TH+K-1 rows in VMEM; the
        # (K-1)/TH duplication is materialized once on the host.
        # TODO(synk): replace with a pl.Element halo index_map (or manual make_async_copy halo pipeline) to drop this extra HBM pass.
        bands = [xp[:, r * TH: r * TH + BH] for r in range(R)]
        x_in = jnp.stack(bands, axis=1).reshape(N * R, BH, WP, IC)
        img_spec = pl.BlockSpec((1, BH, WP, IC),
                                lambda n, r, R_=R: (n * R_ + r, 0, 0, 0))
        semantics = ("parallel", "parallel")

    ch_rows = _pick_chunk_rows(TH, OW, OCP)
    n_chunks = TH // ch_rows
    M = N * OH * OW
    vmem_limit = int(min(budget, max(est + (4 << 20), 32 << 20)))

    cost = pl.CostEstimate(
        flops=int(2 * M * K * K * IC * OCP), transcendentals=0,
        bytes_accessed=int(x_in.size * cmp_bytes + w.size * cmp_bytes
                           + b.size * 4 + M * OCP * out_bytes))

    kernel = _make_conv_kernel(K, TH, OW, IC, OCP, group, ch_rows, n_chunks,
                               out_dtype, resident)
    out_flat = pl.pallas_call(
        kernel,
        out_shape=jax.ShapeDtypeStruct((M, OCP), out_dtype),
        grid=(N, R),
        in_specs=[
            img_spec,
            pl.BlockSpec((G, D, OCP), lambda n, r: (0, 0, 0)),
            pl.BlockSpec((1, OCP), lambda n, r: (0, 0)),
        ],
        out_specs=pl.BlockSpec((TH * OW, OCP),
                               lambda n, r, R_=R: (n * R_ + r, 0)),
        compiler_params=pltpu.CompilerParams(
            dimension_semantics=semantics,
            vmem_limit_bytes=vmem_limit),
        cost_estimate=cost,
    )(x_in, w, b)

    out = out_flat[:, :OC].reshape(N, OH, OW, OC)
    # TODO(synk): keep the surrounding model NHWC and fuse noise/leaky-relu/AdaIN into the epilogue so this OCP slice + NCHW transpose disappear.
    return jnp.transpose(out, (0, 3, 1, 2))

# TODO(synk): noise injection (randn), instance-norm, leaky-relu, depthwise Blur3x3, upsample and lerp of SynthesisModule are elementwise/layout glue left to XLA; only the WSConv2d paths run in Pallas.


if __name__ == "__main__":
    key = jax.random.PRNGKey(0)
    k_x, k_w1, k_b1, k_w2 = jax.random.split(key, 4)

    # Small shapes consistent with the module's WSConv2d usage.
    N, IC, H, W = 2, 4, 16, 16
    OC, K, stride, padding = 8, 3, 1, 1

    x = jax.random.normal(k_x, (N, IC, H, W), dtype=jnp.float32)
    weight = jax.random.normal(k_w1, (OC, IC, K, K), dtype=jnp.float32)
    bias = jax.random.normal(k_b1, (OC,), dtype=jnp.float32)

    # Reference: XLA f32 conv on the same bf16-rounded operands.
    def ref_conv(xr, wr, br, gain, k, pad):
        ic = wr.shape[1]
        s = np.float32(gain / np.sqrt(ic * k * k))
        xq = xr.astype(jnp.bfloat16).astype(jnp.float32)
        wq = (wr.astype(jnp.float32) * s).astype(jnp.bfloat16).astype(jnp.float32)
        y = lax.conv_general_dilated(
            xq, wq, window_strides=(1, 1),
            padding=[(pad, pad), (pad, pad)],
            dimension_numbers=("NCHW", "OIHW", "NCHW"),
            precision=lax.Precision.HIGHEST)
        return y + br.reshape(1, -1, 1, 1)

    ref = ref_conv(x, weight, bias, float(np.sqrt(2.0)), K, padding)

    # 1) default path (whole padded image resident).
    out = jax.block_until_ready(wsconv2d(x, weight, bias, stride, padding))
    np.testing.assert_allclose(np.asarray(out), np.asarray(ref),
                               rtol=2e-3, atol=2e-3)

    # 2) resident image with multiple row tiles (r-offset indexing + semantics).
    out_r = jax.block_until_ready(
        wsconv2d(x, weight, bias, stride, padding, row_tile=8))
    np.testing.assert_allclose(np.asarray(out_r), np.asarray(ref),
                               rtol=2e-3, atol=2e-3)

    # 3) halo'd row-band fallback (what large feature maps use).
    out_b = jax.block_until_ready(
        wsconv2d(x, weight, bias, stride, padding,
                 force_banded=True, row_tile=4))
    np.testing.assert_allclose(np.asarray(out_b), np.asarray(ref),
                               rtol=2e-3, atol=2e-3)

    # 4) 1x1 / padding=0 / gain=1 fast path (AdaIN transforms, to_rgb).
    OC1 = 3
    w1 = jax.random.normal(k_w2, (OC1, IC, 1, 1), dtype=jnp.float32)
    b1 = jnp.ones((OC1,), dtype=jnp.float32)
    out1 = jax.block_until_ready(wsconv2d(x, w1, b1, 1, 0, gain=1.0))
    ref1 = ref_conv(x, w1, b1, 1.0, 1, 0)
    np.testing.assert_allclose(np.asarray(out1), np.asarray(ref1),
                               rtol=2e-3, atol=2e-3)

    print("KERNEL_OK")
</pallas_src>

<mosaic_0001>
module attributes {stable_mosaic.version = 11 : i64} {
  func.func @kernel(%arg0: i32, %arg1: i32, %arg2: memref<1x18x18x4xbf16, #tpu.memory_space<vmem>>, %arg3: memref<1x36x128xbf16, #tpu.memory_space<vmem>>, %arg4: memref<1x128xf32, #tpu.memory_space<vmem>>, %arg5: memref<256x128xf32, #tpu.memory_space<vmem>>) attributes {dimension_semantics = [#tpu.dimension_semantics<parallel>, #tpu.dimension_semantics<parallel>], iteration_bounds = array<i64: 2, 1>, scalar_prefetch = 0 : i64, scratch_operands = 0 : i64, tpu.core_type = #tpu.core_type<tc>, window_params = [{transform_indices = @transform_0, window_bounds = array<i64: 1, 18, 18, 4>}, {pipeline_mode = #tpu.pipeline_mode<synchronous>, transform_indices = @transform_1, window_bounds = array<i64: 1, 36, 128>}, {pipeline_mode = #tpu.pipeline_mode<synchronous>, transform_indices = @transform_2, window_bounds = array<i64: 1, 128>}, {transform_indices = @transform_3, window_bounds = array<i64: 256, 128>}]} {
    %c16_i32 = arith.constant 16 : i32
    %0 = arith.muli %arg1, %c16_i32 : i32
    %c0 = arith.constant 0 : index
    %c0_0 = arith.constant 0 : index
    %1 = vector.load %arg4[%c0, %c0_0] : memref<1x128xf32, #tpu.memory_space<vmem>>, vector<1x128xf32>
    %2 = vector.shape_cast %1 : vector<1x128xf32> to vector<1x128xf32>
    %3 = vector.broadcast %2 : vector<1x128xf32> to vector<256x128xf32>
    %c0_i32 = arith.constant 0 : i32
    %4 = arith.addi %0, %c0_i32 : i32
    %c0_i32_1 = arith.constant 0 : i32
    %5 = arith.addi %4, %c0_i32_1 : i32
    %c0_2 = arith.constant 0 : index
    %6 = arith.index_cast %5 : i32 to index
    %c0_3 = arith.constant 0 : index
    %c0_4 = arith.constant 0 : index
    %7 = vector.load %arg2[%c0_2, %6, %c0_3, %c0_4] : memref<1x18x18x4xbf16, #tpu.memory_space<vmem>>, vector<1x16x16x4xbf16>
    %8 = vector.shape_cast %7 : vector<1x16x16x4xbf16> to vector<16x16x4xbf16>
    %9 = vector.shape_cast %8 : vector<16x16x4xbf16> to vector<256x4xbf16>
    %c0_i32_5 = arith.constant 0 : i32
    %10 = arith.addi %0, %c0_i32_5 : i32
    %c0_i32_6 = arith.constant 0 : i32
    %11 = arith.addi %10, %c0_i32_6 : i32
    %c0_7 = arith.constant 0 : index
    %12 = arith.index_cast %11 : i32 to index
    %c1 = arith.constant 1 : index
    %c0_8 = arith.constant 0 : index
    %13 = vector.load %arg2[%c0_7, %12, %c1, %c0_8] : memref<1x18x18x4xbf16, #tpu.memory_space<vmem>>, vector<1x16x16x4xbf16>
    %14 = vector.shape_cast %13 : vector<1x16x16x4xbf16> to vector<16x16x4xbf16>
    %15 = vector.shape_cast %14 : vector<16x16x4xbf16> to vector<256x4xbf16>
    %c0_i32_9 = arith.constant 0 : i32
    %16 = arith.addi %0, %c0_i32_9 : i32
    %c0_i32_10 = arith.constant 0 : i32
    %17 = arith.addi %16, %c0_i32_10 : i32
    %c0_11 = arith.constant 0 : index
    %18 = arith.index_cast %17 : i32 to index
    %c2 = arith.constant 2 : index
    %c0_12 = arith.constant 0 : index
    %19 = vector.load %arg2[%c0_11, %18, %c2, %c0_12] : memref<1x18x18x4xbf16, #tpu.memory_space<vmem>>, vector<1x16x16x4xbf16>
    %20 = vector.shape_cast %19 : vector<1x16x16x4xbf16> to vector<16x16x4xbf16>
    %21 = vector.shape_cast %20 : vector<16x16x4xbf16> to vector<256x4xbf16>
    %c0_i32_13 = arith.constant 0 : i32
    %22 = arith.addi %0, %c0_i32_13 : i32
    %c1_i32 = arith.constant 1 : i32
    %23 = arith.addi %22, %c1_i32 : i32
    %c0_14 = arith.constant 0 : index
    %24 = arith.index_cast %23 : i32 to index
    %c0_15 = arith.constant 0 : index
    %c0_16 = arith.constant 0 : index
    %25 = vector.load %arg2[%c0_14, %24, %c0_15, %c0_16] : memref<1x18x18x4xbf16, #tpu.memory_space<vmem>>, vector<1x16x16x4xbf16>
    %26 = vector.shape_cast %25 : vector<1x16x16x4xbf16> to vector<16x16x4xbf16>
    %27 = vector.shape_cast %26 : vector<16x16x4xbf16> to vector<256x4xbf16>
    %c0_i32_17 = arith.constant 0 : i32
    %28 = arith.addi %0, %c0_i32_17 : i32
    %c1_i32_18 = arith.constant 1 : i32
    %29 = arith.addi %28, %c1_i32_18 : i32
    %c0_19 = arith.constant 0 : index
    %30 = arith.index_cast %29 : i32 to index
    %c1_20 = arith.constant 1 : index
    %c0_21 = arith.constant 0 : index
    %31 = vector.load %arg2[%c0_19, %30, %c1_20, %c0_21] : memref<1x18x18x4xbf16, #tpu.memory_space<vmem>>, vector<1x16x16x4xbf16>
    %32 = vector.shape_cast %31 : vector<1x16x16x4xbf16> to vector<16x16x4xbf16>
    %33 = vector.shape_cast %32 : vector<16x16x4xbf16> to vector<256x4xbf16>
    %c0_i32_22 = arith.constant 0 : i32
    %34 = arith.addi %0, %c0_i32_22 : i32
    %c1_i32_23 = arith.constant 1 : i32
    %35 = arith.addi %34, %c1_i32_23 : i32
    %c0_24 = arith.constant 0 : index
    %36 = arith.index_cast %35 : i32 to index
    %c2_25 = arith.constant 2 : index
    %c0_26 = arith.constant 0 : index
    %37 = vector.load %arg2[%c0_24, %36, %c2_25, %c0_26] : memref<1x18x18x4xbf16, #tpu.memory_space<vmem>>, vector<1x16x16x4xbf16>
    %38 = vector.shape_cast %37 : vector<1x16x16x4xbf16> to vector<16x16x4xbf16>
    %39 = vector.shape_cast %38 : vector<16x16x4xbf16> to vector<256x4xbf16>
    %c0_i32_27 = arith.constant 0 : i32
    %40 = arith.addi %0, %c0_i32_27 : i32
    %c2_i32 = arith.constant 2 : i32
    %41 = arith.addi %40, %c2_i32 : i32
    %c0_28 = arith.constant 0 : index
    %42 = arith.index_cast %41 : i32 to index
    %c0_29 = arith.constant 0 : index
    %c0_30 = arith.constant 0 : index
    %43 = vector.load %arg2[%c0_28, %42, %c0_29, %c0_30] : memref<1x18x18x4xbf16, #tpu.memory_space<vmem>>, vector<1x16x16x4xbf16>
    %44 = vector.shape_cast %43 : vector<1x16x16x4xbf16> to vector<16x16x4xbf16>
    %45 = vector.shape_cast %44 : vector<16x16x4xbf16> to vector<256x4xbf16>
    %c0_i32_31 = arith.constant 0 : i32
    %46 = arith.addi %0, %c0_i32_31 : i32
    %c2_i32_32 = arith.constant 2 : i32
    %47 = arith.addi %46, %c2_i32_32 : i32
    %c0_33 = arith.constant 0 : index
    %48 = arith.index_cast %47 : i32 to index
    %c1_34 = arith.constant 1 : index
    %c0_35 = arith.constant 0 : index
    %49 = vector.load %arg2[%c0_33, %48, %c1_34, %c0_35] : memref<1x18x18x4xbf16, #tpu.memory_space<vmem>>, vector<1x16x16x4xbf16>
    %50 = vector.shape_cast %49 : vector<1x16x16x4xbf16> to vector<16x16x4xbf16>
    %51 = vector.shape_cast %50 : vector<16x16x4xbf16> to vector<256x4xbf16>
    %c0_i32_36 = arith.constant 0 : i32
    %52 = arith.addi %0, %c0_i32_36 : i32
    %c2_i32_37 = arith.constant 2 : i32
    %53 = arith.addi %52, %c2_i32_37 : i32
    %c0_38 = arith.constant 0 : index
    %54 = arith.index_cast %53 : i32 to index
    %c2_39 = arith.constant 2 : index
    %c0_40 = arith.constant 0 : index
    %55 = vector.load %arg2[%c0_38, %54, %c2_39, %c0_40] : memref<1x18x18x4xbf16, #tpu.memory_space<vmem>>, vector<1x16x16x4xbf16>
    %56 = vector.shape_cast %55 : vector<1x16x16x4xbf16> to vector<16x16x4xbf16>
    %57 = vector.shape_cast %56 : vector<16x16x4xbf16> to vector<256x4xbf16>
    %58 = tpu.concatenate %9, %15, %21, %27, %33, %39, %45, %51, %57 in 1 : vector<256x4xbf16>, vector<256x4xbf16>, vector<256x4xbf16>, vector<256x4xbf16>, vector<256x4xbf16>, vector<256x4xbf16>, vector<256x4xbf16>, vector<256x4xbf16>, vector<256x4xbf16> -> vector<256x36xbf16>
    %c0_41 = arith.constant 0 : index
    %c0_42 = arith.constant 0 : index
    %c0_43 = arith.constant 0 : index
    %59 = vector.load %arg3[%c0_41, %c0_42, %c0_43] : memref<1x36x128xbf16, #tpu.memory_space<vmem>>, vector<1x36x128xbf16>
    %60 = vector.shape_cast %59 : vector<1x36x128xbf16> to vector<36x128xbf16>
    %cst = arith.constant dense<0.000000e+00> : vector<256x128xf32>
    %61 = tpu.matmul %58, %60, %cst {dimension_numbers = #tpu.dot_dimension_numbers<[1], [0], [0], [1], [0, 0, 1, 1], [], []>} : vector<256x36xbf16>, vector<36x128xbf16>, vector<256x128xf32> -> vector<256x128xf32>
    %62 = arith.addf %3, %61 : vector<256x128xf32>
    %c0_44 = arith.constant 0 : index
    %c0_45 = arith.constant 0 : index
    %63 = vector.load %arg5[%c0_44, %c0_45] : memref<256x128xf32, #tpu.memory_space<vmem>>, vector<256x128xf32>
    tpu.vector_store %arg5[%c0_44, %c0_45], %62 {strides = array<i32>} : memref<256x128xf32, #tpu.memory_space<vmem>>, vector<256x128xf32>,
    return
  }
  func.func @transform_0(%arg0: i32, %arg1: i32) -> (i32, i32, i32, i32) {
    %c0_i32 = arith.constant 0 : i32
    %c0_i32_0 = arith.constant 0 : i32
    %c0_i32_1 = arith.constant 0 : i32
    %c0_i32_2 = arith.constant 0 : i32
    return %arg0, %c0_i32, %c0_i32_0, %c0_i32_1 : i32, i32, i32, i32
  }
  func.func @transform_1(%arg0: i32, %arg1: i32) -> (i32, i32, i32) {
    %c0_i32 = arith.constant 0 : i32
    %c0_i32_0 = arith.constant 0 : i32
    %c0_i32_1 = arith.constant 0 : i32
    %c0_i32_2 = arith.constant 0 : i32
    return %c0_i32, %c0_i32_0, %c0_i32_1 : i32, i32, i32
  }
  func.func @transform_2(%arg0: i32, %arg1: i32) -> (i32, i32) {
    %c0_i32 = arith.constant 0 : i32
    %c0_i32_0 = arith.constant 0 : i32
    %c0_i32_1 = arith.constant 0 : i32
    return %c0_i32, %c0_i32_0 : i32, i32
  }
  func.func @transform_3(%arg0: i32, %arg1: i32) -> (i32, i32) {
    %c1_i32 = arith.constant 1 : i32
    %0 = arith.muli %arg0, %c1_i32 : i32
    %1 = arith.addi %0, %arg1 : i32
    %c0_i32 = arith.constant 0 : i32
    %c0_i32_0 = arith.constant 0 : i32
    return %1, %c0_i32 : i32, i32
  }
}

</mosaic_0001>

<bundles_post_ra>
// kernel: tpu_custom_call.1
= control target key start
LH: loop header
LB: loop body
LE: loop exit
PB: predicated region body
PF: predicated region fallthrough
CT: control target
= control target key end

     0   :  { %8 = vsyncpa [#allocation3], 0  ;;  %s6132_s0 = inlined_call_operand.vmem [shape: bf16[2,18,18,4], index: 0, kind: input, shape index: {}]   ;;  %s6133_s1 = inlined_call_operand.vmem [shape: bf16[1,36,128], index: 1, kind: input, shape index: {}]   ;;  %s6134_s2 = inlined_call_operand.vmem [shape: f32[1,128], index: 2, kind: input, shape index: {}]   ;;  %s6135_s3 = inlined_call_operand.hbm [shape: f32[512,128], index: 3, kind: output, shape index: {}]  }
   0x1   :  { %10 = vsyncpa [#allocation3 + $0x1], 0  ;;  %s4102_s12 = smov 0   ;;  %s4104_s13 = smov 0  }
   0x2   :  { %s4106_s14 = smov 0   ;;  %s4108_s15 = smov 0  }
   0x3   :  { %s4110_s16 = smov 0   ;;  %s4112_s17 = smov 0  }
   0x4 LB: > { %s3429_s18 = sadd.s32 4294967295, %s4070_s17   ;;  %s3430_s19 = sadd.s32 4294967294, %s4070_s17   ;;  %s4070_s17 = sphi %s4112_s17, %s16_s17   ;;  %s4066_s16 = sphi %s4110_s16, %s6146_s16   ;;  %s4062_s15 = sphi %s4108_s15, %s6145_s15   ;;  %s4058_s14 = sphi %s4106_s14, %s6144_s14   ;;  %s4054_s13 = sphi %s4104_s13, %s6143_s13   ;;  %s4050_s12 = sphi %s4102_s12, %s6142_s12  }
   0x5   : > { %s28_s20 = sadd.s32 1, %s4066_s16  ;;  %s105_s21 = sadd.s32 1, %s4058_s14 }
   0x6   : > { %p30_p0 = scmp.ge.s32.totalorder %s28_s20, 2  ;;  %p115_p1 = scmp.ne.s32.totalorder %s4058_s14, %s4054_s13 }
   0x7   : > { %p116_p2 = scmp.eq.s32.totalorder %s3429_s18, 1  ;;  %p121_p3 = scmp.ne.s32.totalorder %s4054_s13, %s4050_s12 }
   0x8   : > { %s6148_s20 = smov (%p30_p0, %s28_s20), 0  ;;  %p122_p5 = scmp.eq.s32.totalorder %s3430_s19, 1 }
   0x9   : > { %p4142_p4 = por %p116_p2, %p115_p1  ;;  %s102_s23 = ssub.s32 %s4066_s16, %s6148_s20 }
   0xa   : > { %p3433_p6 = scmp.ge.s32.totalorder %s4070_s17, 1  ;;  %p103_p7 = scmp.eq.s32.totalorder %s102_s23, 0 }
   0xb   : > { %p4149_p8 = por %p122_p5, %p121_p3  ;;  %p154_p9 = scmp.lt.s32.totalorder %s4070_s17, 3 }
   0xc   : > { %s4155_s25 = scalar_select %p103_p7, %s4058_s14, %s105_s21  }
   0xd   : > { %p155_p10 = pnand %p3433_p6, %p154_p9 }
   0xe   : > { %p178_p11 = scmp.lt.s32.totalorder (!%p155_p10), %s4062_s15, 1  ;;  %s4072_s4 = smov (!%p155_p10), 12  }
   0xf   : > { %158 = sbr.rel (%p155_p10) target bundleno = 678 (0x2a6), region = 32  ;;  %s4073_s5 = smov (!%p155_p10), 8  }
  0x10   : > { %s4074_s6 = smov (!%p155_p10), 4   ;;  %s4075_s7 = smov (!%p155_p10), 16  }
  0x11   : > { %s4076_s8 = smov (!%p155_p10), 20   ;;  %s4077_s9 = smov (!%p155_p10), 24  }
  0x12   : > { %s4078_s10 = smov (!%p155_p10), 28   ;;  %s4079_s11 = smov (!%p155_p10), 32  }
  0x13   : > { %s175_s28 = sand.u32 (!%p155_p10), 1, %s4054_s13   ;;  %s4080_s19 = smov (!%p155_p10), [#allocation2]  }
  0x14   : > { %s179_s26 = scalar_select %p178_p11, %s4062_s15, 1  ;;  %vm696_vm0 = vcmask 1042432   ;;  %vm697_vm1 = vcmask 1046532   ;;  %vm245_vm3 = vsmask.f32 3328  ;;  %vm2771_vm6 = vcmask 31744  }
  0x15   : > { %vm4193_vm2 = vmor %vm696_vm0, %vm697_vm1  ;;  %vm246_vm4 = vsmask.f32 7440  ;;  %vm2820_vm7 = vcmask 64512   ;;  %vm2853_vm8 = vcmask 97280   ;;  %vm2886_vm9 = vcmask 130048   ;;  %s3434_s29 = sshll.u32 %s175_s28, 8 }
  0x16   : > { %s3847_s27 = smul.u32 216, %s179_s26  ;;  %vm4251_vm5 = vmor %vm245_vm3, %vm246_vm4  ;;  %vm2919_vm10 = vcmask 162816   ;;  %vm2952_vm11 = vcmask 195584   ;;  %vm2985_vm12 = vcmask 228352   ;;  %vm3104_vm13 = vcmask 1041408   ;;  %s3998_s21 = sshll.u32 %s4080_s19, 4  ;;  %s3999_s21 = int_to_ptr.vmem [resolvable:$false] %s3998_s21 }
  0x17   : > { %vm3018_vm14 = vcmask 261120   ;;  %vm3071_vm15 = vcmask 293888   ;;  %s4000_s23 = scalar_lea.vmem %s3999_s21, 8192 }
  0x18   : > { %s4162_s30 = scalar_lea.vmem %s6132_s0, %s3847_s27 }
  0x19   : > { %v3469_v0 = vld [vmem:[%s4162_s30 + $0x6c] sm:$0xf]  ;;  %v4166_v1 = vld [vmem:[%s4162_s30 + $0x70] sm:$0xf]  ;;  %v4179_v12 = vld [vmem:[%s4162_s30 + $0x64] sm:$0xf] }
  0x1a   : > { %v3453_v2 = vld [vmem:[%s4162_s30 + $0xc] sm:$0xf]  ;;  %v1065_v3 = vshll.u32 %v4166_v1, 16  ;;  %v1069_v4 = vshrl.u32 %v4166_v1, 16  ;;  %v3669_v5 = vcombine.low %v3469_v0, %v4166_v1  ;;  %v1056_v6 = vshrl.u32 %v3469_v0, 16 }
  0x1b   : > { %v4173_v7 = vld [vmem:[%s4162_s30 + $0x10] sm:$0xf]  ;;  %v1059_v8 = vshll.u32 %v3469_v0, 16  ;;  %v864_v15 = vshrl.u32 %v3453_v2, 16  ;;  %v867_v16 = vshll.u32 %v3453_v2, 16  ;;  %v757_v22 = vrot.slane %v4179_v12, 5 }
  0x1c   : > { %v873_v9 = vshll.u32 %v4173_v7, 16  ;;  %v877_v10 = vshrl.u32 %v4173_v7, 16  ;;  %v3661_v11 = vcombine.low %v3453_v2, %v4173_v7  ;;  %v4181_v13 = vrot.slane %v1069_v4, 4  ;;  %2339 = vrot.lane.b32.xlu1 %v3669_v5, %s4072_s4  ;;  %v4185_v17 = vld [vmem:[%s4162_s30 + $0x68] sm:$0x1] }
  0x1d   : > { %v1058_v14 = vrot.slane %v1056_v6, 4  ;;  %v1061_v18 = vrot.slane %v1059_v8, 5  ;;  %v640_v20 = vld [vmem:[%s4162_s30 + $0x60] sm:$0xe]  ;;  %v760_v23 = vrot.slane %v4185_v17, 5  ;;  %v866_v24 = vrot.slane %v864_v15, 4 }
  0x1e   : > { %v4187_v19 = vrot.slane %v877_v10, 4  ;;  %2323 = vrot.lane.b32.xlu0 %v3661_v11, %s4072_s4  ;;  %v869_v25 = vrot.slane %v867_v16, 5  ;;  %v3445_v26 = vrot.slane %v640_v20, 9  ;;  %v4200_v27 = vld [vmem:[%s4162_s30 + $0x4] sm:$0xf]  ;;  %v450_v28 = vshll.u32 %v4179_v12, 16 }
  0x1f   : > { %v1062_v29 = vor.u32 %v1061_v18, %v1058_v14  ;;  %v759_v30 = vrot.slane %v757_v22, 4  ;;  %v4204_v31 = vld [vmem:[%s4162_s30 + $0x8] sm:$0x1]  ;;  %v632_v32 = vld [vmem:[%s4162_s30] sm:$0xe]  ;;  %v701_v33 = vrot.slane %v4200_v27, 5 }
  0x20   : > { %v870_v34 = vor.u32 %v869_v25, %v866_v24  ;;  %v758_v35 = vsel %vm4193_vm2, %v3445_v26, %v757_v22  ;;  %v3437_v36 = vrot.slane %v632_v32, 9  ;;  %v704_v37 = vrot.slane %v4204_v31, 5  ;;  %v4212_v38 = vld [vmem:[%s4162_s30 + $0x70] sm:$0xf]  ;;  %v4215_v39 = vld [vmem:[%s4162_s30 + $0x74] sm:$0x1] }
  0x21   : > { %v4217_v40 = vrot.slane %v1062_v29, 4  ;;  %v761_v41 = vsel %vm4193_vm2, %v759_v30, %v760_v23  ;;  %v703_v42 = vrot.slane %v701_v33, 4  ;;  %v641_v43 = vld [vmem:[%s4162_s30 + $0x6c] sm:$0xe]  ;;  %v764_v44 = vrot.slane %v4212_v38, 5 }
  0x22   : > { %v4223_v45 = vrot.slane %v870_v34, 4  ;;  %v3653_v46 = vcombine.low %v758_v35, %v761_v41  ;;  %v702_v47 = vsel %vm4193_vm2, %v3437_v36, %v701_v33  ;;  %v3446_v48 = vrot.slane %v641_v43, 9  ;;  %v200_v49 = vld [vmem:[%s4162_s30 + $0x10] sm:$0xf]  ;;  %v230_v50 = vld [vmem:[%s4162_s30 + $0x14] sm:$0x1] }
  0x23   : > { %v705_v51 = vsel %vm4193_vm2, %v703_v42, %v704_v37  ;;  %v766_v52 = vrot.slane %v764_v44, 4  ;;  %v767_v53 = vrot.slane %v4215_v39, 5  ;;  %v633_v54 = vld [vmem:[%s4162_s30 + $0xc] sm:$0xe]  ;;  %v708_v55 = vrot.slane %v200_v49, 5 }
  0x24   : > { %2243 = vrot.lane.b32.xlu1 %v3653_v46, %s4073_s5  ;;  %v3645_v56 = vcombine.low %v702_v47, %v705_v51  ;;  %v765_v57 = vsel %vm4193_vm2, %v3446_v48, %v764_v44  ;;  %v3438_v58 = vrot.slane %v633_v54, 9  ;;  %v711_v59 = vrot.slane %v230_v50, 5  ;;  %v199_v60 = vld [vmem:[%s4162_s30 + $0xc] sm:$0xf]  ;;  %v197_v2 = vld [vmem:[%s4162_s30] sm:$0xf] }
  0x25   : > { %v768_v61 = vsel %vm4193_vm2, %v766_v52, %v767_v53  ;;  %v710_v62 = vrot.slane %v708_v55, 4  ;;  %v273_v63 = vshrl.u32 %v199_v60, 16  ;;  %v276_v0 = vshll.u32 %v199_v60, 16  ;;  %v215_v23 = vld [vmem:[%s4162_s30 + $0x6c] sm:$0xf] }
  0x26   : > { %2227 = vrot.lane.b32.xlu0 %v3645_v56, %s4073_s5  ;;  %v3654_v4 = vcombine.low %v765_v57, %v768_v61  ;;  %v709_v5 = vsel %vm4193_vm2, %v3438_v58, %v708_v55  ;;  %v282_v6 = vshll.u32 %v200_v49, 16  ;;  %v286_v8 = vshrl.u32 %v200_v49, 16  ;;  %v213_v52 = vld [vmem:[%s4162_s30 + $0x60] sm:$0xf]  ;;  %v3981_v21 = vld [vmem:[%s4162_s30 + $0x30] sm:$0xf] }
  0x27   : > { %v712_v10 = vsel %vm4193_vm2, %v710_v62, %v711_v59  ;;  %v275_v11 = vrot.slane %v273_v63, 4  ;;  %v278_v14 = vrot.slane %v276_v0, 5  ;;  %v292_v15 = vshll.u32 %v230_v50, 16 }
  0x28   : > { %2245 = vrot.lane.b32.xlu1 %v3654_v4, %s4073_s5  ;;  %v3646_v16 = vcombine.low %v709_v5, %v712_v10  ;;  %v284_v18 = vrot.slane %v282_v6, 5  ;;  %v288_v20 = vrot.slane %v286_v8, 4  ;;  %v249_v22 = vshrl.u32 %v197_v2, 16  ;;  %v3471_v4 = vld [vmem:[%s4162_s30 + $0x78] sm:$0xf] }
  0x29   : > { %v279_v24 = vor.u32 %v278_v14, %v275_v11  ;;  %v294_v25 = vrot.slane %v292_v15, 5  ;;  %v252_v26 = vshll.u32 %v197_v2, 16  ;;  %v258_v29 = vshll.u32 %v4200_v27, 16  ;;  %v4274_v10 = vld [vmem:[%s4162_s30 + $0x7c] sm:$0xf] }
  0x2a   : > { %2229 = vrot.lane.b32.xlu0 %v3646_v16, %s4073_s5  ;;  %v289_v32 = vor.u32 %v288_v20, %v284_v18  ;;  %v251_v33 = vrot.slane %v249_v22, 4  ;;  %v262_v34 = vshrl.u32 %v4200_v27, 16  ;;  %v268_v35 = vshll.u32 %v4204_v31, 16 }
  0x2b   : > { %v280_v36 = vrot.slane %v279_v24, 4  ;;  %v254_v37 = vrot.slane %v252_v26, 5  ;;  %v260_v41 = vrot.slane %v258_v29, 5  ;;  %v465_v42 = vshrl.u32 %v215_v23, 16 }
  0x2c   : > { %v290_v43 = vrot.slane %v289_v32, 4  ;;  %v264_v44 = vrot.slane %v262_v34, 4  ;;  %v270_v46 = vrot.slane %v268_v35, 5  ;;  %v468_v47 = vshll.u32 %v215_v23, 16  ;;  %v4281_v23 = vld [vmem:[%s4162_s30 + $0x18] sm:$0xf] }
  0x2d   : > { %v285_v48 = vsel %vm4251_vm5, %v280_v36, %v284_v18  ;;  %v255_v49 = vor.u32 %v254_v37, %v251_v33  ;;  %v467_v50 = vrot.slane %v465_v42, 4  ;;  %v474_v51 = vshll.u32 %v4212_v38, 16  ;;  %v4292_v35 = vld [vmem:[%s4162_s30 + $0x74] sm:$0x1] }
  0x2e   : > { %v295_v27 = vsel %vm4251_vm5, %v290_v43, %v294_v25  ;;  %v265_v31 = vor.u32 %v264_v44, %v260_v41  ;;  %v470_v53 = vrot.slane %v468_v47, 5  ;;  %v478_v54 = vshrl.u32 %v4212_v38, 16 }
  0x2f   : > { %v3630_v55 = vcombine.low %v285_v48, %v295_v27  ;;  %v256_v56 = vrot.slane %v255_v49, 4  ;;  %v476_v57 = vrot.slane %v474_v51, 5  ;;  %v484_v58 = vshll.u32 %v4215_v39, 16  ;;  %v4302_v48 = vld [vmem:[%s4162_s30 + $0x14] sm:$0x1] }
  0x30   : > { %v266_v59 = vrot.slane %v265_v31, 4  ;;  %v471_v60 = vor.u32 %v470_v53, %v467_v50  ;;  %v480_v61 = vrot.slane %v478_v54, 4  ;;  %v441_v62 = vshrl.u32 %v213_v52, 16 }
  0x31   : > { %2149 = vrot.lane.b32.xlu1 %v3630_v55, %s4074_s6  ;;  %v261_v63 = vsel %vm4251_vm5, %v256_v56, %v260_v41  ;;  %v486_v0 = vrot.slane %v484_v58, 5  ;;  %v444_v2 = vshll.u32 %v213_v52, 16  ;;  %v452_v38 = vrot.slane %v450_v28, 5 }
  0x32   : > { %v271_v39 = vsel %vm4251_vm5, %v266_v59, %v270_v46  ;;  %v472_v5 = vrot.slane %v471_v60, 4  ;;  %v481_v6 = vor.u32 %v480_v61, %v476_v57  ;;  %v443_v8 = vrot.slane %v441_v62, 4 }
  0x33   : > { %v3629_v11 = vcombine.low %v261_v63, %v271_v39  ;;  %v446_v14 = vrot.slane %v444_v2, 5  ;;  %v454_v15 = vshrl.u32 %v4179_v12, 16  ;;  %v460_v16 = vshll.u32 %v4185_v17, 16  ;;  %v4286_v12 = vld [vmem:[%s4162_s30 + $0x1c] sm:$0xf] }
  0x34   : > { %v477_v28 = vsel %vm4251_vm5, %v472_v5, %v476_v57  ;;  %v482_v18 = vrot.slane %v481_v6, 4  ;;  %v1080_v20 = vshrl.u32 %v3471_v4, 16  ;;  %v1083_v22 = vshll.u32 %v3471_v4, 16  ;;  %v4318_v57 = vld [vmem:[%s4162_s30 + $0x80] sm:$0x1] }
  0x35   : > { %2147 = vrot.lane.b32.xlu0 %v3629_v11, %s4074_s6  ;;  %v447_v24 = vor.u32 %v446_v14, %v443_v8  ;;  %v456_v25 = vrot.slane %v454_v15, 4  ;;  %v462_v26 = vrot.slane %v460_v16, 5  ;;  %v1093_v29 = vshrl.u32 %v4274_v10, 16  ;;  %v3509_v8 = vld [vmem:[%s4162_s30 + $0x6c] sm:$0xe] }
  0x36   : > { %v487_v17 = vsel %vm4251_vm5, %v482_v18, %v486_v0  ;;  %v1082_v32 = vrot.slane %v1080_v20, 4  ;;  %v1085_v33 = vrot.slane %v1083_v22, 5  ;;  %v3670_v34 = vcombine.low %v3471_v4, %v4274_v10  ;;  %v4327_v0 = vld [vmem:[%s4162_s30 + $0x20] sm:$0x1] }
  0x37   : > { %v3638_v36 = vcombine.low %v477_v28, %v487_v17  ;;  %v448_v37 = vrot.slane %v447_v24, 4  ;;  %v457_v41 = vor.u32 %v456_v25, %v452_v38  ;;  %v888_v42 = vshrl.u32 %v4281_v23, 16  ;;  %v3501_v28 = vld [vmem:[%s4162_s30 + $0xc] sm:$0xe]  ;;  %v3510_v17 = vld [vmem:[%s4162_s30 + $0x78] sm:$0xe] }
  0x38   : > { %v891_v43 = vshll.u32 %v4281_v23, 16  ;;  %v901_v44 = vshrl.u32 %v4286_v12, 16  ;;  %v3662_v46 = vcombine.low %v4281_v23, %v4286_v12  ;;  %v1067_v47 = vrot.slane %v1065_v3, 5 }
  0x39   : > { %2165 = vrot.lane.b32.xlu1 %v3638_v36, %s4074_s6  ;;  %v453_v49 = vsel %vm4251_vm5, %v448_v37, %v452_v38  ;;  %v458_v50 = vrot.slane %v457_v41, 4  ;;  %v890_v51 = vrot.slane %v888_v42, 4  ;;  %v1075_v52 = vshll.u32 %v4292_v35, 16 }
  0x3a   : > { %v893_v27 = vrot.slane %v891_v43, 5  ;;  %v1068_v31 = vsel %vm4251_vm5, %v4217_v40, %v1067_v47  ;;  %v1072_v53 = vor.u32 %v4181_v13, %v1067_v47  ;;  %v875_v3 = vrot.slane %v873_v9, 5  ;;  %v3502_v47 = vld [vmem:[%s4162_s30 + $0x18] sm:$0xe] }
  0x3b   : > { %v463_v54 = vsel %vm4251_vm5, %v458_v50, %v462_v26  ;;  %v1077_v55 = vrot.slane %v1075_v52, 5  ;;  %v883_v56 = vshll.u32 %v4302_v48, 16  ;;  %v1086_v58 = vor.u32 %v1085_v33, %v1082_v32 }
  0x3c   : > { %v3637_v59 = vcombine.low %v453_v49, %v463_v54  ;;  %v1073_v60 = vrot.slane %v1072_v53, 4  ;;  %v876_v40 = vsel %vm4251_vm5, %v4223_v45, %v875_v3  ;;  %v880_v13 = vor.u32 %v4187_v19, %v875_v3  ;;  %v4369_v53 = vld [vmem:[%s4162_s30 + $0x7c] sm:$0xf] }
  0x3d   : > { %2341 = vrot.lane.b32.xlu1 %v3670_v34, %s4072_s4  ;;  %v885_v9 = vrot.slane %v883_v56, 5  ;;  %v1087_v61 = vrot.slane %v1086_v58, 4  ;;  %v1089_v62 = vshll.u32 %v4274_v10, 16  ;;  %v1095_v63 = vrot.slane %v1093_v29, 4  ;;  %v4376_v58 = vld [vmem:[%s4162_s30 + $0x18] sm:$0xf] }
  0x3e   : > { %2163 = vrot.lane.b32.xlu0 %v3637_v59, %s4074_s6  ;;  %v1078_v2 = vsel %vm4251_vm5, %v1073_v60, %v1077_v55  ;;  %v881_v38 = vrot.slane %v880_v13, 4  ;;  %v1099_v45 = vshll.u32 %v4318_v57, 16  ;;  %v894_v19 = vor.u32 %v893_v27, %v890_v51  ;;  %v4362_v51 = vld [vmem:[%s4162_s30 + $0x78] sm:$0xf] }
  0x3f   : > { %v3685_v4 = vcombine.low %v1068_v31, %v1078_v2  ;;  %v1091_v39 = vrot.slane %v1089_v62, 5  ;;  %v897_v5 = vshll.u32 %v4286_v12, 16  ;;  %v903_v6 = vrot.slane %v901_v44, 4 }
  0x40   : > { %v886_v11 = vsel %vm4251_vm5, %v881_v38, %v885_v9  ;;  %v1101_v14 = vrot.slane %v1099_v45, 5  ;;  %v895_v15 = vrot.slane %v894_v19, 4  ;;  %v907_v16 = vshll.u32 %v4327_v0, 16  ;;  %v4382_v9 = vld [vmem:[%s4162_s30 + $0x1c] sm:$0xf] }
  0x41   : > { %2419 = vrot.lane.b32.xlu1 %v3685_v4, %s4075_s7  ;;  %v3677_v18 = vcombine.low %v876_v40, %v886_v11  ;;  %v1092_v20 = vsel %vm4251_vm5, %v1087_v61, %v1091_v39  ;;  %v1096_v22 = vor.u32 %v1095_v63, %v1091_v39  ;;  %v899_v23 = vrot.slane %v897_v5, 5  ;;  %v4397_v19 = vld [vmem:[%s4162_s30 + $0x88] sm:$0xf] }
  0x42   : > { %2325 = vrot.lane.b32.xlu0 %v3662_v46, %s4072_s4  ;;  %v909_v24 = vrot.slane %v907_v16, 5  ;;  %v3525_v25 = vrot.slane %v3509_v8, 9  ;;  %v1369_v26 = vrot.slane %v4166_v1, 5  ;;  %v1372_v29 = vrot.slane %v4292_v35, 5  ;;  %v4404_v8 = vld [vmem:[%s4162_s30 + $0x24] sm:$0xf] }
  0x43   : > { %v1097_v32 = vrot.slane %v1096_v22, 4  ;;  %v900_v33 = vsel %vm4251_vm5, %v895_v15, %v899_v23  ;;  %v904_v34 = vor.u32 %v903_v6, %v899_v23  ;;  %v3517_v36 = vrot.slane %v3501_v28, 9  ;;  %v4413_v28 = vld [vmem:[%s4162_s30 + $0x28] sm:$0xf] }
  0x44   : > { %v1370_v37 = vsel %vm4193_vm2, %v3525_v25, %v1369_v26  ;;  %v1371_v41 = vrot.slane %v1369_v26, 4  ;;  %v1313_v42 = vrot.slane %v4173_v7, 5  ;;  %v1316_v43 = vrot.slane %v4302_v48, 5 }
  0x45   : > { %v1102_v1 = vsel %vm4251_vm5, %v1097_v32, %v1101_v14  ;;  %v905_v35 = vrot.slane %v904_v34, 4  ;;  %v3526_v44 = vrot.slane %v3510_v17, 9  ;;  %v1376_v46 = vrot.slane %v4274_v10, 5 }
  0x46   : > { %2403 = vrot.lane.b32.xlu0 %v3677_v18, %s4075_s7  ;;  %v3686_v49 = vcombine.low %v1092_v20, %v1102_v1  ;;  %v1373_v50 = vsel %vm4193_vm2, %v1371_v41, %v1372_v29  ;;  %v1314_v7 = vsel %vm4193_vm2, %v3517_v36, %v1313_v42  ;;  %v1315_v48 = vrot.slane %v1313_v42, 4 }
  0x47   : > { %v910_v52 = vsel %vm4251_vm5, %v905_v35, %v909_v24  ;;  %v3701_v27 = vcombine.low %v1370_v37, %v1373_v50  ;;  %v1377_v10 = vsel %vm4193_vm2, %v3526_v44, %v1376_v46  ;;  %v1378_v31 = vrot.slane %v1376_v46, 4  ;;  %v4418_v24 = vld [vmem:[%s4162_s30 + $0x80] sm:$0x1] }
  0x48   : > { %2421 = vrot.lane.b32.xlu1 %v3686_v49, %s4075_s7  ;;  %v3678_v3 = vcombine.low %v900_v33, %v910_v52  ;;  %v1317_v54 = vsel %vm4193_vm2, %v1315_v48, %v1316_v43  ;;  %v1379_v55 = vrot.slane %v4318_v57, 5  ;;  %v3518_v56 = vrot.slane %v3502_v47, 9  ;;  %v4429_v37 = vld [vmem:[%s4162_s30 + $0x20] sm:$0x1] }
  0x49   : > { %v3693_v59 = vcombine.low %v1314_v7, %v1317_v54  ;;  %v1320_v60 = vrot.slane %v4286_v12, 5  ;;  %v1323_v40 = vrot.slane %v4327_v0, 5  ;;  %v1668_v13 = vshrl.u32 %v4362_v51, 16  ;;  %v4392_v12 = vld [vmem:[%s4162_s30 + $0x84] sm:$0xf] }
  0x4a   : > { %2405 = vrot.lane.b32.xlu0 %v3678_v3, %s4075_s7  ;;  %v1380_v61 = vsel %vm4193_vm2, %v1378_v31, %v1379_v55  ;;  %v1671_v57 = vshll.u32 %v4362_v51, 16  ;;  %v1681_v62 = vshrl.u32 %v4369_v53, 16  ;;  %v3717_v63 = vcombine.low %v4362_v51, %v4369_v53 }
  0x4b   : > { %v3702_v0 = vcombine.low %v1377_v10, %v1380_v61  ;;  %v1321_v2 = vsel %vm4193_vm2, %v3518_v56, %v1320_v60  ;;  %v1322_v38 = vrot.slane %v1320_v60, 4  ;;  %v1670_v45 = vrot.slane %v1668_v13, 4 }
  0x4c   : > { %2499 = vrot.lane.b32.xlu1 %v3701_v27, %s4076_s8  ;;  %v1673_v4 = vrot.slane %v1671_v57, 5  ;;  %v1476_v39 = vshrl.u32 %v4376_v58, 16  ;;  %v1479_v5 = vshll.u32 %v4376_v58, 16  ;;  %v1489_v6 = vshrl.u32 %v4382_v9, 16  ;;  %v4438_v27 = vld [vmem:[%s4162_s30 + $0x8c] sm:$0x1] }
  0x4d   : > { %v1324_v11 = vsel %vm4193_vm2, %v1322_v38, %v1323_v40  ;;  %v3709_v14 = vcombine.low %v4376_v58, %v4382_v9  ;;  %v1692_v15 = vshrl.u32 %v4392_v12, 16  ;;  %v1695_v16 = vshll.u32 %v4392_v12, 16  ;;  %v4448_v57 = vld [vmem:[%s4162_s30 + $0x2c] sm:$0x1] }
  0x4e   : > { %2483 = vrot.lane.b32.xlu0 %v3693_v59, %s4076_s8  ;;  %v3694_v18 = vcombine.low %v1321_v2, %v1324_v11  ;;  %v1478_v20 = vrot.slane %v1476_v39, 4  ;;  %v1481_v22 = vrot.slane %v1479_v5, 5  ;;  %v1705_v23 = vshrl.u32 %v4397_v19, 16 }
  0x4f   : > { %v1694_v25 = vrot.slane %v1692_v15, 4  ;;  %v1697_v26 = vrot.slane %v1695_v16, 5  ;;  %v3718_v29 = vcombine.low %v4392_v12, %v4397_v19  ;;  %v1500_v17 = vshrl.u32 %v4404_v8, 16  ;;  %v3581_v16 = vld [vmem:[%s4162_s30 + $0x18] sm:$0xe] }
  0x50   : > { %2501 = vrot.lane.b32.xlu1 %v3702_v0, %s4076_s8  ;;  %v1503_v32 = vshll.u32 %v4404_v8, 16  ;;  %v1513_v33 = vshrl.u32 %v4413_v28, 16  ;;  %v3710_v34 = vcombine.low %v4404_v8, %v4413_v28  ;;  %v1674_v36 = vor.u32 %v1673_v4, %v1670_v45  ;;  %v3589_v45 = vld [vmem:[%s4162_s30 + $0x78] sm:$0xe] }
  0x51   : > { %v1502_v41 = vrot.slane %v1500_v17, 4  ;;  %v1677_v42 = vshll.u32 %v4369_v53, 16  ;;  %v1683_v43 = vrot.slane %v1681_v62, 4  ;;  %v1687_v1 = vshll.u32 %v4418_v24, 16 }
  0x52   : > { %2485 = vrot.lane.b32.xlu0 %v3694_v18, %s4076_s8  ;;  %v1505_v35 = vrot.slane %v1503_v32, 5  ;;  %v1675_v44 = vrot.slane %v1674_v36, 4  ;;  %v1482_v46 = vor.u32 %v1481_v22, %v1478_v20  ;;  %v1485_v47 = vshll.u32 %v4382_v9, 16 }
  0x53   : > { %v1679_v49 = vrot.slane %v1677_v42, 5  ;;  %v1689_v50 = vrot.slane %v1687_v1, 5  ;;  %v1491_v7 = vrot.slane %v1489_v6, 4  ;;  %v1495_v48 = vshll.u32 %v4429_v37, 16  ;;  %v4472_v42 = vld [vmem:[%s4162_s30 + $0x7c] sm:$0xf] }
  0x54   : > { %2595 = vrot.lane.b32.xlu1 %v3717_v63, %s4077_s9  ;;  %v1483_v51 = vrot.slane %v1482_v46, 4  ;;  %v1487_v52 = vrot.slane %v1485_v47, 5  ;;  %v1698_v10 = vor.u32 %v1697_v26, %v1694_v25  ;;  %v1701_v31 = vshll.u32 %v4397_v19, 16  ;;  %v217_v25 = vld [vmem:[%s4162_s30 + $0x78] sm:$0xf] }
  0x55   : > { %v1680_v3 = vsel %vm4251_vm5, %v1675_v44, %v1679_v49  ;;  %v1684_v54 = vor.u32 %v1683_v43, %v1679_v49  ;;  %v1497_v55 = vrot.slane %v1495_v48, 5  ;;  %v1707_v56 = vrot.slane %v1705_v23, 4  ;;  %v4483_v46 = vld [vmem:[%s4162_s30 + $0x80] sm:$0x1]  ;;  %v201_v49 = vld [vmem:[%s4162_s30 + $0x18] sm:$0xf] }
  0x56   : > { %2579 = vrot.lane.b32.xlu0 %v3709_v14, %s4077_s9  ;;  %v1488_v58 = vsel %vm4251_vm5, %v1483_v51, %v1487_v52  ;;  %v1492_v59 = vor.u32 %v1491_v7, %v1487_v52  ;;  %v1699_v60 = vrot.slane %v1698_v10, 4  ;;  %v1703_v40 = vrot.slane %v1701_v31, 5  ;;  %v4491_v51 = vld [vmem:[%s4162_s30 + $0x1c] sm:$0xf] }
  0x57   : > { %v1685_v13 = vrot.slane %v1684_v54, 4  ;;  %v1711_v61 = vshll.u32 %v4438_v27, 16  ;;  %v1506_v62 = vor.u32 %v1505_v35, %v1502_v41  ;;  %v1509_v63 = vshll.u32 %v4413_v28, 16  ;;  %v4497_v54 = vld [vmem:[%s4162_s30 + $0x20] sm:$0x1] }
  0x58   : > { %2597 = vrot.lane.b32.xlu1 %v3718_v29, %s4077_s9  ;;  %v1493_v12 = vrot.slane %v1492_v59, 4  ;;  %v1704_v0 = vsel %vm4251_vm5, %v1699_v60, %v1703_v40  ;;  %v1708_v2 = vor.u32 %v1707_v56, %v1703_v40  ;;  %v1515_v38 = vrot.slane %v1513_v33, 4 }
  0x59   : > { %v1690_v4 = vsel %vm4251_vm5, %v1685_v13, %v1689_v50  ;;  %v1713_v39 = vrot.slane %v1711_v61, 5  ;;  %v1507_v5 = vrot.slane %v1506_v62, 4  ;;  %v1511_v6 = vrot.slane %v1509_v63, 5  ;;  %v3590_v62 = vld [vmem:[%s4162_s30 + $0x84] sm:$0xe] }
  0x5a   : > { %2581 = vrot.lane.b32.xlu0 %v3710_v34, %s4077_s9  ;;  %v3733_v8 = vcombine.low %v1680_v3, %v1690_v4  ;;  %v1498_v11 = vsel %vm4251_vm5, %v1493_v12, %v1497_v55  ;;  %v1709_v14 = vrot.slane %v1708_v2, 4  ;;  %v1519_v15 = vshll.u32 %v4448_v57, 16 }
  0x5b   : > { %v3725_v18 = vcombine.low %v1488_v58, %v1498_v11  ;;  %v1512_v20 = vsel %vm4251_vm5, %v1507_v5, %v1511_v6  ;;  %v1516_v22 = vor.u32 %v1515_v38, %v1511_v6  ;;  %v3605_v23 = vrot.slane %v3589_v45, 9  ;;  %v3582_v5 = vld [vmem:[%s4162_s30 + $0x24] sm:$0xe] }
  0x5c   : > { %2675 = vrot.lane.b32.xlu1 %v3733_v8, %s4078_s10  ;;  %v1714_v26 = vsel %vm4251_vm5, %v1709_v14, %v1713_v39  ;;  %v1521_v29 = vrot.slane %v1519_v15, 5  ;;  %v1981_v17 = vrot.slane %v4369_v53, 5  ;;  %v1984_v32 = vrot.slane %v4418_v24, 5 }
  0x5d   : > { %v3734_v33 = vcombine.low %v1704_v0, %v1714_v26  ;;  %v1517_v34 = vrot.slane %v1516_v22, 4  ;;  %v3597_v36 = vrot.slane %v3581_v16, 9  ;;  %v1925_v41 = vrot.slane %v4382_v9, 5  ;;  %v219_v22 = vld [vmem:[%s4162_s30 + $0x84] sm:$0xf] }
  0x5e   : > { %2659 = vrot.lane.b32.xlu0 %v3725_v18, %s4078_s10  ;;  %v1982_v43 = vsel %vm4193_vm2, %v3605_v23, %v1981_v17  ;;  %v1983_v1 = vrot.slane %v1981_v17, 4  ;;  %v1928_v35 = vrot.slane %v4429_v37, 5  ;;  %v489_v53 = vshrl.u32 %v217_v25, 16 }
  0x5f   : > { %v1522_v24 = vsel %vm4251_vm5, %v1517_v34, %v1521_v29  ;;  %v1926_v44 = vsel %vm4193_vm2, %v3597_v36, %v1925_v41  ;;  %v1927_v9 = vrot.slane %v1925_v41, 4  ;;  %v492_v47 = vshll.u32 %v217_v25, 16  ;;  %v4520_v34 = vld [vmem:[%s4162_s30 + $0x88] sm:$0xf] }
  0x60   : > { %2677 = vrot.lane.b32.xlu1 %v3734_v33, %s4078_s10  ;;  %v3726_v50 = vcombine.low %v1512_v20, %v1522_v24  ;;  %v1985_v7 = vsel %vm4193_vm2, %v1983_v1, %v1984_v32  ;;  %v491_v37 = vrot.slane %v489_v53, 4  ;;  %v498_v48 = vshll.u32 %v4472_v42, 16  ;;  %v203_v24 = vld [vmem:[%s4162_s30 + $0x24] sm:$0xf] }
  0x61   : > { %v3749_v52 = vcombine.low %v1982_v43, %v1985_v7  ;;  %v1929_v10 = vsel %vm4193_vm2, %v1927_v9, %v1928_v35  ;;  %v494_v31 = vrot.slane %v492_v47, 5  ;;  %v502_v3 = vshrl.u32 %v4472_v42, 16  ;;  %v4525_v43 = vld [vmem:[%s4162_s30 + $0x8c] sm:$0x1] }
  0x62   : > { %2661 = vrot.lane.b32.xlu0 %v3726_v50, %s4078_s10  ;;  %v3741_v55 = vcombine.low %v1926_v44, %v1929_v10  ;;  %v500_v56 = vrot.slane %v498_v48, 5  ;;  %v508_v58 = vshll.u32 %v4483_v46, 16  ;;  %v297_v59 = vshrl.u32 %v201_v49, 16  ;;  %v4537_v50 = vld [vmem:[%s4162_s30 + $0x28] sm:$0xf] }
  0x63   : > { %v495_v60 = vor.u32 %v494_v31, %v491_v37  ;;  %v504_v40 = vrot.slane %v502_v3, 4  ;;  %v300_v13 = vshll.u32 %v201_v49, 16  ;;  %v306_v61 = vshll.u32 %v4491_v51, 16  ;;  %v4544_v10 = vld [vmem:[%s4162_s30 + $0x2c] sm:$0x1] }
  0x64   : > { %2755 = vrot.lane.b32.xlu1 %v3749_v52, %s4079_s11  ;;  %v510_v63 = vrot.slane %v508_v58, 5  ;;  %v299_v12 = vrot.slane %v297_v59, 4  ;;  %v310_v0 = vshrl.u32 %v4491_v51, 16  ;;  %v316_v2 = vshll.u32 %v4497_v54, 16  ;;  %v642_v58 = vld [vmem:[%s4162_s30 + $0x78] sm:$0xe] }
  0x65   : > { %v496_v38 = vrot.slane %v495_v60, 4  ;;  %v505_v45 = vor.u32 %v504_v40, %v500_v56  ;;  %v302_v4 = vrot.slane %v300_v13, 5  ;;  %v308_v39 = vrot.slane %v306_v61, 5 }
  0x66   : > { %2739 = vrot.lane.b32.xlu0 %v3741_v55, %s4079_s11  ;;  %v312_v6 = vrot.slane %v310_v0, 4  ;;  %v318_v8 = vrot.slane %v316_v2, 5  ;;  %v3606_v11 = vrot.slane %v3590_v62, 9  ;;  %v1988_v14 = vrot.slane %v4397_v19, 5  ;;  %v634_v0 = vld [vmem:[%s4162_s30 + $0x18] sm:$0xe] }
  0x67   : > { %v501_v15 = vsel %vm4251_vm5, %v496_v38, %v500_v56  ;;  %v506_v16 = vrot.slane %v505_v45, 4  ;;  %v303_v18 = vor.u32 %v302_v4, %v299_v12  ;;  %v1991_v20 = vrot.slane %v4438_v27, 5 }
  0x68   : > { %v313_v23 = vor.u32 %v312_v6, %v308_v39  ;;  %v1989_v25 = vsel %vm4193_vm2, %v3606_v11, %v1988_v14  ;;  %v1990_v26 = vrot.slane %v1988_v14, 4  ;;  %v3598_v29 = vrot.slane %v3582_v5, 9 }
  0x69   : > { %v511_v17 = vsel %vm4251_vm5, %v506_v16, %v510_v63  ;;  %v304_v19 = vrot.slane %v303_v18, 4  ;;  %v1932_v32 = vrot.slane %v4413_v28, 5  ;;  %v1935_v33 = vrot.slane %v4448_v57, 5  ;;  %v643_v18 = vld [vmem:[%s4162_s30 + $0x84] sm:$0xe] }
  0x6a   : > { %v3639_v27 = vcombine.low %v501_v15, %v511_v17  ;;  %v314_v36 = vrot.slane %v313_v23, 4  ;;  %v1992_v41 = vsel %vm4193_vm2, %v1990_v26, %v1991_v20  ;;  %v513_v1 = vshrl.u32 %v219_v22, 16 }
  0x6b   : > { %v309_v35 = vsel %vm4251_vm5, %v304_v19, %v308_v39  ;;  %v3750_v53 = vcombine.low %v1989_v25, %v1992_v41  ;;  %v1933_v28 = vsel %vm4193_vm2, %v3598_v29, %v1932_v32  ;;  %v1934_v57 = vrot.slane %v1932_v32, 4 }
  0x6c   : > { %2167 = vrot.lane.b32.xlu1 %v3639_v27, %s4074_s6  ;;  %v319_v44 = vsel %vm4251_vm5, %v314_v36, %v318_v8  ;;  %v515_v9 = vrot.slane %v513_v1, 4  ;;  %v516_v47 = vshll.u32 %v219_v22, 16  ;;  %v522_v49 = vshll.u32 %v4520_v34, 16 }
  0x6d   : > { %v3631_v7 = vcombine.low %v309_v35, %v319_v44  ;;  %v1936_v37 = vsel %vm4193_vm2, %v1934_v57, %v1935_v33  ;;  %v526_v48 = vshrl.u32 %v4520_v34, 16  ;;  %v532_v52 = vshll.u32 %v4525_v43, 16 }
  0x6e   : > { %v3742_v31 = vcombine.low %v1933_v28, %v1936_v37  ;;  %v518_v3 = vrot.slane %v516_v47, 5  ;;  %v524_v55 = vrot.slane %v522_v49, 5  ;;  %v321_v56 = vshrl.u32 %v203_v24, 16 }
  0x6f   : > { %2151 = vrot.lane.b32.xlu0 %v3631_v7, %s4074_s6  ;;  %v528_v59 = vrot.slane %v526_v48, 4  ;;  %v534_v60 = vrot.slane %v532_v52, 5  ;;  %v324_v40 = vshll.u32 %v203_v24, 16  ;;  %v330_v13 = vshll.u32 %v4537_v50, 16  ;;  %v4581_v24 = vld [vmem:[%s4162_s30 + $0x88] sm:$0xf] }
  0x70   : > { %2757 = vrot.lane.b32.xlu1 %v3750_v53, %s4079_s11  ;;  %v519_v61 = vor.u32 %v518_v3, %v515_v9  ;;  %v323_v62 = vrot.slane %v321_v56, 4  ;;  %v334_v63 = vshrl.u32 %v4537_v50, 16  ;;  %v340_v12 = vshll.u32 %v4544_v10, 16  ;;  %v4588_v7 = vld [vmem:[%s4162_s30 + $0x24] sm:$0xf] }
  0x71   : > { %v529_v2 = vor.u32 %v528_v59, %v524_v55  ;;  %v326_v38 = vrot.slane %v324_v40, 5  ;;  %v332_v45 = vrot.slane %v330_v13, 5  ;;  %v3447_v4 = vrot.slane %v642_v58, 9  ;;  %v4599_v3 = vld [vmem:[%s4162_s30 + $0x28] sm:$0xf] }
  0x72   : > { %v520_v39 = vrot.slane %v519_v61, 4  ;;  %v336_v5 = vrot.slane %v334_v63, 4  ;;  %v342_v6 = vrot.slane %v340_v12, 5  ;;  %v771_v8 = vrot.slane %v4472_v42, 5  ;;  %v4609_v40 = vld [vmem:[%s4162_s30 + $0x94] sm:$0xf] }
  0x73   : > { %2741 = vrot.lane.b32.xlu0 %v3742_v31, %s4079_s11  ;;  %v530_v11 = vrot.slane %v529_v2, 4  ;;  %v327_v14 = vor.u32 %v326_v38, %v323_v62  ;;  %v774_v15 = vrot.slane %v4483_v46, 5  ;;  %v3439_v16 = vrot.slane %v634_v0, 9  ;;  %v635_v46 = vld [vmem:[%s4162_s30 + $0x24] sm:$0xe] }
  0x74   : > { %v525_v20 = vsel %vm4251_vm5, %v520_v39, %v524_v55  ;;  %v337_v22 = vor.u32 %v336_v5, %v332_v45  ;;  %v772_v23 = vsel %vm4193_vm2, %v3447_v4, %v771_v8  ;;  %v773_v25 = vrot.slane %v771_v8, 4  ;;  %v4615_v12 = vld [vmem:[%s4162_s30 + $0x30] sm:$0xf]  ;;  %v4618_v0 = vld [vmem:[%s4162_s30 + $0x34] sm:$0xf] }
  0x75   : > { %v535_v42 = vsel %vm4251_vm5, %v530_v11, %v534_v60  ;;  %v328_v26 = vrot.slane %v327_v14, 4  ;;  %v715_v29 = vrot.slane %v4491_v51, 5  ;;  %v718_v17 = vrot.slane %v4497_v54, 5  ;;  %v4573_v51 = vld [vmem:[%s4162_s30 + $0x84] sm:$0xf] }
  0x76   : > { %v3640_v19 = vcombine.low %v525_v20, %v535_v42  ;;  %v338_v32 = vrot.slane %v337_v22, 4  ;;  %v775_v33 = vsel %vm4193_vm2, %v773_v25, %v774_v15  ;;  %v3448_v27 = vrot.slane %v643_v18, 9  ;;  %v3475_v60 = vld [vmem:[%s4162_s30 + $0x90] sm:$0xf]  ;;  %v4631_v18 = vld [vmem:[%s4162_s30 + $0x8c] sm:$0x1] }
  0x77   : > { %v333_v36 = vsel %vm4251_vm5, %v328_v26, %v332_v45  ;;  %v3655_v41 = vcombine.low %v772_v23, %v775_v33  ;;  %v716_v1 = vsel %vm4193_vm2, %v3439_v16, %v715_v29  ;;  %v717_v35 = vrot.slane %v715_v29, 4  ;;  %v4636_v42 = vld [vmem:[%s4162_s30 + $0x2c] sm:$0x1] }
  0x78   : > { %2169 = vrot.lane.b32.xlu1 %v3640_v19, %s4074_s6  ;;  %v343_v54 = vsel %vm4251_vm5, %v338_v32, %v342_v6  ;;  %v778_v53 = vrot.slane %v4520_v34, 5  ;;  %v781_v28 = vrot.slane %v4525_v43, 5  ;;  %v3440_v57 = vrot.slane %v635_v46, 9 }
  0x79   : > { %v3632_v44 = vcombine.low %v333_v36, %v343_v54  ;;  %v719_v9 = vsel %vm4193_vm2, %v717_v35, %v718_v17  ;;  %v722_v47 = vrot.slane %v4537_v50, 5  ;;  %v725_v49 = vrot.slane %v4544_v10, 5 }
  0x7a   : > { %v3647_v37 = vcombine.low %v716_v1, %v719_v9  ;;  %v779_v34 = vsel %vm4193_vm2, %v3448_v27, %v778_v53  ;;  %v780_v43 = vrot.slane %v778_v53, 4  ;;  %v1104_v48 = vshrl.u32 %v4573_v51, 16 }
  0x7b   : > { %2153 = vrot.lane.b32.xlu0 %v3632_v44, %s4074_s6  ;;  %v723_v52 = vsel %vm4193_vm2, %v3440_v57, %v722_v47  ;;  %v724_v50 = vrot.slane %v722_v47, 4  ;;  %v1107_v10 = vshll.u32 %v4573_v51, 16  ;;  %v1117_v31 = vshrl.u32 %v4581_v24, 16 }
  0x7c   : > { %2247 = vrot.lane.b32.xlu1 %v3655_v41, %s4073_s5  ;;  %v782_v55 = vsel %vm4193_vm2, %v780_v43, %v781_v28  ;;  %v1106_v56 = vrot.slane %v1104_v48, 4  ;;  %v3671_v58 = vcombine.low %v4573_v51, %v4581_v24  ;;  %v912_v59 = vshrl.u32 %v4588_v7, 16  ;;  %v4645_v28 = vld [vmem:[%s4162_s30 + $0x98] sm:$0x1] }
  0x7d   : > { %v3656_v13 = vcombine.low %v779_v34, %v782_v55  ;;  %v726_v61 = vsel %vm4193_vm2, %v724_v50, %v725_v49  ;;  %v1109_v62 = vrot.slane %v1107_v10, 5  ;;  %v915_v63 = vshll.u32 %v4588_v7, 16  ;;  %v4656_v50 = vld [vmem:[%s4162_s30 + $0x38] sm:$0x1] }
  0x7e   : > { %v3648_v2 = vcombine.low %v723_v52, %v726_v61  ;;  %v914_v38 = vrot.slane %v912_v59, 4  ;;  %v925_v45 = vshrl.u32 %v4599_v3, 16  ;;  %v3663_v4 = vcombine.low %v4588_v7, %v4599_v3 }
  0x7f   : > { %2231 = vrot.lane.b32.xlu0 %v3647_v37, %s4073_s5  ;;  %v917_v39 = vrot.slane %v915_v63, 5  ;;  %v1128_v5 = vshrl.u32 %v3475_v60, 16  ;;  %v1131_v6 = vshll.u32 %v3475_v60, 16  ;;  %v1141_v8 = vshrl.u32 %v4609_v40, 16 }
  0x80   : > { %2249 = vrot.lane.b32.xlu1 %v3656_v13, %s4073_s5  ;;  %v3672_v11 = vcombine.low %v3475_v60, %v4609_v40  ;;  %v936_v14 = vshrl.u32 %v4615_v12, 16  ;;  %v939_v15 = vshll.u32 %v4615_v12, 16  ;;  %v949_v16 = vshrl.u32 %v4618_v0, 16  ;;  %v3511_v60 = vld [vmem:[%s4162_s30 + $0x84] sm:$0xe] }
  0x81   : > { %v1130_v20 = vrot.slane %v1128_v5, 4  ;;  %v1133_v22 = vrot.slane %v1131_v6, 5  ;;  %v3664_v23 = vcombine.low %v4615_v12, %v4618_v0  ;;  %v1110_v25 = vor.u32 %v1109_v62, %v1106_v56 }
  0x82   : > { %v938_v26 = vrot.slane %v936_v14, 4  ;;  %v941_v29 = vrot.slane %v939_v15, 5  ;;  %v1113_v17 = vshll.u32 %v4581_v24, 16  ;;  %v1119_v46 = vrot.slane %v1117_v31, 4 }
  0x83   : > { %2233 = vrot.lane.b32.xlu0 %v3648_v2, %s4073_s5  ;;  %v1111_v19 = vrot.slane %v1110_v25, 4  ;;  %v1123_v32 = vshll.u32 %v4631_v18, 16  ;;  %v918_v33 = vor.u32 %v917_v39, %v914_v38  ;;  %v921_v27 = vshll.u32 %v4599_v3, 16 }
  0x84   : > { %2343 = vrot.lane.b32.xlu1 %v3671_v58, %s4072_s4  ;;  %v1115_v36 = vrot.slane %v1113_v17, 5  ;;  %v927_v41 = vrot.slane %v925_v45, 4  ;;  %v931_v1 = vshll.u32 %v4636_v42, 16  ;;  %v1134_v35 = vor.u32 %v1133_v22, %v1130_v20 }
  0x85   : > { %v1125_v51 = vrot.slane %v1123_v32, 5  ;;  %v919_v54 = vrot.slane %v918_v33, 4  ;;  %v923_v53 = vrot.slane %v921_v27, 5  ;;  %v1137_v57 = vshll.u32 %v4609_v40, 16  ;;  %v4689_v27 = vld [vmem:[%s4162_s30 + $0x90] sm:$0xf] }
  0x86   : > { %v1116_v44 = vsel %vm4251_vm5, %v1111_v19, %v1115_v36  ;;  %v1120_v9 = vor.u32 %v1119_v46, %v1115_v36  ;;  %v933_v47 = vrot.slane %v931_v1, 5  ;;  %v1135_v49 = vrot.slane %v1134_v35, 4  ;;  %v4696_v35 = vld [vmem:[%s4162_s30 + $0x94] sm:$0xf] }
  0x87   : > { %2327 = vrot.lane.b32.xlu0 %v3663_v4, %s4072_s4  ;;  %v924_v7 = vsel %vm4251_vm5, %v919_v54, %v923_v53  ;;  %v928_v37 = vor.u32 %v927_v41, %v923_v53  ;;  %v1139_v34 = vrot.slane %v1137_v57, 5  ;;  %v1143_v43 = vrot.slane %v1141_v8, 4  ;;  %v3503_v4 = vld [vmem:[%s4162_s30 + $0x24] sm:$0xe]  ;;  %v4703_v57 = vld [vmem:[%s4162_s30 + $0x30] sm:$0xf] }
  0x88   : > { %2345 = vrot.lane.b32.xlu1 %v3672_v11, %s4072_s4  ;;  %v1121_v48 = vrot.slane %v1120_v9, 4  ;;  %v1147_v52 = vshll.u32 %v4645_v28, 16  ;;  %v942_v10 = vor.u32 %v941_v29, %v938_v26  ;;  %v945_v31 = vshll.u32 %v4618_v0, 16  ;;  %v3512_v11 = vld [vmem:[%s4162_s30 + $0x90] sm:$0xe] }
  0x89   : > { %v929_v55 = vrot.slane %v928_v37, 4  ;;  %v1140_v56 = vsel %vm4251_vm5, %v1135_v49, %v1139_v34  ;;  %v1144_v58 = vor.u32 %v1143_v43, %v1139_v34  ;;  %v951_v59 = vrot.slane %v949_v16, 4  ;;  %v3504_v29 = vld [vmem:[%s4162_s30 + $0x30] sm:$0xe]  ;;  %v4710_v49 = vld [vmem:[%s4162_s30 + $0x34] sm:$0xf] }
  0x8a   : > { %v1126_v13 = vsel %vm4251_vm5, %v1121_v48, %v1125_v51  ;;  %v1149_v61 = vrot.slane %v1147_v52, 5  ;;  %v943_v62 = vrot.slane %v942_v10, 4  ;;  %v947_v63 = vrot.slane %v945_v31, 5 }
  0x8b   : > { %2329 = vrot.lane.b32.xlu0 %v3664_v23, %s4072_s4  ;;  %v3687_v12 = vcombine.low %v1116_v44, %v1126_v13  ;;  %v934_v2 = vsel %vm4251_vm5, %v929_v55, %v933_v47  ;;  %v1145_v38 = vrot.slane %v1144_v58, 4  ;;  %v955_v45 = vshll.u32 %v4656_v50, 16  ;;  %v4727_v55 = vld [vmem:[%s4162_s30 + $0xa0] sm:$0xf]  ;;  %v4733_v13 = vld [vmem:[%s4162_s30 + $0x3c] sm:$0xf] }
  0x8c   : > { %v3679_v39 = vcombine.low %v924_v7, %v934_v2  ;;  %v948_v5 = vsel %vm4251_vm5, %v943_v62, %v947_v63  ;;  %v952_v6 = vor.u32 %v951_v59, %v947_v63  ;;  %v3527_v8 = vrot.slane %v3511_v60, 9  ;;  %v4743_v2 = vld [vmem:[%s4162_s30 + $0x40] sm:$0xf] }
  0x8d   : > { %2423 = vrot.lane.b32.xlu1 %v3687_v12, %s4075_s7  ;;  %v1150_v14 = vsel %vm4251_vm5, %v1145_v38, %v1149_v61  ;;  %v957_v15 = vrot.slane %v955_v45, 5  ;;  %v1383_v16 = vrot.slane %v4581_v24, 5  ;;  %v1386_v20 = vrot.slane %v4631_v18, 5 }
  0x8e   : > { %v3688_v22 = vcombine.low %v1140_v56, %v1150_v14  ;;  %v953_v23 = vrot.slane %v952_v6, 4  ;;  %v3519_v25 = vrot.slane %v3503_v4, 9  ;;  %v1327_v26 = vrot.slane %v4599_v3, 5  ;;  %v4712_v7 = vpop.permute.xlu1 %2339 }
  0x8f   : > { %2407 = vrot.lane.b32.xlu0 %v3679_v39, %s4075_s7  ;;  %v1384_v17 = vsel %vm4193_vm2, %v3527_v8, %v1383_v16  ;;  %v1385_v46 = vrot.slane %v1383_v16, 4  ;;  %v1330_v19 = vrot.slane %v4636_v42, 5  ;;  %v3528_v32 = vrot.slane %v3512_v11, 9 }
  0x90   : > { %v958_v24 = vsel %vm4251_vm5, %v953_v23, %v957_v15  ;;  %v1328_v18 = vsel %vm4193_vm2, %v3519_v25, %v1327_v26  ;;  %v1329_v33 = vrot.slane %v1327_v26, 4  ;;  %v1390_v3 = vrot.slane %v4609_v40, 5  ;;  %v4749_v6 = vpop.permute.xlu0 %2323  ;;  %v4762_v26 = vld [vmem:[%s4162_s30 + $0x38] sm:$0x1] }
  0x91   : > { %2425 = vrot.lane.b32.xlu1 %v3688_v22, %s4075_s7  ;;  %v3680_v36 = vcombine.low %v948_v5, %v958_v24  ;;  %v1387_v42 = vsel %vm4193_vm2, %v1385_v46, %v1386_v20  ;;  %v1393_v41 = vrot.slane %v4645_v28, 5  ;;  %v3520_v1 = vrot.slane %v3504_v29, 9  ;;  %v4747_v5 = vld [vmem:[%s4162_s30 + $0x98] sm:$0x1] }
  0x92   : > { %v3703_v51 = vcombine.low %v1384_v17, %v1387_v42  ;;  %v1331_v54 = vsel %vm4193_vm2, %v1329_v33, %v1330_v19  ;;  %v1391_v40 = vsel %vm4193_vm2, %v3528_v32, %v1390_v3  ;;  %v1392_v53 = vrot.slane %v1390_v3, 4 }
  0x93   : > { %2409 = vrot.lane.b32.xlu0 %v3680_v36, %s4075_s7  ;;  %v3695_v44 = vcombine.low %v1328_v18, %v1331_v54  ;;  %v1334_v28 = vrot.slane %v4618_v0, 5  ;;  %v1337_v9 = vrot.slane %v4656_v50, 5  ;;  %v1716_v47 = vshrl.u32 %v4689_v27, 16  ;;  %v4721_v0 = vld [vmem:[%s4162_s30 + $0x9c] sm:$0xf] }
  0x94   : > { %v1394_v37 = vsel %vm4193_vm2, %v1392_v53, %v1393_v41  ;;  %v1719_v34 = vshll.u32 %v4689_v27, 16  ;;  %v1729_v43 = vshrl.u32 %v4696_v35, 16  ;;  %v3719_v48 = vcombine.low %v4689_v27, %v4696_v35 }
  0x95   : > { %2503 = vrot.lane.b32.xlu1 %v3703_v51, %s4076_s8  ;;  %v3704_v52 = vcombine.low %v1391_v40, %v1394_v37  ;;  %v1335_v50 = vsel %vm4193_vm2, %v3520_v1, %v1334_v28  ;;  %v1336_v10 = vrot.slane %v1334_v28, 4  ;;  %v1718_v31 = vrot.slane %v1716_v47, 4  ;;  %v4771_v51 = vld [vmem:[%s4162_s30 + $0xa4] sm:$0x1] }
  0x96   : > { %v1721_v56 = vrot.slane %v1719_v34, 5  ;;  %v1524_v58 = vshrl.u32 %v4703_v57, 16  ;;  %v1527_v59 = vshll.u32 %v4703_v57, 16  ;;  %v1537_v60 = vshrl.u32 %v4710_v49, 16  ;;  %v4755_v16 = vpop.permute.xlu1 %2243 }
  0x97   : > { %2487 = vrot.lane.b32.xlu0 %v3695_v44, %s4076_s8  ;;  %v1338_v61 = vsel %vm4193_vm2, %v1336_v10, %v1337_v9  ;;  %v3711_v62 = vcombine.low %v4703_v57, %v4710_v49  ;;  %v1740_v63 = vshrl.u32 %v4721_v0, 16  ;;  %v1743_v12 = vshll.u32 %v4721_v0, 16 }
  0x98   : > { %v3696_v38 = vcombine.low %v1335_v50, %v1338_v61  ;;  %v1526_v45 = vrot.slane %v1524_v58, 4  ;;  %v1529_v4 = vrot.slane %v1527_v59, 5  ;;  %v1753_v39 = vshrl.u32 %v4727_v55, 16  ;;  %v4774_v53 = vpop.permute.xlu0 %2227  ;;  %v4786_v50 = vld [vmem:[%s4162_s30 + $0x44] sm:$0x1] }
  0x99   : > { %2505 = vrot.lane.b32.xlu1 %v3704_v52, %s4076_s8  ;;  %v1742_v8 = vrot.slane %v1740_v63, 4  ;;  %v1745_v11 = vrot.slane %v1743_v12, 5  ;;  %v3720_v14 = vcombine.low %v4721_v0, %v4727_v55  ;;  %v1548_v15 = vshrl.u32 %v4733_v13, 16 }
  0x9a   : > { %v1551_v20 = vshll.u32 %v4733_v13, 16  ;;  %v1561_v22 = vshrl.u32 %v4743_v2, 16  ;;  %v3712_v23 = vcombine.low %v4733_v13, %v4743_v2  ;;  %v1722_v25 = vor.u32 %v1721_v56, %v1718_v31  ;;  %v4779_v47 = vpop.permute.xlu1 %2245  ;;  %v3591_v13 = vld [vmem:[%s4162_s30 + $0x90] sm:$0xe] }
  0x9b   : > { %2489 = vrot.lane.b32.xlu0 %v3696_v38, %s4076_s8  ;;  %v1550_v29 = vrot.slane %v1548_v15, 4  ;;  %v1725_v17 = vshll.u32 %v4696_v35, 16  ;;  %v1731_v46 = vrot.slane %v1729_v43, 4  ;;  %v1735_v19 = vshll.u32 %v4747_v5, 16 }
  0x9c   : > { %v1553_v32 = vrot.slane %v1551_v20, 5  ;;  %v1723_v24 = vrot.slane %v1722_v25, 4  ;;  %v1530_v18 = vor.u32 %v1529_v4, %v1526_v45  ;;  %v1533_v33 = vshll.u32 %v4710_v49, 16 }
  0x9d   : > { %2599 = vrot.lane.b32.xlu1 %v3719_v48, %s4077_s9  ;;  %v1727_v3 = vrot.slane %v1725_v17, 5  ;;  %v1737_v27 = vrot.slane %v1735_v19, 5  ;;  %v1539_v36 = vrot.slane %v1537_v60, 4  ;;  %v1543_v42 = vshll.u32 %v4762_v26, 16 }
  0x9e   : > { %v1531_v41 = vrot.slane %v1530_v18, 4  ;;  %v1535_v1 = vrot.slane %v1533_v33, 5  ;;  %v1746_v54 = vor.u32 %v1745_v11, %v1742_v8  ;;  %v1749_v40 = vshll.u32 %v4727_v55, 16  ;;  %v3583_v8 = vld [vmem:[%s4162_s30 + $0x30] sm:$0xe]  ;;  %v4799_v11 = vpop.permute.xlu0 %2229 }
  0x9f   : > { %2583 = vrot.lane.b32.xlu0 %v3711_v62, %s4077_s9  ;;  %v1728_v57 = vsel %vm4251_vm5, %v1723_v24, %v1727_v3  ;;  %v1732_v44 = vor.u32 %v1731_v46, %v1727_v3  ;;  %v1545_v28 = vrot.slane %v1543_v42, 5  ;;  %v1755_v9 = vrot.slane %v1753_v39, 4  ;;  %v4814_v3 = vld [vmem:[%s4162_s30 + $0x94] sm:$0xf] }
  0xa0   : > { %v1536_v37 = vsel %vm4251_vm5, %v1531_v41, %v1535_v1  ;;  %v1540_v34 = vor.u32 %v1539_v36, %v1535_v1  ;;  %v1747_v43 = vrot.slane %v1746_v54, 4  ;;  %v1751_v48 = vrot.slane %v1749_v40, 5  ;;  %v4824_v54 = vld [vmem:[%s4162_s30 + $0x98] sm:$0x1]  ;;  %v205_v40 = vld [vmem:[%s4162_s30 + $0x30] sm:$0xf] }
  0xa1   : > { %2601 = vrot.lane.b32.xlu1 %v3720_v14, %s4077_s9  ;;  %v1733_v0 = vrot.slane %v1732_v44, 4  ;;  %v1759_v52 = vshll.u32 %v4771_v51, 16  ;;  %v1554_v10 = vor.u32 %v1553_v32, %v1550_v29  ;;  %v1557_v31 = vshll.u32 %v4743_v2, 16 }
  0xa2   : > { %v1541_v56 = vrot.slane %v1540_v34, 4  ;;  %v1752_v58 = vsel %vm4251_vm5, %v1747_v43, %v1751_v48  ;;  %v1756_v59 = vor.u32 %v1755_v9, %v1751_v48  ;;  %v1563_v60 = vrot.slane %v1561_v22, 4  ;;  %v4832_v9 = vld [vmem:[%s4162_s30 + $0x34] sm:$0xf] }
  0xa3   : > { %2585 = vrot.lane.b32.xlu0 %v3712_v23, %s4077_s9  ;;  %v1738_v61 = vsel %vm4251_vm5, %v1733_v0, %v1737_v27  ;;  %v1761_v62 = vrot.slane %v1759_v52, 5  ;;  %v1555_v63 = vrot.slane %v1554_v10, 4  ;;  %v1559_v12 = vrot.slane %v1557_v31, 5  ;;  %v221_v23 = vld [vmem:[%s4162_s30 + $0x90] sm:$0xf]  ;;  %v4804_v25 = vpop.permute.xlu1 %2149 }
  0xa4   : > { %v3735_v38 = vcombine.low %v1728_v57, %v1738_v61  ;;  %v1546_v45 = vsel %vm4251_vm5, %v1541_v56, %v1545_v28  ;;  %v1757_v4 = vrot.slane %v1756_v59, 4  ;;  %v1567_v39 = vshll.u32 %v4786_v50, 16  ;;  %v4840_v52 = vld [vmem:[%s4162_s30 + $0x38] sm:$0x1] }
  0xa5   : > { %v3727_v14 = vcombine.low %v1536_v37, %v1546_v45  ;;  %v1560_v15 = vsel %vm4251_vm5, %v1555_v63, %v1559_v12  ;;  %v1564_v20 = vor.u32 %v1563_v60, %v1559_v12  ;;  %v3607_v22 = vrot.slane %v3591_v13, 9 }
  0xa6   : > { %2679 = vrot.lane.b32.xlu1 %v3735_v38, %s4078_s10  ;;  %v1762_v29 = vsel %vm4251_vm5, %v1757_v4, %v1761_v62  ;;  %v1569_v17 = vrot.slane %v1567_v39, 5  ;;  %v1995_v46 = vrot.slane %v4696_v35, 5  ;;  %v1998_v19 = vrot.slane %v4747_v5, 5 }
  0xa7   : > { %2663 = vrot.lane.b32.xlu0 %v3727_v14, %s4078_s10  ;;  %v3736_v32 = vcombine.low %v1752_v58, %v1762_v29  ;;  %v1565_v24 = vrot.slane %v1564_v20, 4  ;;  %v3599_v18 = vrot.slane %v3583_v8, 9  ;;  %v1939_v33 = vrot.slane %v4710_v49, 5  ;;  %v4834_v37 = vpop.permute.xlu0 %2147  ;;  %v3964_v29 = vld [vmem:[%s4162_s30 + $0xc] sm:$0xf] }
  0xa8   : > { %v1996_v27 = vsel %vm4193_vm2, %v3607_v22, %v1995_v46  ;;  %v1997_v36 = vrot.slane %v1995_v46, 4  ;;  %v1942_v42 = vrot.slane %v4762_v26, 5  ;;  %v537_v35 = vshrl.u32 %v221_v23, 16 }
  0xa9   : > { %v1570_v5 = vsel %vm4251_vm5, %v1565_v24, %v1569_v17  ;;  %v1940_v41 = vsel %vm4193_vm2, %v3599_v18, %v1939_v33  ;;  %v1941_v1 = vrot.slane %v1939_v33, 4  ;;  %v540_v49 = vshll.u32 %v221_v23, 16  ;;  %v3963_v23 = vld [vmem:[%s4162_s30 + $0x10] sm:$0xf] }
  0xaa   : > { %2681 = vrot.lane.b32.xlu1 %v3736_v32, %s4078_s10  ;;  %v3728_v57 = vcombine.low %v1560_v15, %v1570_v5  ;;  %v1999_v44 = vsel %vm4193_vm2, %v1997_v36, %v1998_v19  ;;  %v539_v26 = vrot.slane %v537_v35, 4  ;;  %v546_v28 = vshll.u32 %v4814_v3, 16  ;;  %v3592_v15 = vld [vmem:[%s4162_s30 + $0x9c] sm:$0xe]  ;;  %v3965_v5 = vld [vmem:[%s4162_s30 + $0x4] sm:$0xf] }
  0xab   : > { %v3751_v34 = vcombine.low %v1996_v27, %v1999_v44  ;;  %v1943_v43 = vsel %vm4193_vm2, %v1941_v1, %v1942_v42  ;;  %v542_v48 = vrot.slane %v540_v49, 5  ;;  %v550_v0 = vshrl.u32 %v4814_v3, 16  ;;  %v4842_v10 = vpop.permute.xlu1 %2165  ;;  %v3584_v36 = vld [vmem:[%s4162_s30 + $0x3c] sm:$0xe] }
  0xac   : > { %2665 = vrot.lane.b32.xlu0 %v3728_v57, %s4078_s10  ;;  %v3743_v31 = vcombine.low %v1940_v41, %v1943_v43  ;;  %v548_v56 = vrot.slane %v546_v28, 5  ;;  %v556_v58 = vshll.u32 %v4824_v54, 16  ;;  %v345_v59 = vshrl.u32 %v205_v40, 16  ;;  %v3966_v41 = vld [vmem:[%s4162_s30] sm:$0xf] }
  0xad   : > { %v543_v60 = vor.u32 %v542_v48, %v539_v26  ;;  %v552_v13 = vrot.slane %v550_v0, 4  ;;  %v348_v61 = vshll.u32 %v205_v40, 16  ;;  %v354_v62 = vshll.u32 %v4832_v9, 16  ;;  %v223_v28 = vld [vmem:[%s4162_s30 + $0x9c] sm:$0xf] }
  0xae   : > { %2759 = vrot.lane.b32.xlu1 %v3751_v34, %s4079_s11  ;;  %v558_v63 = vrot.slane %v556_v58, 5  ;;  %v347_v12 = vrot.slane %v345_v59, 4  ;;  %v358_v38 = vshrl.u32 %v4832_v9, 16  ;;  %v364_v45 = vshll.u32 %v4840_v52, 16  ;;  %v3967_v58 = vld [vmem:[%s4162_s30 + $0x70] sm:$0xf] }
  0xaf   : > { %v544_v4 = vrot.slane %v543_v60, 4  ;;  %v553_v39 = vor.u32 %v552_v13, %v548_v56  ;;  %v350_v8 = vrot.slane %v348_v61, 5  ;;  %v356_v14 = vrot.slane %v354_v62, 5  ;;  %v4851_v20 = vpop.permute.xlu1 %2341  ;;  %v3968_v59 = vld [vmem:[%s4162_s30 + $0x6c] sm:$0xf] }
  0xb0   : > { %2743 = vrot.lane.b32.xlu0 %v3743_v31, %s4079_s11  ;;  %v360_v22 = vrot.slane %v358_v38, 4  ;;  %v3614_v17 = vcombine.low %v3964_v29, %v3963_v23  ;;  %v4856_v46 = vpop.permute.xlu0 %2163  ;;  %v366_v33 = vrot.slane %v364_v45, 5  ;;  %v3608_v27 = vrot.slane %v3592_v15, 9  ;;  %v4888_v13 = vld [vmem:[%s4162_s30 + $0xa0] sm:$0xf] }
  0xb1   : > { %v549_v19 = vsel %vm4251_vm5, %v544_v4, %v548_v56  ;;  %v554_v32 = vrot.slane %v553_v39, 4  ;;  %v351_v24 = vor.u32 %v350_v8, %v347_v12  ;;  %v3613_v1 = vcombine.low %v3966_v41, %v3965_v5  ;;  %v3969_v45 = vld [vmem:[%s4162_s30 + $0x64] sm:$0xf]  ;;  %v3970_v4 = vld [vmem:[%s4162_s30 + $0x60] sm:$0xf] }
  0xb2   : > { %v361_v18 = vor.u32 %v360_v22, %v356_v14  ;;  %v2002_v49 = vrot.slane %v4727_v55, 5  ;;  %v4868_v44 = vsel %vm2771_vm6, %v3614_v17, %v4804_v25  ;;  %v2005_v26 = vrot.slane %v4771_v51, 5  ;;  %v207_v8 = vld [vmem:[%s4162_s30 + $0x3c] sm:$0xf]  ;;  %v4907_v17 = vld [vmem:[%s4162_s30 + $0x40] sm:$0xf] }
  0xb3   : > { %v559_v42 = vsel %vm4251_vm5, %v554_v32, %v558_v63  ;;  %v352_v35 = vrot.slane %v351_v24, 4  ;;  %v4874_v43 = vpop.permute.xlu1 %2419  ;;  %v3600_v31 = vrot.slane %v3584_v36, 9  ;;  %v1946_v25 = vrot.slane %v4743_v2, 5  ;;  %v4893_v63 = vld [vmem:[%s4162_s30 + $0xa4] sm:$0x1] }
  0xb4   : > { %v3641_v40 = vcombine.low %v549_v19, %v559_v42  ;;  %v362_v57 = vrot.slane %v361_v18, 4  ;;  %v4872_v34 = vpop.permute.xlu0 %2325  ;;  %v2003_v48 = vsel %vm4193_vm2, %v3608_v27, %v2002_v49  ;;  %v2004_v0 = vrot.slane %v2002_v49, 4 }
  0xb5   : > { %v357_v55 = vsel %vm4251_vm5, %v352_v35, %v356_v14  ;;  %v1949_v56 = vrot.slane %v4786_v50, 5  ;;  %v3622_v60 = vcombine.low %v3968_v59, %v3967_v58  ;;  %v561_v12 = vshrl.u32 %v223_v28, 16 }
  0xb6   : > { %2171 = vrot.lane.b32.xlu1 %v3641_v40, %s4074_s6  ;;  %v367_v51 = vsel %vm4251_vm5, %v362_v57, %v366_v33  ;;  %v2006_v62 = vsel %vm4193_vm2, %v2004_v0, %v2005_v26  ;;  %v1947_v2 = vsel %vm4193_vm2, %v3600_v31, %v1946_v25  ;;  %v1948_v50 = vrot.slane %v1946_v25, 4  ;;  %v4917_v33 = vld [vmem:[%s4162_s30 + $0x44] sm:$0x1] }
  0xb7   : > { %v3633_v61 = vcombine.low %v357_v55, %v367_v51  ;;  %v3752_v38 = vcombine.low %v2003_v48, %v2006_v62  ;;  %v3621_v39 = vcombine.low %v3970_v4, %v3969_v45  ;;  %v2774_v15 = vsel %vm2771_vm6, %v3613_v1, %v4834_v37 }
  0xb8   : > { %v4900_v14 = vpop.permute.xlu0 %2403  ;;  %v563_v22 = vrot.slane %v561_v12, 4  ;;  %v564_v23 = vshll.u32 %v223_v28, 16  ;;  %v570_v29 = vshll.u32 %v4888_v13, 16  ;;  %v1950_v19 = vsel %vm4193_vm2, %v1948_v50, %v1949_v56 }
  0xb9   : > { %2155 = vrot.lane.b32.xlu0 %v3633_v61, %s4074_s6  ;;  %v2801_v32 = vsel %vm2771_vm6, %v3622_v60, %v4842_v10  ;;  %v574_v24 = vshrl.u32 %v4888_v13, 16  ;;  %v580_v18 = vshll.u32 %v4893_v63, 16  ;;  %v3744_v27 = vcombine.low %v1947_v2, %v1950_v19 }
  0xba   : > { %2761 = vrot.lane.b32.xlu1 %v3752_v38, %s4079_s11  ;;  %v4919_v37 = vpop.permute.xlu1 %2421  ;;  %v566_v36 = vrot.slane %v564_v23, 5  ;;  %v572_v42 = vrot.slane %v570_v29, 5  ;;  %v369_v35 = vshrl.u32 %v207_v8, 16  ;;  %v2798_v5 = vsel %vm2771_vm6, %v3621_v39, %v4856_v46  ;;  %v644_v46 = vld [vmem:[%s4162_s30 + $0x90] sm:$0xe] }
  0xbb   : > { %v576_v41 = vrot.slane %v574_v24, 4  ;;  %v372_v1 = vshll.u32 %v207_v8, 16  ;;  %v378_v10 = vshll.u32 %v4907_v17, 16  ;;  %v382_v26 = vshrl.u32 %v4907_v17, 16  ;;  %v636_v38 = vld [vmem:[%s4162_s30 + $0x30] sm:$0xe] }
  0xbc   : > { %v4924_v49 = vpop.permute.xlu0 %2405  ;;  %v567_v40 = vor.u32 %v566_v36, %v563_v22  ;;  %v371_v57 = vrot.slane %v369_v35, 4  ;;  %v388_v28 = vshll.u32 %v4917_v33, 16  ;;  %v582_v48 = vrot.slane %v580_v18, 5 }
  0xbd   : > { %2745 = vrot.lane.b32.xlu0 %v3744_v27, %s4079_s11  ;;  %v577_v55 = vor.u32 %v576_v41, %v572_v42  ;;  %v374_v0 = vrot.slane %v372_v1, 5  ;;  %v380_v31 = vrot.slane %v378_v10, 5  ;;  %v2822_v25 = vsel %vm2820_vm7, %v2774_v15, %v4774_v53  ;;  %v637_v1 = vld [vmem:[%s4162_s30 + $0x3c] sm:$0xe] }
  0xbe   : > { %v4930_v51 = vpop.permute.xlu1 %2499  ;;  %v2838_v56 = vsel %vm2820_vm7, %v2798_v5, %v4755_v16  ;;  %v568_v58 = vrot.slane %v567_v40, 4  ;;  %v384_v59 = vrot.slane %v382_v26, 4  ;;  %v390_v62 = vrot.slane %v388_v28, 5 }
  0xbf   : > { %v578_v60 = vrot.slane %v577_v55, 4  ;;  %v375_v61 = vor.u32 %v374_v0, %v371_v57  ;;  %v2840_v12 = vsel %vm2820_vm7, %v2801_v32, %v4779_v47  ;;  %v3449_v53 = vrot.slane %v644_v46, 9  ;;  %v4980_v57 = vld [vmem:[%s4162_s30 + $0x9c] sm:$0xf] }
  0xc0   : > { %v4939_v2 = vpop.permute.xlu0 %2483  ;;  %v573_v50 = vsel %vm4251_vm5, %v568_v58, %v572_v42  ;;  %v385_v45 = vor.u32 %v384_v59, %v380_v31  ;;  %v785_v39 = vrot.slane %v4814_v3, 5  ;;  %v788_v8 = vrot.slane %v4824_v54, 5  ;;  %v645_v42 = vld [vmem:[%s4162_s30 + $0x9c] sm:$0xe]  ;;  %v4998_v58 = vld [vmem:[%s4162_s30 + $0xa0] sm:$0xf] }
  0xc1   : > { %v583_v16 = vsel %vm4251_vm5, %v578_v60, %v582_v48  ;;  %v376_v4 = vrot.slane %v375_v61, 4  ;;  %v3441_v23 = vrot.slane %v636_v38, 9  ;;  %v729_v29 = vrot.slane %v4832_v9, 5  ;;  %v3461_v46 = vld [vmem:[%s4162_s30 + $0x3c] sm:$0xf] }
  0xc2   : > { %v4947_v15 = vpop.permute.xlu1 %2501  ;;  %v3642_v47 = vcombine.low %v573_v50, %v583_v16  ;;  %v386_v22 = vrot.slane %v385_v45, 4  ;;  %v786_v32 = vsel %vm4193_vm2, %v3449_v53, %v785_v39  ;;  %v787_v24 = vrot.slane %v785_v39, 4  ;;  %v5022_v16 = vld [vmem:[%s4162_s30 + $0x40] sm:$0xf] }
  0xc3   : > { %v381_v19 = vsel %vm4251_vm5, %v376_v4, %v380_v31  ;;  %v732_v3 = vrot.slane %v4840_v52, 5  ;;  %v2824_v9 = vsel %vm2820_vm7, %v4868_v44, %v4799_v11  ;;  %v730_v27 = vsel %vm4193_vm2, %v3441_v23, %v729_v29 }
  0xc4   : > { %v4955_v18 = vpop.permute.xlu0 %2485  ;;  %2173 = vrot.lane.b32.xlu1 %v3642_v47, %s4074_s6  ;;  %v391_v54 = vsel %vm4251_vm5, %v386_v22, %v390_v62  ;;  %v731_v36 = vrot.slane %v729_v29, 4  ;;  %v2873_v52 = vsel %vm2853_vm8, %v2840_v12, %v4851_v20  ;;  %v2857_v5 = vsel %vm2853_vm8, %v2824_v9, %v4872_v34  ;;  %v3479_v12 = vld [vmem:[%s4162_s30 + $0xa8] sm:$0xf]  ;;  %v5027_v47 = vld [vmem:[%s4162_s30 + $0xac] sm:$0xf] }
  0xc5   : > { %v3634_v35 = vcombine.low %v381_v19, %v391_v54  ;;  %v789_v41 = vsel %vm4193_vm2, %v787_v24, %v788_v8  ;;  %v2871_v44 = vsel %vm2853_vm8, %v2838_v56, %v4712_v7  ;;  %v3450_v34 = vrot.slane %v645_v42, 9  ;;  %v3463_v22 = vld [vmem:[%s4162_s30 + $0x48] sm:$0xf]  ;;  %v5034_v24 = vld [vmem:[%s4162_s30 + $0x4c] sm:$0xf] }
  0xc6   : > { %v4973_v10 = vpop.permute.xlu1 %2595  ;;  %v3657_v40 = vcombine.low %v786_v32, %v789_v41  ;;  %v733_v11 = vsel %vm4193_vm2, %v731_v36, %v732_v3  ;;  %v792_v26 = vrot.slane %v4888_v13, 5  ;;  %v795_v28 = vrot.slane %v4893_v63, 5  ;;  %v5052_v41 = vld [vmem:[%s4162_s30 + $0xa4] sm:$0x1] }
  0xc7   : > { %2157 = vrot.lane.b32.xlu0 %v3634_v35, %s4074_s6  ;;  %v3649_v20 = vcombine.low %v730_v27, %v733_v11  ;;  %v2855_v48 = vsel %vm2853_vm8, %v2822_v25, %v4749_v6  ;;  %v3442_v0 = vrot.slane %v637_v1, 9  ;;  %v736_v7 = vrot.slane %v4907_v17, 5 }
  0xc8   : > { %v4985_v55 = vpop.permute.xlu0 %2579  ;;  %2251 = vrot.lane.b32.xlu1 %v3657_v40, %s4073_s5  ;;  %v739_v31 = vrot.slane %v4917_v33, 5  ;;  %v2904_v56 = vsel %vm2886_vm9, %v2871_v44, %v4874_v43  ;;  %v793_v13 = vsel %vm4193_vm2, %v3450_v34, %v792_v26  ;;  %v794_v63 = vrot.slane %v792_v26, 4 }
  0xc9   : > { %v1152_v59 = vshrl.u32 %v4980_v57, 16  ;;  %v2888_v17 = vsel %vm2886_vm9, %v2855_v48, %v4900_v14  ;;  %v737_v33 = vsel %vm4193_vm2, %v3442_v0, %v736_v7  ;;  %v738_v25 = vrot.slane %v736_v7, 4 }
  0xca   : > { %v5001_v6 = vpop.permute.xlu1 %2597  ;;  %v1155_v43 = vshll.u32 %v4980_v57, 16  ;;  %v796_v60 = vsel %vm4193_vm2, %v794_v63, %v795_v28  ;;  %v2906_v61 = vsel %vm2886_vm9, %v2873_v52, %v4919_v37  ;;  %v2890_v62 = vsel %vm2886_vm9, %v2857_v5, %v4924_v49 }
  0xcb   : > { %2235 = vrot.lane.b32.xlu0 %v3649_v20, %s4073_s5  ;;  %v960_v14 = vshrl.u32 %v3461_v46, 16  ;;  %v3658_v50 = vcombine.low %v793_v13, %v796_v60  ;;  %v740_v45 = vsel %vm4193_vm2, %v738_v25, %v739_v31  ;;  %v1165_v53 = vshrl.u32 %v4998_v58, 16  ;;  %v5074_v25 = vld [vmem:[%s4162_s30 + $0xb0] sm:$0x1] }
  0xcc   : > { %v5016_v38 = vpop.permute.xlu0 %2581  ;;  %v963_v4 = vshll.u32 %v3461_v46, 16  ;;  %v3650_v39 = vcombine.low %v737_v33, %v740_v45  ;;  %v1154_v8 = vrot.slane %v1152_v59, 4  ;;  %v1157_v37 = vrot.slane %v1155_v43, 5 }
  0xcd   : > { %v3673_v49 = vcombine.low %v4980_v57, %v4998_v58  ;;  %2253 = vrot.lane.b32.xlu1 %v3658_v50, %s4073_s5  ;;  %v962_v29 = vrot.slane %v960_v14, 4  ;;  %v1176_v19 = vshrl.u32 %v3479_v12, 16  ;;  %v1179_v32 = vshll.u32 %v3479_v12, 16 }
  0xce   : > { %v5030_v23 = vpop.permute.xlu1 %2675  ;;  %v965_v3 = vrot.slane %v963_v4, 5  ;;  %v973_v54 = vshrl.u32 %v5022_v16, 16  ;;  %v3665_v9 = vcombine.low %v3461_v46, %v5022_v16  ;;  %v5041_v27 = vsel %vm2919_vm10, %v2904_v56, %v4930_v51  ;;  %v5056_v51 = vld [vmem:[%s4162_s30 + $0x44] sm:$0x1] }
  0xcf   : > { %2237 = vrot.lane.b32.xlu0 %v3650_v39, %s4073_s5  ;;  %v5047_v42 = vsel %vm2919_vm10, %v2888_v17, %v4939_v2  ;;  %v1178_v35 = vrot.slane %v1176_v19, 4  ;;  %v1189_v52 = vshrl.u32 %v5027_v47, 16  ;;  %v3674_v5 = vcombine.low %v3479_v12, %v5027_v47 }
  0xd0   : > { %v5043_v36 = vpop.permute.xlu0 %2659  ;;  %v1181_v1 = vrot.slane %v1179_v32, 5  ;;  %v984_v40 = vshrl.u32 %v3463_v22, 16  ;;  %v987_v11 = vshll.u32 %v3463_v22, 16  ;;  %v997_v44 = vshrl.u32 %v5034_v24, 16 }
  0xd1   : > { %2347 = vrot.lane.b32.xlu1 %v3673_v49, %s4072_s4  ;;  %v3666_v2 = vcombine.low %v3463_v22, %v5034_v24  ;;  %v5064_v20 = vsel %vm2919_vm10, %v2906_v61, %v4947_v15  ;;  %v1158_v34 = vor.u32 %v1157_v37, %v1154_v8  ;;  %v1161_v26 = vshll.u32 %v4998_v58, 16  ;;  %v5091_v22 = vld [vmem:[%s4162_s30 + $0x50] sm:$0x1] }
  0xd2   : > { %v5058_v57 = vpop.permute.xlu1 %2677  ;;  %v1167_v28 = vrot.slane %v1165_v53, 4  ;;  %v1171_v48 = vshll.u32 %v5052_v41, 16  ;;  %v966_v0 = vor.u32 %v965_v3, %v962_v29  ;;  %v969_v7 = vshll.u32 %v5022_v16, 16 }
  0xd3   : > { %2331 = vrot.lane.b32.xlu0 %v3665_v9, %s4072_s4  ;;  %v1159_v31 = vrot.slane %v1158_v34, 4  ;;  %v1163_v46 = vrot.slane %v1161_v26, 5  ;;  %v975_v56 = vrot.slane %v973_v54, 4  ;;  %v979_v13 = vshll.u32 %v5056_v51, 16 }
  0xd4   : > { %v5071_v63 = vpop.permute.xlu0 %2661  ;;  %v986_v15 = vrot.slane %v984_v40, 4  ;;  %v989_v59 = vrot.slane %v987_v11, 5  ;;  %v967_v17 = vrot.slane %v966_v0, 4  ;;  %v971_v33 = vrot.slane %v969_v7, 5  ;;  %v3513_v40 = vld [vmem:[%s4162_s30 + $0x9c] sm:$0xe] }
  0xd5   : > { %2349 = vrot.lane.b32.xlu1 %v3674_v5, %s4072_s4  ;;  %v5079_v43 = vsel %vm2919_vm10, %v2890_v62, %v4955_v18  ;;  %v1164_v60 = vsel %vm4251_vm5, %v1159_v31, %v1163_v46  ;;  %v1168_v61 = vor.u32 %v1167_v28, %v1163_v46  ;;  %v1173_v14 = vrot.slane %v1171_v48, 5  ;;  %v3505_v28 = vld [vmem:[%s4162_s30 + $0x3c] sm:$0xe] }
  0xd6   : > { %v972_v12 = vsel %vm4251_vm5, %v967_v17, %v971_v33  ;;  %v976_v50 = vor.u32 %v975_v56, %v971_v33  ;;  %v981_v45 = vrot.slane %v979_v13, 5  ;;  %v1182_v53 = vor.u32 %v1181_v1, %v1178_v35  ;;  %v5086_v4 = vpop.permute.xlu1 %2755  ;;  %v3514_v33 = vld [vmem:[%s4162_s30 + $0xa8] sm:$0xe] }
  0xd7   : > { %2333 = vrot.lane.b32.xlu0 %v3666_v2, %s4072_s4  ;;  %v1169_v39 = vrot.slane %v1168_v61, 4  ;;  %v1185_v18 = vshll.u32 %v5027_v47, 16  ;;  %v1191_v62 = vrot.slane %v1189_v52, 4  ;;  %v1195_v8 = vshll.u32 %v5074_v25, 16 }
  0xd8   : > { %v977_v37 = vrot.slane %v976_v50, 4  ;;  %v1183_v49 = vrot.slane %v1182_v53, 4  ;;  %v990_v29 = vor.u32 %v989_v59, %v986_v15  ;;  %v993_v19 = vshll.u32 %v5034_v24, 16  ;;  %v5096_v9 = vpop.permute.xlu0 %2739  ;;  %v3506_v53 = vld [vmem:[%s4162_s30 + $0x48] sm:$0xe] }
  0xd9   : > { %v1174_v32 = vsel %vm4251_vm5, %v1169_v39, %v1173_v14  ;;  %v1187_v3 = vrot.slane %v1185_v18, 5  ;;  %v999_v54 = vrot.slane %v997_v44, 4  ;;  %v1197_v34 = vrot.slane %v1195_v8, 5 }
  0xda   : > { %v3689_v35 = vcombine.low %v1164_v60, %v1174_v32  ;;  %v982_v52 = vsel %vm4251_vm5, %v977_v37, %v981_v45  ;;  %v991_v5 = vrot.slane %v990_v29, 4  ;;  %v995_v1 = vrot.slane %v993_v19, 5  ;;  %v3936_v29 = vld [vmem:[%s6133_s1 + $0x10] ss:$0 sps:$4 sm:$0x33]  }
  0xdb   : > { %v3681_v11 = vcombine.low %v972_v12, %v982_v52  ;;  %v1192_v2 = vor.u32 %v1191_v62, %v1187_v3  ;;  %v1003_v26 = vshll.u32 %v5091_v22, 16  ;;  %v2970_v44 = vsel %vm2952_vm11, %v5041_v27, %v4973_v10  ;;  %v5145_v19 = vld [vmem:[%s4162_s30 + $0xa8] sm:$0xf]  ;;  %3845 = vmatprep.subr.msk.bf16.mxu0 %vm3104_vm13, %v3936_v29  ;;  %3846 = vmatprep.subr.msk.bf16.mxu1 %vm3104_vm13, %v3936_v29 }
  0xdc   : > { %2427 = vrot.lane.b32.xlu1 %v3689_v35, %s4075_s7  ;;  %v1188_v48 = vsel %vm4251_vm5, %v1183_v49, %v1187_v3  ;;  %v996_v0 = vsel %vm4251_vm5, %v991_v5, %v995_v1  ;;  %v1000_v7 = vor.u32 %v999_v54, %v995_v1  ;;  %v3529_v13 = vrot.slane %v3513_v40, 9  ;;  %v5162_v5 = vld [vmem:[%s4162_s30 + $0x48] sm:$0xf] }
  0xdd   : > { %2411 = vrot.lane.b32.xlu0 %v3681_v11, %s4075_s7  ;;  %v1193_v46 = vrot.slane %v1192_v2, 4  ;;  %v1005_v56 = vrot.slane %v1003_v26, 5  ;;  %v1397_v15 = vrot.slane %v4998_v58, 5  ;;  %v1400_v10 = vrot.slane %v5052_v41, 5  ;;  %v3939_v26 = vld [vmem:[%s6133_s1 + $0x8] sm:$0xff]  }
  0xde   : > { %v5111_v31 = vpop.permute.xlu1 %2167  ;;  %v1001_v59 = vrot.slane %v1000_v7, 4  ;;  %v3521_v27 = vrot.slane %v3505_v28, 9  ;;  %v1341_v17 = vrot.slane %v5022_v16, 5  ;;  %v1344_v12 = vrot.slane %v5056_v51, 5  ;;  %v5196_v28 = vld [vmem:[%s4162_s30 + $0xb4] sm:$0xf] }
  0xdf   : > { %v1198_v60 = vsel %vm4251_vm5, %v1193_v46, %v1197_v34  ;;  %v1398_v61 = vsel %vm4193_vm2, %v3529_v13, %v1397_v15  ;;  %v1399_v14 = vrot.slane %v1397_v15, 4  ;;  %v3530_v62 = vrot.slane %v3514_v33, 9  ;;  %v5206_v7 = vld [vmem:[%s4162_s30 + $0x54] sm:$0xf] }
  0xe0   : > { %v3690_v58 = vcombine.low %v1188_v48, %v1198_v60  ;;  %v1006_v41 = vsel %vm4251_vm5, %v1001_v59, %v1005_v56  ;;  %v1342_v16 = vsel %vm4193_vm2, %v3521_v27, %v1341_v17  ;;  %v1343_v45 = vrot.slane %v1341_v17, 4 }
  0xe1   : > { %v5123_v50 = vpop.permute.xlu0 %2151  ;;  %v3682_v39 = vcombine.low %v996_v0, %v1006_v41  ;;  %v1401_v18 = vsel %vm4193_vm2, %v1399_v14, %v1400_v10  ;;  %v2954_v51 = vsel %vm2952_vm11, %v5047_v42, %v4985_v55  ;;  %v2972_v8 = vsel %vm2952_vm11, %v5064_v20, %v5001_v6  ;;  %v5213_v10 = vld [vmem:[%s4162_s30 + $0xb8] sm:$0xf] }
  0xe2   : > { %2429 = vrot.lane.b32.xlu1 %v3690_v58, %s4075_s7  ;;  %v3705_v37 = vcombine.low %v1398_v61, %v1401_v18  ;;  %v1345_v49 = vsel %vm4193_vm2, %v1343_v45, %v1344_v12  ;;  %v5147_v32 = vpop.permute.xlu1 %2757  ;;  %v1404_v42 = vrot.slane %v5027_v47, 5  ;;  %v1407_v6 = vrot.slane %v5074_v25, 5  ;;  %v5167_v25 = vld [vmem:[%s4162_s30 + $0xac] sm:$0xf]  ;;  %v5220_v61 = vld [vmem:[%s4162_s30 + $0x58] sm:$0xf] }
  0xe3   : > { %2413 = vrot.lane.b32.xlu0 %v3682_v39, %s4075_s7  ;;  %v3697_v55 = vcombine.low %v1342_v16, %v1345_v49  ;;  %v3522_v20 = vrot.slane %v3506_v53, 9  ;;  %v2956_v3 = vsel %vm2952_vm11, %v5079_v43, %v5016_v38  ;;  %v5157_v54 = vsel %vm2985_vm12, %v2970_v44, %v5030_v23  ;;  %v3944_v49 = vld [vmem:[%s6133_s1] sm:$0xff]  }
  0xe4   : > { %v1348_v35 = vrot.slane %v5034_v24, 5  ;;  %v1351_v52 = vrot.slane %v5091_v22, 5  ;;  %v1405_v47 = vsel %vm4193_vm2, %v3530_v62, %v1404_v42  ;;  %v1406_v1 = vrot.slane %v1404_v42, 4  ;;  %v5234_v62 = vld [vmem:[%s4162_s30 + $0xb0] sm:$0x1] }
  0xe5   : > { %v1764_v38 = vshrl.u32 %v5145_v19, 16  ;;  %v5170_v43 = vpop.permute.xlu0 %2741  ;;  %v2987_v23 = vsel %vm2985_vm12, %v2954_v51, %v5043_v36  ;;  %v1767_v40 = vshll.u32 %v5145_v19, 16  ;;  %v5184_v2 = vsel %vm2985_vm12, %v2972_v8, %v5058_v57 }
  0xe6   : > { %2507 = vrot.lane.b32.xlu1 %v3705_v37, %s4076_s8  ;;  %v1349_v24 = vsel %vm4193_vm2, %v3522_v20, %v1348_v35  ;;  %v1350_v22 = vrot.slane %v1348_v35, 4  ;;  %v1408_v11 = vsel %vm4193_vm2, %v1406_v1, %v1407_v6  ;;  %v5188_v36 = vsel %vm2985_vm12, %v2956_v3, %v5071_v63  ;;  %v5202_v63 = vld [vmem:[%s4162_s30 + $0x4c] sm:$0xf] }
  0xe7   : > { %2491 = vrot.lane.b32.xlu0 %v3697_v55, %s4076_s8  ;;  %v1572_v34 = vshrl.u32 %v5162_v5, 16  ;;  %v3706_v44 = vcombine.low %v1405_v47, %v1408_v11  ;;  %v1777_v48 = vshrl.u32 %v5167_v25, 16  ;;  %v1575_v0 = vshll.u32 %v5162_v5, 16 }
  0xe8   : > { %v1352_v57 = vsel %vm4193_vm2, %v1350_v22, %v1351_v52  ;;  %v1766_v13 = vrot.slane %v1764_v38, 4  ;;  %v1769_v15 = vrot.slane %v1767_v40, 5  ;;  %v3721_v59 = vcombine.low %v5145_v19, %v5167_v25  ;;  %v5257_v52 = vld [vmem:[%s4162_s30 + $0x50] sm:$0x1] }
  0xe9   : > { %v3698_v56 = vcombine.low %v1349_v24, %v1352_v57  ;;  %v1574_v27 = vrot.slane %v1572_v34, 4  ;;  %v3106_v17 = vsel %vm3104_vm13, %v3936_v29, 0  ;;  %v1788_v33 = vshrl.u32 %v5196_v28, 16 }
  0xea   : > { %v5208_v46 = vpop.permute.xlu1 %2169  ;;  %2509 = vrot.lane.b32.xlu1 %v3706_v44, %s4076_s8  ;;  %v1791_v60 = vshll.u32 %v5196_v28, 16  ;;  %v1577_v14 = vrot.slane %v1575_v0, 5  ;;  %v1585_v12 = vshrl.u32 %v5202_v63, 16  ;;  %v3713_v58 = vcombine.low %v5162_v5, %v5202_v63  ;;  %3802 = vmatpush3.bf16.msra.mxu0 %v3106_v17 }
  0xeb   : > { %2493 = vrot.lane.b32.xlu0 %v3698_v56, %s4076_s8  ;;  %v1596_v41 = vshrl.u32 %v5206_v7, 16  ;;  %3842 = vmatpush3.bf16.msra.mxu1 %v3106_v17  ;;  %v1790_v45 = vrot.slane %v1788_v33, 4  ;;  %v1801_v53 = vshrl.u32 %v5213_v10, 16  ;;  %v3722_v39 = vcombine.low %v5196_v28, %v5213_v10 }
  0xec   : > { %3803 = vmatprep.subr.bf16.mxu0 %v3939_v26  ;;  %v1599_v18 = vshll.u32 %v5206_v7, 16  ;;  %3840 = vmatprep.subr.bf16.mxu1 %v3939_v26  ;;  %v1793_v8 = vrot.slane %v1791_v60, 5  ;;  %v1609_v37 = vshrl.u32 %v5220_v61, 16  ;;  %v3714_v19 = vcombine.low %v5206_v7, %v5220_v61 }
  0xed   : > { %v5227_v16 = vpop.permute.xlu0 %2153  ;;  %v5243_v29 = vrot.slane %v1596_v41, 4  ;;  %v3020_v55 = vsel %vm3018_vm14, %v2987_v23, %v5096_v9  ;;  %v3036_v42 = vsel %vm3018_vm14, %v5157_v54, %v5086_v4  ;;  %v1770_v6 = vor.u32 %v1769_v15, %v1766_v13  ;;  %v3971_v9 = vld [vmem:[%s4162_s30 + $0x78] sm:$0xf]  ;;  %v3972_v4 = vld [vmem:[%s4162_s30 + $0x7c] sm:$0xf] }
  0xee   : > { %v5236_v51 = vpop.permute.xlu1 %2247  ;;  %2603 = vrot.lane.b32.xlu1 %v3721_v59, %s4077_s9  ;;  %3807 = vmatprep.mubr.msk.bf16.mxu0 %vm3071_vm15, %v3020_v55  ;;  %v1773_v20 = vshll.u32 %v5167_v25, 16  ;;  %v1779_v3 = vrot.slane %v1777_v48, 4  ;;  %v1783_v35 = vshll.u32 %v5234_v62, 16  ;;  %v1601_v47 = vrot.slane %v1599_v18, 5  ;;  %v5273_v48 = vld [vmem:[%s4162_s30 + $0xbc] sm:$0x1] }
  0xef   : > { %2587 = vrot.lane.b32.xlu0 %v3713_v58, %s4077_s9  ;;  %3823 = vmatprep.mubr.msk.bf16.mxu1 %vm3071_vm15, %v3036_v42  ;;  %v3623_v54 = vcombine.low %v3971_v9, %v3972_v4  ;;  %v1578_v1 = vor.u32 %v1577_v14, %v1574_v27  ;;  %v1581_v38 = vshll.u32 %v5202_v63, 16  ;;  %v1771_v24 = vrot.slane %v1770_v6, 4  ;;  %v5287_v27 = vld [vmem:[%s4162_s30 + $0x5c] sm:$0x1]  ;;  %v3585_v9 = vld [vmem:[%s4162_s30 + $0x48] sm:$0xe] }
  0xf0   : > { %3804 = vmatpush3.bf16.msra.mxu0 %v3939_v26  ;;  %3843 = vmatpush3.bf16.msra.mxu1 %v3939_v26  ;;  %v1775_v22 = vrot.slane %v1773_v20, 5  ;;  %v1785_v40 = vrot.slane %v1783_v35, 5  ;;  %v1587_v11 = vrot.slane %v1585_v12, 4  ;;  %v1591_v44 = vshll.u32 %v5257_v52, 16 }
  0xf1   : > { %v5259_v5 = vpop.permute.xlu0 %2231  ;;  %3805 = vmatprep.subr.bf16.mxu0 %v3944_v49  ;;  %3841 = vmatprep.subr.bf16.mxu1 %v3944_v49  ;;  %v1579_v34 = vrot.slane %v1578_v1, 4  ;;  %v1583_v28 = vrot.slane %v1581_v38, 5  ;;  %v3038_v57 = vsel %vm3018_vm14, %v5184_v2, %v5147_v32  ;;  %v3022_v7 = vsel %vm3018_vm14, %v5188_v36, %v5170_v43 }
  0xf2   : > { %v5265_v23 = vpop.permute.xlu1 %2249  ;;  %2605 = vrot.lane.b32.xlu1 %v3722_v39, %s4077_s9  ;;  %v1776_v26 = vsel %vm4251_vm5, %v1771_v24, %v1775_v22  ;;  %v1780_v0 = vor.u32 %v1779_v3, %v1775_v22  ;;  %v1794_v56 = vor.u32 %v1793_v8, %v1790_v45  ;;  %v1593_v2 = vrot.slane %v1591_v44, 5  ;;  %v3973_v45 = vld [vmem:[%s4162_s30 + $0x18] sm:$0xf]  ;;  %v3974_v39 = vld [vmem:[%s4162_s30 + $0x1c] sm:$0xf] }
  0xf3   : > { %2589 = vrot.lane.b32.xlu0 %v3714_v19, %s4077_s9  ;;  %v1584_v15 = vsel %vm4251_vm5, %v1579_v34, %v1583_v28  ;;  %v1588_v32 = vor.u32 %v1587_v11, %v1583_v28  ;;  %v1797_v59 = vshll.u32 %v5213_v10, 16  ;;  %v1803_v36 = vrot.slane %v1801_v53, 4  ;;  %v3593_v19 = vld [vmem:[%s4162_s30 + $0xa8] sm:$0xe] }
  0xf4   : > { %3806 = vmatpush3.bf16.msra.mxu0 %v3944_v49  ;;  %v1781_v33 = vrot.slane %v1780_v0, 4  ;;  %3844 = vmatpush3.bf16.msra.mxu1 %v3944_v49  ;;  %v1795_v43 = vrot.slane %v1794_v56, 4  ;;  %v1807_v60 = vshll.u32 %v5273_v48, 16  ;;  %v1602_v58 = vor.u32 %v1601_v47, %v5243_v29 }
  0xf5   : > { %v5281_v13 = vpop.permute.xlu0 %2233  ;;  %v1589_v14 = vrot.slane %v1588_v32, 4  ;;  %v1799_v12 = vrot.slane %v1797_v59, 5  ;;  %v1605_v41 = vshll.u32 %v5220_v61, 16  ;;  %v3615_v18 = vcombine.low %v3973_v45, %v3974_v39  ;;  %v3978_v59 = vld [vmem:[%s4162_s30 + $0x28] sm:$0xf] }
  0xf6   : > { %v5289_v17 = vpop.permute.xlu1 %2343  ;;  %v1786_v8 = vsel %vm4251_vm5, %v1781_v33, %v1785_v40  ;;  %v1611_v49 = vrot.slane %v1609_v37, 4  ;;  %v1615_v53 = vshll.u32 %v5287_v27, 16  ;;  %v1809_v20 = vrot.slane %v1807_v60, 5  ;;  %v5343_v60 = vld [vmem:[%s4162_s30 + $0xac] sm:$0xf] }
  0xf7   : > { %3808 = vmatmul.mubr.msk.bf16.vlgmr.msra.gmra.mxu0 %vm3071_vm15, %v3022_v7  ;;  %v3737_v29 = vcombine.low %v1776_v26, %v1786_v8  ;;  %v1594_v42 = vsel %vm4251_vm5, %v1589_v14, %v1593_v2  ;;  %v1804_v6 = vor.u32 %v1803_v36, %v1799_v12  ;;  %3824 = vmatmul.mubr.msk.bf16.vlgmr.msra.gmra.mxu1 %vm3071_vm15, %v3038_v57  ;;  %v1603_v47 = vrot.slane %v1602_v58, 4  ;;  %v225_v26 = vld [vmem:[%s4162_s30 + $0xa8] sm:$0xf]  ;;  %v3977_v2 = vld [vmem:[%s4162_s30 + $0x24] sm:$0xf] }
  0xf8   : > { %v3729_v35 = vcombine.low %v1584_v15, %v1594_v42  ;;  %v1607_v37 = vrot.slane %v1605_v41, 5  ;;  %v5313_v4 = vsel %vm2771_vm6, %v3623_v54, %v5111_v31  ;;  %v1800_v1 = vsel %vm4251_vm5, %v1795_v43, %v1799_v12  ;;  %v3976_v15 = vld [vmem:[%s4162_s30 + $0x88] sm:$0xf]  ;;  %v5351_v58 = vld [vmem:[%s4162_s30 + $0xb0] sm:$0x1] }
  0xf9   : > { %v5303_v55 = vpop.permute.xlu0 %2327  ;;  %2683 = vrot.lane.b32.xlu1 %v3737_v29, %s4078_s10  ;;  %v1805_v38 = vrot.slane %v1804_v6, 4  ;;  %v3609_v24 = vrot.slane %v3593_v19, 9  ;;  %v1617_v40 = vrot.slane %v1615_v53, 5  ;;  %v2009_v11 = vrot.slane %v5167_v25, 5  ;;  %v209_v39 = vld [vmem:[%s4162_s30 + $0x48] sm:$0xf] }
  0xfa   : > { %v5308_v3 = vpop.permute.xlu1 %2345  ;;  %2667 = vrot.lane.b32.xlu0 %v3729_v35, %s4078_s10  ;;  %v1612_v22 = vor.u32 %v1611_v49, %v1607_v37  ;;  %v2012_v34 = vrot.slane %v5234_v62, 5  ;;  %v5325_v54 = vsel %vm2771_vm6, %v3615_v18, %v5123_v50  ;;  %v1608_v44 = vsel %vm4251_vm5, %v1603_v47, %v1607_v37  ;;  %v3975_v50 = vld [vmem:[%s4162_s30 + $0x84] sm:$0xf]  ;;  %v5361_v6 = vld [vmem:[%s4162_s30 + $0x4c] sm:$0xf] }
  0xfb   : > { %v1810_v28 = vsel %vm4251_vm5, %v1805_v38, %v1809_v20  ;;  %v3601_v57 = vrot.slane %v3585_v9, 9  ;;  %v2010_v62 = vsel %vm4193_vm2, %v3609_v24, %v2009_v11  ;;  %v2011_v7 = vrot.slane %v2009_v11, 4  ;;  %v5374_v9 = vld [vmem:[%s4162_s30 + $0x50] sm:$0x1] }
  0xfc   : > { %v3738_v25 = vcombine.low %v1800_v1, %v1810_v28  ;;  %v1613_v0 = vrot.slane %v1612_v22, 4  ;;  %v3624_v32 = vcombine.low %v3975_v50, %v3976_v15  ;;  %v3616_v33 = vcombine.low %v3977_v2, %v3978_v59  ;;  %v3586_v59 = vld [vmem:[%s4162_s30 + $0x54] sm:$0xe] }
  0xfd   : > { %v5321_v31 = vpop.permute.xlu0 %2329  ;;  %v1953_v43 = vrot.slane %v5202_v63, 5  ;;  %v1956_v36 = vrot.slane %v5257_v52, 5  ;;  %v2013_v12 = vsel %vm4193_vm2, %v2011_v7, %v2012_v34  ;;  %v585_v41 = vshrl.u32 %v225_v26, 16 }
  0xfe   : > { %2685 = vrot.lane.b32.xlu1 %v3738_v25, %s4078_s10  ;;  %v1618_v14 = vsel %vm4251_vm5, %v1613_v0, %v1617_v40  ;;  %v588_v45 = vshll.u32 %v225_v26, 16  ;;  %v3753_v18 = vcombine.low %v2010_v62, %v2013_v12  ;;  %v594_v29 = vshll.u32 %v5343_v60, 16  ;;  %v3594_v62 = vld [vmem:[%s4162_s30 + $0xb4] sm:$0xe] }
  0xff   : > { %v5334_v56 = vpop.permute.xlu1 %2423  ;;  %v3730_v52 = vcombine.low %v1608_v44, %v1618_v14  ;;  %v1954_v8 = vsel %vm4193_vm2, %v3601_v57, %v1953_v43  ;;  %v1955_v49 = vrot.slane %v1953_v43, 4  ;;  %v587_v53 = vrot.slane %v585_v41, 4 }
 0x100   : > { %v590_v19 = vrot.slane %v588_v45, 5  ;;  %v598_v42 = vshrl.u32 %v5343_v60, 16  ;;  %v5368_v35 = vsel %vm2771_vm6, %v3624_v32, %v5208_v46  ;;  %v604_v37 = vshll.u32 %v5351_v58, 16 }
 0x101   : > { %v5354_v63 = vpop.permute.xlu0 %2407  ;;  %2669 = vrot.lane.b32.xlu0 %v3730_v52, %s4078_s10  ;;  %v1957_v47 = vsel %vm4193_vm2, %v1955_v49, %v1956_v36  ;;  %v393_v1 = vshrl.u32 %v209_v39, 16  ;;  %v596_v22 = vrot.slane %v594_v29, 5  ;;  %v396_v28 = vshll.u32 %v209_v39, 16  ;;  %v227_v52 = vld [vmem:[%s4162_s30 + $0xb4] sm:$0xf] }
 0x102   : > { %2763 = vrot.lane.b32.xlu1 %v3753_v18, %s4079_s11  ;;  %v3745_v38 = vcombine.low %v1954_v8, %v1957_v47  ;;  %v591_v24 = vor.u32 %v590_v19, %v587_v53  ;;  %v600_v40 = vrot.slane %v598_v42, 4  ;;  %v606_v46 = vrot.slane %v604_v37, 5 }
 0x103   : > { %v5363_v20 = vpop.permute.xlu1 %2425  ;;  %v395_v34 = vrot.slane %v393_v1, 4  ;;  %v402_v44 = vshll.u32 %v5361_v6, 16  ;;  %v406_v25 = vshrl.u32 %v5361_v6, 16  ;;  %v412_v0 = vshll.u32 %v5374_v9, 16 }
 0x104   : > { %v592_v57 = vrot.slane %v591_v24, 4  ;;  %v601_v26 = vor.u32 %v600_v40, %v596_v22  ;;  %v5387_v50 = vsel %vm2771_vm6, %v3616_v33, %v5227_v16  ;;  %v5393_v15 = vsel %vm2820_vm7, %v5313_v4, %v5236_v51 }
 0x105   : > { %v5377_v11 = vpop.permute.xlu0 %2409  ;;  %2747 = vrot.lane.b32.xlu0 %v3745_v38, %s4079_s11  ;;  %v398_v32 = vrot.slane %v396_v28, 5  ;;  %v404_v2 = vrot.slane %v402_v44, 5  ;;  %v5399_v43 = vsel %vm2820_vm7, %v5325_v54, %v5259_v5  ;;  %v408_v36 = vrot.slane %v406_v25, 4 }
 0x106   : > { %v597_v16 = vsel %vm4251_vm5, %v592_v57, %v596_v22  ;;  %v602_v33 = vrot.slane %v601_v26, 4  ;;  %v414_v41 = vrot.slane %v412_v0, 5  ;;  %v3610_v51 = vrot.slane %v3594_v62, 9  ;;  %v5429_v22 = vld [vmem:[%s4162_s30 + $0xbc] sm:$0x1] }
 0x107   : > { %v5383_v7 = vpop.permute.xlu1 %2503  ;;  %v399_v12 = vor.u32 %v398_v32, %v395_v34  ;;  %v2016_v4 = vrot.slane %v5213_v10, 5  ;;  %v409_v39 = vor.u32 %v408_v36, %v404_v2  ;;  %v2019_v5 = vrot.slane %v5273_v48, 5  ;;  %v5418_v48 = vld [vmem:[%s4162_s30 + $0xb8] sm:$0xf] }
 0x108   : > { %v607_v45 = vsel %vm4251_vm5, %v602_v33, %v606_v46  ;;  %v3602_v54 = vrot.slane %v3586_v59, 9  ;;  %v802_v10 = vrot.slane %v5351_v58, 5  ;;  %v1960_v42 = vrot.slane %v5220_v61, 5  ;;  %v5440_v62 = vld [vmem:[%s4162_s30 + $0x58] sm:$0xf] }
 0x109   : > { %v5403_v14 = vpop.permute.xlu0 %2487  ;;  %v3643_v8 = vcombine.low %v597_v16, %v607_v45  ;;  %v400_v49 = vrot.slane %v399_v12, 4  ;;  %v2017_v53 = vsel %vm4193_vm2, %v3610_v51, %v2016_v4  ;;  %v2018_v19 = vrot.slane %v2016_v4, 4  ;;  %v5447_v16 = vld [vmem:[%s4162_s30 + $0x5c] sm:$0x1] }
 0x10a   : > { %v410_v29 = vrot.slane %v409_v39, 4  ;;  %v1963_v47 = vrot.slane %v5287_v27, 5  ;;  %v746_v38 = vrot.slane %v5374_v9, 5  ;;  %v609_v61 = vshrl.u32 %v227_v52, 16  ;;  %v211_v27 = vld [vmem:[%s4162_s30 + $0x54] sm:$0xf] }
 0x10b   : > { %v5410_v18 = vpop.permute.xlu1 %2505  ;;  %2175 = vrot.lane.b32.xlu1 %v3643_v8, %s4074_s6  ;;  %v405_v1 = vsel %vm4251_vm5, %v400_v49, %v404_v2  ;;  %v2020_v24 = vsel %vm4193_vm2, %v2018_v19, %v2019_v5  ;;  %v1961_v34 = vsel %vm4193_vm2, %v3602_v54, %v1960_v42  ;;  %v1962_v28 = vrot.slane %v1960_v42, 4  ;;  %v638_v42 = vld [vmem:[%s4162_s30 + $0x48] sm:$0xe] }
 0x10c   : > { %v415_v40 = vsel %vm4251_vm5, %v410_v29, %v414_v41  ;;  %v3754_v46 = vcombine.low %v2017_v53, %v2020_v24  ;;  %v611_v26 = vrot.slane %v609_v61, 4  ;;  %v612_v25 = vshll.u32 %v227_v52, 16  ;;  %v646_v52 = vld [vmem:[%s4162_s30 + $0xa8] sm:$0xe] }
 0x10d   : > { %v5420_v37 = vpop.permute.xlu0 %2489  ;;  %v3635_v57 = vcombine.low %v405_v1, %v415_v40  ;;  %v618_v0 = vshll.u32 %v5418_v48, 16  ;;  %v1964_v32 = vsel %vm4193_vm2, %v1962_v28, %v1963_v47  ;;  %v622_v2 = vshrl.u32 %v5418_v48, 16 }
 0x10e   : > { %v628_v59 = vshll.u32 %v5429_v22, 16  ;;  %v417_v33 = vshrl.u32 %v211_v27, 16  ;;  %v3746_v12 = vcombine.low %v1961_v34, %v1964_v32  ;;  %v614_v41 = vrot.slane %v612_v25, 5  ;;  %v647_v32 = vld [vmem:[%s4162_s30 + $0xb4] sm:$0xe] }
 0x10f   : > { %v5436_v44 = vpop.permute.xlu1 %2599  ;;  %2159 = vrot.lane.b32.xlu0 %v3635_v57, %s4074_s6  ;;  %2765 = vrot.lane.b32.xlu1 %v3754_v46, %s4079_s11  ;;  %v620_v51 = vrot.slane %v618_v0, 5  ;;  %v420_v4 = vshll.u32 %v211_v27, 16  ;;  %v2844_v45 = vsel %vm2820_vm7, %v5368_v35, %v5265_v23  ;;  %v624_v39 = vrot.slane %v622_v2, 4 }
 0x110   : > { %v419_v5 = vrot.slane %v417_v33, 4  ;;  %v426_v54 = vshll.u32 %v5440_v62, 16  ;;  %v615_v49 = vor.u32 %v614_v41, %v611_v26  ;;  %v430_v19 = vshrl.u32 %v5440_v62, 16 }
 0x111   : > { %v5449_v36 = vpop.permute.xlu0 %2583  ;;  %v422_v53 = vrot.slane %v420_v4, 5  ;;  %v436_v29 = vshll.u32 %v5447_v16, 16  ;;  %v2828_v47 = vsel %vm2820_vm7, %v5387_v50, %v5281_v13  ;;  %v625_v1 = vor.u32 %v624_v39, %v620_v51 }
 0x112   : > { %v630_v23 = vrot.slane %v628_v59, 5  ;;  %v428_v35 = vrot.slane %v426_v54, 5  ;;  %v616_v24 = vrot.slane %v615_v49, 4  ;;  %v432_v27 = vrot.slane %v430_v19, 4 }
 0x113   : > { %v5458_v8 = vpop.permute.xlu1 %2601  ;;  %2749 = vrot.lane.b32.xlu0 %v3746_v12, %s4079_s11  ;;  %v423_v61 = vor.u32 %v422_v53, %v419_v5  ;;  %v438_v40 = vrot.slane %v436_v29, 5  ;;  %v626_v34 = vrot.slane %v625_v1, 4  ;;  %v3451_v28 = vrot.slane %v646_v52, 9 }
 0x114   : > { %v799_v57 = vrot.slane %v5343_v60, 5  ;;  %v3443_v26 = vrot.slane %v638_v42, 9  ;;  %v621_v13 = vsel %vm4251_vm5, %v616_v24, %v620_v51  ;;  %v433_v25 = vor.u32 %v432_v27, %v428_v35  ;;  %v3481_v42 = vld [vmem:[%s4162_s30 + $0xb4] sm:$0xf] }
 0x115   : > { %v5467_v46 = vpop.permute.xlu0 %2585  ;;  %v424_v50 = vrot.slane %v423_v61, 4  ;;  %v743_v0 = vrot.slane %v5361_v6, 5  ;;  %v2875_v2 = vsel %vm2853_vm8, %v5393_v15, %v5289_v17  ;;  %v631_v59 = vsel %vm4251_vm5, %v626_v34, %v630_v23  ;;  %v639_v17 = vld [vmem:[%s4162_s30 + $0x54] sm:$0xe] }
 0x116   : > { %v800_v60 = vsel %vm4193_vm2, %v3451_v28, %v799_v57  ;;  %v801_v33 = vrot.slane %v799_v57, 4  ;;  %v2859_v41 = vsel %vm2853_vm8, %v5399_v43, %v5303_v55  ;;  %v3644_v51 = vcombine.low %v621_v13, %v631_v59  ;;  %v5536_v28 = vld [vmem:[%s4162_s30 + $0x58] sm:$0xf] }
 0x117   : > { %v429_v6 = vsel %vm4251_vm5, %v424_v50, %v428_v35  ;;  %v434_v4 = vrot.slane %v433_v25, 4  ;;  %v744_v39 = vsel %vm4193_vm2, %v3443_v26, %v743_v0  ;;  %v745_v5 = vrot.slane %v743_v0, 4  ;;  %v5514_v35 = vld [vmem:[%s4162_s30 + $0x54] sm:$0xf]  ;;  %v3483_v26 = vld [vmem:[%s4162_s30 + $0xc0] sm:$0xf] }
 0x118   : > { %v5481_v12 = vpop.permute.xlu1 %2679  ;;  %v803_v15 = vsel %vm4193_vm2, %v801_v33, %v802_v10  ;;  %v3452_v54 = vrot.slane %v647_v32, 9  ;;  %2177 = vrot.lane.b32.xlu1 %v3644_v51, %s4074_s6  ;;  %v806_v52 = vrot.slane %v5418_v48, 5  ;;  %v809_v49 = vrot.slane %v5429_v22, 5  ;;  %v3467_v33 = vld [vmem:[%s4162_s30 + $0x60] sm:$0xf] }
 0x119   : > { %v439_v55 = vsel %vm4251_vm5, %v434_v4, %v438_v40  ;;  %v3659_v43 = vcombine.low %v800_v60, %v803_v15  ;;  %v5500_v58 = vpop.permute.xlu0 %2663  ;;  %v747_v53 = vsel %vm4193_vm2, %v745_v5, %v746_v38  ;;  %v3444_v19 = vrot.slane %v639_v17, 9  ;;  %v5559_v4 = vld [vmem:[%s4162_s30 + $0x64] sm:$0xf] }
 0x11a   : > { %v3636_v10 = vcombine.low %v429_v6, %v439_v55  ;;  %v750_v29 = vrot.slane %v5440_v62, 5  ;;  %v2877_v1 = vsel %vm2853_vm8, %v2844_v45, %v5308_v3  ;;  %v807_v48 = vsel %vm4193_vm2, %v3452_v54, %v806_v52  ;;  %v5522_v45 = vld [vmem:[%s4162_s30 + $0xb8] sm:$0xf]  ;;  %v5572_v54 = vld [vmem:[%s4162_s30 + $0xbc] sm:$0x1] }
 0x11b   : > { %v808_v22 = vrot.slane %v806_v52, 4  ;;  %v753_v23 = vrot.slane %v5447_v16, 5  ;;  %v2861_v9 = vsel %vm2853_vm8, %v2828_v47, %v5321_v31  ;;  %v3651_v38 = vcombine.low %v744_v39, %v747_v53  ;;  %v5579_v53 = vld [vmem:[%s4162_s30 + $0x5c] sm:$0x1] }
 0x11c   : > { %2161 = vrot.lane.b32.xlu0 %v3636_v10, %s4074_s6  ;;  %v2908_v24 = vsel %vm2886_vm9, %v2875_v2, %v5334_v56  ;;  %v752_v3 = vrot.slane %v750_v29, 4  ;;  %v5524_v61 = vpop.permute.xlu1 %2681  ;;  %2255 = vrot.lane.b32.xlu1 %v3659_v43, %s4073_s5  ;;  %v751_v27 = vsel %vm4193_vm2, %v3444_v19, %v750_v29  ;;  %v1200_v40 = vshrl.u32 %v3481_v42, 16 }
 0x11d   : > { %v810_v16 = vsel %vm4193_vm2, %v808_v22, %v809_v49  ;;  %v1203_v31 = vshll.u32 %v3481_v42, 16  ;;  %v2892_v47 = vsel %vm2886_vm9, %v2859_v41, %v5354_v63  ;;  %v1008_v57 = vshrl.u32 %v5514_v35, 16 }
 0x11e   : > { %v3660_v56 = vcombine.low %v807_v48, %v810_v16  ;;  %v754_v34 = vsel %vm4193_vm2, %v752_v3, %v753_v23  ;;  %v2910_v13 = vsel %vm2886_vm9, %v2877_v1, %v5363_v20  ;;  %v5544_v50 = vsel %vm2886_vm9, %v2861_v9, %v5377_v11  ;;  %v5548_v0 = vpop.permute.xlu0 %2665  ;;  %v5553_v20 = vld [vmem:[%s4162_s30 + $0xc4] sm:$0xf] }
 0x11f   : > { %v1213_v63 = vshrl.u32 %v5522_v45, 16  ;;  %v1011_v25 = vshll.u32 %v5514_v35, 16  ;;  %v3652_v32 = vcombine.low %v751_v27, %v754_v34  ;;  %v1202_v2 = vrot.slane %v1200_v40, 4 }
 0x120   : > { %2239 = vrot.lane.b32.xlu0 %v3651_v38, %s4073_s5  ;;  %v1205_v59 = vrot.slane %v1203_v31, 5  ;;  %v3675_v60 = vcombine.low %v3481_v42, %v5522_v45  ;;  %2257 = vrot.lane.b32.xlu1 %v3660_v56, %s4073_s5  ;;  %v1010_v11 = vrot.slane %v1008_v57, 4  ;;  %v1021_v41 = vshrl.u32 %v5536_v28, 16  ;;  %v5574_v55 = vpop.permute.xlu1 %2759  ;;  %v5592_v31 = vld [vmem:[%s4162_s30 + $0xc8] sm:$0x1] }
 0x121   : > { %v1224_v51 = vshrl.u32 %v3483_v26, 16  ;;  %v1227_v6 = vshll.u32 %v3483_v26, 16  ;;  %v1013_v17 = vrot.slane %v1011_v25, 5  ;;  %v3667_v15 = vcombine.low %v5514_v35, %v5536_v28 }
 0x122   : > { %v5565_v39 = vsel %vm2919_vm10, %v2908_v24, %v5383_v7  ;;  %v5569_v5 = vsel %vm2919_vm10, %v2892_v47, %v5403_v14  ;;  %v1237_v43 = vshrl.u32 %v5553_v20, 16  ;;  %v3676_v52 = vcombine.low %v3483_v26, %v5553_v20  ;;  %v5587_v23 = vpop.permute.xlu0 %2743 }
 0x123   : > { %v1032_v49 = vshrl.u32 %v3467_v33, 16  ;;  %v1035_v10 = vshll.u32 %v3467_v33, 16  ;;  %v1226_v7 = vrot.slane %v1224_v51, 4  ;;  %v1229_v19 = vrot.slane %v1227_v6, 5  ;;  %v5607_v51 = vld [vmem:[%s4162_s30 + $0x68] sm:$0x1] }
 0x124   : > { %2241 = vrot.lane.b32.xlu0 %v3652_v32, %s4073_s5  ;;  %v1045_v29 = vshrl.u32 %v5559_v4, 16  ;;  %v3668_v14 = vcombine.low %v3467_v33, %v5559_v4  ;;  %2351 = vrot.lane.b32.xlu1 %v3675_v60, %s4072_s4  ;;  %v1206_v42 = vor.u32 %v1205_v59, %v1202_v2  ;;  %v1209_v1 = vshll.u32 %v5522_v45, 16 }
 0x125   : > { %v1215_v48 = vrot.slane %v1213_v63, 4  ;;  %v1219_v22 = vshll.u32 %v5572_v54, 16  ;;  %v1014_v35 = vor.u32 %v1013_v17, %v1010_v11  ;;  %v1017_v9 = vshll.u32 %v5536_v28, 16 }
 0x126   : > { %v1023_v38 = vrot.slane %v1021_v41, 4  ;;  %v1027_v24 = vshll.u32 %v5579_v53, 16  ;;  %v1034_v3 = vrot.slane %v1032_v49, 4  ;;  %v1037_v16 = vrot.slane %v1035_v10, 5 }
 0x127   : > { %v1207_v27 = vrot.slane %v1206_v42, 4  ;;  %v1211_v40 = vrot.slane %v1209_v1, 5  ;;  %v5597_v47 = vsel %vm2919_vm10, %v2910_v13, %v5410_v18  ;;  %v1221_v56 = vrot.slane %v1219_v22, 5  ;;  %v3515_v1 = vld [vmem:[%s4162_s30 + $0xb4] sm:$0xe] }
 0x128   : > { %2335 = vrot.lane.b32.xlu0 %v3667_v15, %s4072_s4  ;;  %v1015_v34 = vrot.slane %v1014_v35, 4  ;;  %v1019_v57 = vrot.slane %v1017_v9, 5  ;;  %v5599_v26 = vpop.permute.xlu1 %2171  ;;  %2353 = vrot.lane.b32.xlu1 %v3676_v52, %s4072_s4  ;;  %v1029_v25 = vrot.slane %v1027_v24, 5  ;;  %v1230_v32 = vor.u32 %v1229_v19, %v1226_v7  ;;  %v3507_v9 = vld [vmem:[%s4162_s30 + $0x54] sm:$0xe] }
 0x129   : > { %v1216_v63 = vor.u32 %v1215_v48, %v1211_v40  ;;  %v1233_v2 = vshll.u32 %v5553_v20, 16  ;;  %v1212_v59 = vsel %vm4251_vm5, %v1207_v27, %v1211_v40  ;;  %v1239_v33 = vrot.slane %v1237_v43, 4 }
 0x12a   : > { %v1024_v60 = vor.u32 %v1023_v38, %v1019_v57  ;;  %v1243_v18 = vshll.u32 %v5592_v31, 16  ;;  %v1231_v11 = vrot.slane %v1230_v32, 4  ;;  %v1038_v6 = vor.u32 %v1037_v16, %v1034_v3 }
 0x12b   : > { %v1217_v13 = vrot.slane %v1216_v63, 4  ;;  %v1235_v41 = vrot.slane %v1233_v2, 5  ;;  %v5609_v17 = vpop.permute.xlu0 %2155  ;;  %v1020_v15 = vsel %vm4251_vm5, %v1015_v34, %v1019_v57  ;;  %v1041_v43 = vshll.u32 %v5559_v4, 16 }
 0x12c   : > { %2337 = vrot.lane.b32.xlu0 %v3668_v14, %s4072_s4  ;;  %v1025_v52 = vrot.slane %v1024_v60, 4  ;;  %v1047_v49 = vrot.slane %v1045_v29, 4  ;;  %v1245_v19 = vrot.slane %v1243_v18, 5  ;;  %v1039_v42 = vrot.slane %v1038_v6, 4  ;;  %v5622_v38 = vpop.permute.xlu1 %2761 }
 0x12d   : > { %v1222_v10 = vsel %vm4251_vm5, %v1217_v13, %v1221_v56  ;;  %v1240_v7 = vor.u32 %v1239_v33, %v1235_v41  ;;  %v1043_v35 = vrot.slane %v1041_v43, 5  ;;  %v1051_v14 = vshll.u32 %v5607_v51, 16 }
 0x12e   : > { %v3691_v48 = vcombine.low %v1212_v59, %v1222_v10  ;;  %v1030_v22 = vsel %vm4251_vm5, %v1025_v52, %v1029_v25  ;;  %v2927_v29 = vsel %vm2919_vm10, %v5544_v50, %v5420_v37  ;;  %v1236_v3 = vsel %vm4251_vm5, %v1231_v11, %v1235_v41  ;;  %v3516_v25 = vld [vmem:[%s4162_s30 + $0xc0] sm:$0xe] }
 0x12f   : > { %v3683_v24 = vcombine.low %v1020_v15, %v1030_v22  ;;  %v1241_v16 = vrot.slane %v1240_v7, 4  ;;  %v1044_v27 = vsel %vm4251_vm5, %v1039_v42, %v1043_v35  ;;  %v1048_v40 = vor.u32 %v1047_v49, %v1043_v35  ;;  %v5638_v32 = vpop.permute.xlu0 %2745  ;;  %v3508_v11 = vld [vmem:[%s4162_s30 + $0x60] sm:$0xe] }
 0x130   : > { %2431 = vrot.lane.b32.xlu1 %v3691_v48, %s4075_s7  ;;  %v1053_v56 = vrot.slane %v1051_v14, 5  ;;  %v3531_v34 = vrot.slane %v3515_v1, 9  ;;  %v1411_v37 = vrot.slane %v5522_v45, 5  ;;  %v1414_v50 = vrot.slane %v5572_v54, 5  ;;  %v3561_v7 = vld [vmem:[%s4162_s30 + $0xc0] sm:$0xf] }
 0x131   : > { %2415 = vrot.lane.b32.xlu0 %v3683_v24, %s4075_s7  ;;  %v1246_v57 = vsel %vm4251_vm5, %v1241_v16, %v1245_v19  ;;  %v3523_v63 = vrot.slane %v3507_v9, 9  ;;  %v1049_v59 = vrot.slane %v1048_v40, 4  ;;  %v1355_v60 = vrot.slane %v5536_v28, 5  ;;  %v5671_v48 = vld [vmem:[%s4162_s30 + $0x60] sm:$0xf] }
 0x132   : > { %v3692_v2 = vcombine.low %v1236_v3, %v1246_v57  ;;  %v1358_v33 = vrot.slane %v5579_v53, 5  ;;  %v2974_v18 = vsel %vm2952_vm11, %v5565_v39, %v5436_v44  ;;  %v2958_v45 = vsel %vm2952_vm11, %v5569_v5, %v5449_v36  ;;  %v5690_v3 = vld [vmem:[%s4162_s30 + $0xc4] sm:$0xf]  ;;  %v3563_v40 = vld [vmem:[%s4162_s30 + $0xcc] sm:$0xf] }
 0x133   : > { %v1412_v54 = vsel %vm4193_vm2, %v3531_v34, %v1411_v37  ;;  %v1413_v13 = vrot.slane %v1411_v37, 4  ;;  %v1054_v28 = vsel %vm4251_vm5, %v1049_v59, %v1053_v56  ;;  %v1356_v53 = vsel %vm4193_vm2, %v3523_v63, %v1355_v60  ;;  %v5705_v57 = vld [vmem:[%s4162_s30 + $0x6c] sm:$0xf] }
 0x134   : > { %2433 = vrot.lane.b32.xlu1 %v3692_v2, %s4075_s7  ;;  %v1357_v41 = vrot.slane %v1355_v60, 4  ;;  %v3532_v44 = vrot.slane %v3516_v25, 9  ;;  %v3684_v36 = vcombine.low %v1044_v27, %v1054_v28  ;;  %v1418_v6 = vrot.slane %v5553_v20, 5  ;;  %v5713_v2 = vld [vmem:[%s4162_s30 + $0x64] sm:$0xf] }
 0x135   : > { %v1415_v5 = vsel %vm4193_vm2, %v1413_v13, %v1414_v50  ;;  %v1421_v15 = vrot.slane %v5592_v31, 5  ;;  %v3524_v49 = vrot.slane %v3508_v11, 9  ;;  %v1362_v10 = vrot.slane %v5559_v4, 5 }
 0x136   : > { %v5656_v39 = vpop.permute.xlu1 %2173  ;;  %v3707_v52 = vcombine.low %v1412_v54, %v1415_v5  ;;  %v1359_v43 = vsel %vm4193_vm2, %v1357_v41, %v1358_v33  ;;  %2417 = vrot.lane.b32.xlu0 %v3684_v36, %s4075_s7  ;;  %v1419_v42 = vsel %vm4193_vm2, %v3532_v44, %v1418_v6  ;;  %v1420_v1 = vrot.slane %v1418_v6, 4  ;;  %s5946_s7 = scalar_lea.vmem [#allocation2], %s3434_s29 }
 0x137   : > { %v3699_v19 = vcombine.low %v1356_v53, %v1359_v43  ;;  %v1365_v20 = vrot.slane %v5607_v51, 5  ;;  %v2976_v4 = vsel %vm2952_vm11, %v5597_v47, %v5458_v8  ;;  %v2960_v22 = vsel %vm2952_vm11, %v2927_v29, %v5467_v46 }
 0x138   : > { %2511 = vrot.lane.b32.xlu1 %v3707_v52, %s4076_s8  ;;  %v1363_v35 = vsel %vm4193_vm2, %v3524_v49, %v1362_v10  ;;  %v1364_v14 = vrot.slane %v1362_v10, 4  ;;  %v3007_v51 = vsel %vm2985_vm12, %v2974_v18, %v5481_v12  ;;  %v1422_v24 = vsel %vm4193_vm2, %v1420_v1, %v1421_v15 }
 0x139   : > { %v5673_v31 = vpop.permute.xlu0 %2157  ;;  %v1812_v8 = vshrl.u32 %v3561_v7, 16  ;;  %v1815_v47 = vshll.u32 %v3561_v7, 16  ;;  %v2991_v46 = vsel %vm2985_vm12, %v2958_v45, %v5500_v58  ;;  %v3708_v29 = vcombine.low %v1419_v42, %v1422_v24  ;;  %v5724_v45 = vld [vmem:[%s4162_s30 + $0x70] sm:$0xf]  ;;  %v5749_v42 = vld [vmem:[%s4162_s30 + $0x68] sm:$0x1] }
 0x13a   : > { %v5683_v9 = vpop.permute.xlu1 %2251  ;;  %v1366_v16 = vsel %vm4193_vm2, %v1364_v14, %v1365_v20  ;;  %v1620_v27 = vshrl.u32 %v5671_v48, 16  ;;  %2495 = vrot.lane.b32.xlu0 %v3699_v19, %s4076_s8  ;;  %v3009_v56 = vsel %vm2985_vm12, %v2976_v4, %v5524_v61  ;;  %v2993_v34 = vsel %vm2985_vm12, %v2960_v22, %v5548_v0  ;;  %v5718_v0 = vld [vmem:[%s4162_s30 + $0xd0] sm:$0xf] }
 0x13b   : > { %v3700_v12 = vcombine.low %v1363_v35, %v1366_v16  ;;  %v1623_v58 = vshll.u32 %v5671_v48, 16  ;;  %v1814_v50 = vrot.slane %v1812_v8, 4  ;;  %v1825_v63 = vshrl.u32 %v5690_v3, 16 }
 0x13c   : > { %2513 = vrot.lane.b32.xlu1 %v3708_v29, %s4076_s8  ;;  %v3723_v25 = vcombine.low %v3561_v7, %v5690_v3  ;;  %v3040_v61 = vsel %vm3018_vm14, %v3007_v51, %v5574_v55  ;;  %v1817_v59 = vrot.slane %v1815_v47, 5  ;;  %v3024_v60 = vsel %vm3018_vm14, %v2991_v46, %v5587_v23  ;;  %v5730_v55 = vld [vmem:[%s4162_s30 + $0xc8] sm:$0x1] }
 0x13d   : > { %v5707_v37 = vpop.permute.xlu0 %2235  ;;  %v1836_v33 = vshrl.u32 %v3563_v40, 16  ;;  %v1839_v18 = vshll.u32 %v3563_v40, 16  ;;  %3827 = vmatprep.mubr.msk.bf16.mxu1 %vm3071_vm15, %v3040_v61  ;;  %v1622_v54 = vrot.slane %v1620_v27, 4  ;;  %v1625_v13 = vrot.slane %v1623_v58, 5  ;;  %3811 = vmatprep.mubr.msk.bf16.mxu0 %vm3071_vm15, %v3024_v60  ;;  %v5762_v27 = vld [vmem:[%s4162_s30 + $0xd4] sm:$0x1] }
 0x13e   : > { %v1644_v11 = vshrl.u32 %v5705_v57, 16  ;;  %v1647_v28 = vshll.u32 %v5705_v57, 16  ;;  %2497 = vrot.lane.b32.xlu0 %v3700_v12, %s4076_s8  ;;  %v1633_v23 = vshrl.u32 %v5713_v2, 16  ;;  %v3715_v41 = vcombine.low %v5671_v48, %v5713_v2  ;;  %s3348_s8 = sshll.u32 %s5946_s7, 4  ;;  %s6081_s8 = int_to_ptr.vmem [resolvable:$true] %s3348_s8 }
 0x13f   : > { %v5732_v53 = vpop.permute.xlu1 %2253  ;;  %v1849_v44 = vshrl.u32 %v5718_v0, 16  ;;  %v3724_v36 = vcombine.low %v3563_v40, %v5718_v0  ;;  %v1838_v6 = vrot.slane %v1836_v33, 4  ;;  %v1841_v15 = vrot.slane %v1839_v18, 5  ;;  %s3994_s18 = scalar_lea.vmem %s6081_s8, 4096  ;;  %p4001_p1 = scmp.lt.s32.totalorder %s6081_s8, %s3999_s21 }
 0x140   : > { %2607 = vrot.lane.b32.xlu1 %v3723_v25, %s4077_s9  ;;  %v1657_v52 = vshrl.u32 %v5724_v45, 16  ;;  %v3716_v43 = vcombine.low %v5705_v57, %v5724_v45  ;;  %v1818_v49 = vor.u32 %v1817_v59, %v1814_v50  ;;  %v1821_v10 = vshll.u32 %v5690_v3, 16  ;;  %p3995_p12 = scmp.ne.s32.totalorder %s6081_s8, %s3994_s18  ;;  %p4002_p2 = scmp.lt.s32.totalorder %s4000_s23, %s3994_s18 }
 0x141   : > { %v5740_v5 = vpop.permute.xlu0 %2237  ;;  %v1827_v7 = vrot.slane %v1825_v63, 4  ;;  %v1831_v19 = vshll.u32 %v5730_v55, 16  ;;  %v1646_v1 = vrot.slane %v1644_v11, 4  ;;  %v1649_v20 = vrot.slane %v1647_v28, 5 }
 0x142   : > { %v1626_v48 = vor.u32 %v1625_v13, %v1622_v54  ;;  %v1629_v4 = vshll.u32 %v5713_v2, 16  ;;  %2591 = vrot.lane.b32.xlu0 %v3715_v41, %s4077_s9  ;;  %v1819_v35 = vrot.slane %v1818_v49, 4  ;;  %v1823_v14 = vrot.slane %v1821_v10, 5  ;;  %p3996_p13 = pnand %p3995_p12, %p4142_p4  ;;  %p4003_p3 = por %p4002_p2, %p4001_p1 }
 0x143   : > { %v5752_v22 = vpop.permute.xlu1 %2347  ;;  %v1833_v51 = vrot.slane %v1831_v19, 5  ;;  %v1635_v24 = vrot.slane %v1633_v23, 4  ;;  %v1639_v29 = vshll.u32 %v5749_v42, 16  ;;  %v3042_v16 = vsel %vm3018_vm14, %v3009_v56, %v5622_v38  ;;  %v5773_v38 = vld [vmem:[%s4162_s30 + $0x74] sm:$0x1] }
 0x144   : > { %2609 = vrot.lane.b32.xlu1 %v3724_v36, %s4077_s9  ;;  %v1627_v47 = vrot.slane %v1626_v48, 4  ;;  %v1631_v46 = vrot.slane %v1629_v4, 5  ;;  %v1824_v40 = vsel %vm4251_vm5, %v1819_v35, %v1823_v14  ;;  %v1828_v12 = vor.u32 %v1827_v7, %v1823_v14  ;;  %3828 = vmatmul.mubr.msk.bf16.gmra.mxu1 %vm3071_vm15, %v3042_v16  ;;  %v3595_v36 = vld [vmem:[%s4162_s30 + $0xc0] sm:$0xe]  ;;  %p3997_p0 = pneg %p3996_p13 }
 0x145   : > { %v5755_v8 = vpop.permute.xlu0 %2331  ;;  %v3026_v58 = vsel %vm3018_vm14, %v2993_v34, %v5638_v32  ;;  %v1842_v57 = vor.u32 %v1841_v15, %v1838_v6  ;;  %v1641_v25 = vrot.slane %v1639_v29, 5  ;;  %v1845_v61 = vshll.u32 %v5718_v0, 16  ;;  %v3587_v19 = vld [vmem:[%s4162_s30 + $0x60] sm:$0xe]  ;;  %v3596_v29 = vld [vmem:[%s4162_s30 + $0xcc] sm:$0xe] }
 0x146   : > { %v1632_v50 = vsel %vm4251_vm5, %v1627_v47, %v1631_v46  ;;  %v1636_v63 = vor.u32 %v1635_v24, %v1631_v46  ;;  %3812 = vmatmul.mubr.msk.bf16.gmra.mxu0 %vm3071_vm15, %v3026_v58  ;;  %2593 = vrot.lane.b32.xlu0 %v3716_v43, %s4077_s9  ;;  %v1829_v56 = vrot.slane %v1828_v12, 4  ;;  %v1851_v32 = vrot.slane %v1849_v44, 4  ;;  %p4004_p5 = pnand %p4003_p3, %p3997_p0 }
 0x147   : > { %v1843_v59 = vrot.slane %v1842_v57, 4  ;;  %v1855_v34 = vshll.u32 %v5762_v27, 16  ;;  %v5778_v60 = vpop.permute.xlu1 %2349  ;;  %v1847_v18 = vrot.slane %v1845_v61, 5  ;;  %v1650_v54 = vor.u32 %v1649_v20, %v1646_v1 }
 0x148   : > { %v1637_v33 = vrot.slane %v1636_v63, 4  ;;  %v1653_v13 = vshll.u32 %v5724_v45, 16  ;;  %v1834_v28 = vsel %vm4251_vm5, %v1829_v56, %v1833_v51  ;;  %v1659_v23 = vrot.slane %v1657_v52, 4 }
 0x149   : > { %v5781_v11 = vpop.permute.xlu0 %2333  ;;  %v1663_v41 = vshll.u32 %v5773_v38, 16  ;;  %v3739_v44 = vcombine.low %v1824_v40, %v1834_v28  ;;  %v1852_v15 = vor.u32 %v1851_v32, %v1847_v18  ;;  %v1857_v43 = vrot.slane %v1855_v34, 5 }
 0x14a   : > { %v1642_v6 = vsel %vm4251_vm5, %v1637_v33, %v1641_v25  ;;  %v1651_v10 = vrot.slane %v1650_v54, 4  ;;  %v1655_v7 = vrot.slane %v1653_v13, 5  ;;  %v1848_v1 = vsel %vm4251_vm5, %v1843_v59, %v1847_v18 }
 0x14b   : > { %v3731_v49 = vcombine.low %v1632_v50, %v1642_v6  ;;  %2687 = vrot.lane.b32.xlu1 %v3739_v44, %s4078_s10  ;;  %v1853_v52 = vrot.slane %v1852_v15, 4  ;;  %v3611_v20 = vrot.slane %v3595_v36, 9  ;;  %v1665_v4 = vrot.slane %v1663_v41, 5  ;;  %v3588_v50 = vld [vmem:[%s4162_s30 + $0x6c] sm:$0xe] }
 0x14c   : > { %v1660_v48 = vor.u32 %v1659_v23, %v1655_v7  ;;  %v2023_v35 = vrot.slane %v5690_v3, 5  ;;  %v2026_v14 = vrot.slane %v5730_v55, 5  ;;  %v1656_v47 = vsel %vm4251_vm5, %v1651_v10, %v1655_v7 }
 0x14d   : > { %2671 = vrot.lane.b32.xlu0 %v3731_v49, %s4078_s10  ;;  %v1858_v24 = vsel %vm4251_vm5, %v1853_v52, %v1857_v43  ;;  %v3603_v46 = vrot.slane %v3587_v19, 9  ;;  %v1967_v55 = vrot.slane %v5713_v2, 5  ;;  %v1970_v57 = vrot.slane %v5749_v42, 5 }
 0x14e   : > { %v5796_v51 = vpop.permute.xlu1 %2427  ;;  %v3740_v40 = vcombine.low %v1848_v1, %v1858_v24  ;;  %v1661_v12 = vrot.slane %v1660_v48, 4  ;;  %v2024_v58 = vsel %vm4193_vm2, %v3611_v20, %v2023_v35  ;;  %v2025_v3 = vrot.slane %v2023_v35, 4  ;;  %v3979_v20 = vld [vmem:[%s4162_s30 + $0x90] sm:$0xf]  ;;  %v3980_v48 = vld [vmem:[%s4162_s30 + $0x94] sm:$0xf] }
 0x14f   : > { %v5803_v16 = vpop.permute.xlu0 %2411  ;;  %v3612_v61 = vrot.slane %v3596_v29, 9  ;;  %v2030_v56 = vrot.slane %v5718_v0, 5  ;;  %v1968_v34 = vsel %vm4193_vm2, %v3603_v46, %v1967_v55  ;;  %v1969_v2 = vrot.slane %v1967_v55, 4 }
 0x150   : > { %2689 = vrot.lane.b32.xlu1 %v3740_v40, %s4078_s10  ;;  %v1666_v63 = vsel %vm4251_vm5, %v1661_v12, %v1665_v4  ;;  %v2027_v25 = vsel %vm4193_vm2, %v2025_v3, %v2026_v14  ;;  %v2033_v18 = vrot.slane %v5762_v27, 5  ;;  %v3604_v30 = vrot.slane %v3588_v50, 9  ;;  %v3982_v14 = vld [vmem:[%s4162_s30 + $0x34] sm:$0xf] }
 0x151   : > { %v3732_v59 = vcombine.low %v1656_v47, %v1666_v63  ;;  %v3755_v32 = vcombine.low %v2024_v58, %v2027_v25  ;;  %v2031_v42 = vsel %vm4193_vm2, %v3612_v61, %v2030_v56  ;;  %v2032_v33 = vrot.slane %v2030_v56, 4  ;;  %v3984_v61 = vld [vmem:[%s4162_s30 + $0xa0] sm:$0xf] }
 0x152   : > { %v1971_v0 = vsel %vm4193_vm2, %v1969_v2, %v1970_v57  ;;  %v1974_v13 = vrot.slane %v5724_v45, 5  ;;  %v1977_v28 = vrot.slane %v5773_v38, 5  ;;  %v3625_v4 = vcombine.low %v3979_v20, %v3980_v48  ;;  %v3985_v2 = vld [vmem:[%s4162_s30 + $0x3c] sm:$0xf] }
 0x153   : > { %2673 = vrot.lane.b32.xlu0 %v3732_v59, %s4078_s10  ;;  %v3747_v41 = vcombine.low %v1968_v34, %v1971_v0  ;;  %v2034_v27 = vsel %vm4193_vm2, %v2032_v33, %v2033_v18  ;;  %v3617_v24 = vcombine.low %v3981_v21, %v3982_v14 }
 0x154   : > { %v5821_v54 = vpop.permute.xlu1 %2429  ;;  %2767 = vrot.lane.b32.xlu1 %v3755_v32, %s4079_s11  ;;  %v3756_v36 = vcombine.low %v2031_v42, %v2034_v27  ;;  %v1975_v44 = vsel %vm4193_vm2, %v3604_v30, %v1974_v13  ;;  %v1976_v6 = vrot.slane %v1974_v13, 4  ;;  %v2810_v46 = vsel %vm2771_vm6, %v3625_v4, %v5599_v26  ;;  %v3986_v42 = vld [vmem:[%s4162_s30 + $0x40] sm:$0xf] }
 0x155   : > { %v5828_v23 = vpop.permute.xlu0 %2413  ;;  %v2846_v29 = vsel %vm2820_vm7, %v2810_v46, %v5683_v9  ;;  %v2786_v58 = vsel %vm2771_vm6, %v3617_v24, %v5609_v17  ;;  %v3618_v33 = vcombine.low %v3985_v2, %v3986_v42 }
 0x156   : > { %v1978_v45 = vsel %vm4193_vm2, %v1976_v6, %v1977_v28  ;;  %v2879_v40 = vsel %vm2853_vm8, %v2846_v29, %v5752_v22  ;;  %v2830_v55 = vsel %vm2820_vm7, %v2786_v58, %v5707_v37 }
 0x157   : > { %2751 = vrot.lane.b32.xlu0 %v3747_v41, %s4079_s11  ;;  %v3748_v43 = vcombine.low %v1975_v44, %v1978_v45  ;;  %v2912_v3 = vsel %vm2886_vm9, %v2879_v40, %v5796_v51  ;;  %v2863_v9 = vsel %vm2853_vm8, %v2830_v55, %v5755_v8  ;;  %v3983_v8 = vld [vmem:[%s4162_s30 + $0x9c] sm:$0xf]  ;;  %v2789_v28 = vsel %vm2771_vm6, %v3618_v33, %v5673_v31  ;;  %v5938_v40 = vld [vmem:[%s6134_s2] ss:$0 sm:$0xff]  ;;  %v3989_v33 = vld [vmem:[%s4162_s30 + $0x48] sm:$0xf] }
 0x158   : > { %v2508_v15 = vpop.permute.xlu1 %2507  ;;  %2769 = vrot.lane.b32.xlu1 %v3756_v36, %s4079_s11  ;;  %v2896_v50 = vsel %vm2886_vm9, %v2863_v9, %v5803_v16  ;;  %v3626_v56 = vcombine.low %v3983_v8, %v3984_v61 }
 0x159   : > { %v2492_v38 = vpop.permute.xlu0 %2491  ;;  %v2945_v26 = vsel %vm2919_vm10, %v2912_v3, %v2508_v15 }
 0x15a   : > { %v2929_v51 = vsel %vm2919_vm10, %v2896_v50, %v2492_v38  ;;  %v2813_v34 = vsel %vm2771_vm6, %v3626_v56, %v5656_v39  ;;  %v2832_v39 = vsel %vm2820_vm7, %v2789_v28, %v5740_v5  ;;  %v3987_v56 = vld [vmem:[%s4162_s30 + $0xa8] sm:$0xf] }
 0x15b   : > { %2753 = vrot.lane.b32.xlu0 %v3748_v43, %s4079_s11  ;;  %v2848_v18 = vsel %vm2820_vm7, %v2813_v34, %v5732_v53  ;;  %v2865_v53 = vsel %vm2853_vm8, %v2832_v39, %v5781_v11  ;;  %v3992_v39 = vld [vmem:[%s4162_s30 + $0xb8] sm:$0xf] }
 0x15c   : > { %v2510_v49 = vpop.permute.xlu1 %2509  ;;  %v2881_v30 = vsel %vm2853_vm8, %v2848_v18, %v5778_v60  ;;  %v3990_v18 = vld [vmem:[%s4162_s30 + $0x4c] sm:$0xf] }
 0x15d   : > { %v2494_v10 = vpop.permute.xlu0 %2493  ;;  %v2914_v13 = vsel %vm2886_vm9, %v2881_v30, %v5821_v54  ;;  %v2898_v54 = vsel %vm2886_vm9, %v2865_v53, %v5828_v23  ;;  %v3619_v30 = vcombine.low %v3989_v33, %v3990_v18 }
 0x15e   : > { %v2947_v41 = vsel %vm2919_vm10, %v2914_v13, %v2510_v49  ;;  %v2931_v6 = vsel %vm2919_vm10, %v2898_v54, %v2494_v10 }
 0x160   : > { %v2604_v7 = vpop.permute.xlu1 %2603 }
 0x161   : > { %v2588_v19 = vpop.permute.xlu0 %2587  ;;  %v2978_v57 = vsel %vm2952_vm11, %v2945_v26, %v2604_v7 }
 0x162   : > { %v2962_v25 = vsel %vm2952_vm11, %v2929_v51, %v2588_v19 }
 0x164   : > { %v2606_v1 = vpop.permute.xlu1 %2605 }
 0x165   : > { %v2590_v52 = vpop.permute.xlu0 %2589  ;;  %v2980_v27 = vsel %vm2952_vm11, %v2947_v41, %v2606_v1  ;;  %v3991_v41 = vld [vmem:[%s4162_s30 + $0xb4] sm:$0xf] }
 0x166   : > { %v2964_v5 = vsel %vm2952_vm11, %v2931_v6, %v2590_v52 }
 0x16b   : > { %v2684_v35 = vpop.permute.xlu1 %2683 }
 0x16c   : > { %v2668_v47 = vpop.permute.xlu0 %2667  ;;  %v3011_v17 = vsel %vm2985_vm12, %v2978_v57, %v2684_v35 }
 0x16d   : > { %v2995_v59 = vsel %vm2985_vm12, %v2962_v25, %v2668_v47 }
 0x170   : > { %v2686_v12 = vpop.permute.xlu1 %2685 }
 0x171   : > { %v3013_v60 = vsel %vm2985_vm12, %v2980_v27, %v2686_v12  ;;  %v3628_v27 = vcombine.low %v3991_v41, %v3992_v39 }
 0x173   : > { %v2670_v22 = vpop.permute.xlu0 %2669 }
 0x174   : > { %v2764_v63 = vpop.permute.xlu1 %2763  ;;  %v2997_v15 = vsel %vm2985_vm12, %v2964_v5, %v2670_v22 }
 0x175   : > { %v3044_v37 = vsel %vm3018_vm14, %v3011_v17, %v2764_v63 }
 0x176   : > { %3831 = vmatprep.mubr.msk.bf16.mxu1 %vm3071_vm15, %v3044_v37 }
 0x177   : > { %v2748_v32 = vpop.permute.xlu0 %2747 }
 0x178   : > { %v3028_v16 = vsel %vm3018_vm14, %v2995_v59, %v2748_v32  ;;  %v3988_v59 = vld [vmem:[%s4162_s30 + $0xac] sm:$0xf] }
 0x179   : > { %3815 = vmatprep.mubr.msk.bf16.mxu0 %vm3071_vm15, %v3028_v16  ;;  %v3627_v32 = vcombine.low %v3987_v56, %v3988_v59 }
 0x17d   : > { %v5880_v0 = vpop.permute.xlu1 %2175 }
 0x17e   : > { %v2816_v28 = vsel %vm2771_vm6, %v3627_v32, %v5880_v0 }
 0x181   : > { %v5893_v36 = vpop.permute.xlu0 %2159  ;;  %v2766_v44 = vpop.permute.xlu1 %2765 }
 0x182   : > { %v3046_v31 = vsel %vm3018_vm14, %v3013_v60, %v2766_v44  ;;  %v2792_v54 = vsel %vm2771_vm6, %v3619_v30, %v5893_v36 }
 0x183   : > { %3832 = vmatmul.mubr.msk.bf16.gmra.mxu1 %vm3071_vm15, %v3046_v31  ;;  %v3993_v31 = vld [vmem:[%s4162_s30 + $0x54] sm:$0xf]  ;;  %s3781_s30 = sshll.u32 %s4062_s15, 12  ;;  %s6086_s15 = scalar_lea.sflag [#allocation3], %s175_s28 }
 0x184   : > { %v3620_v6 = vcombine.low %v3993_v31, %v5440_v62  ;;  %s6077_s11 = scalar_lea.hbm %s6135_s3, %s3781_s30 }
 0x185   : > { %v2750_v45 = vpop.permute.xlu0 %2749 }
 0x186   : > { %v3030_v11 = vsel %vm3018_vm14, %v2997_v15, %v2750_v45 }
 0x187   : > { %3816 = vmatmul.mubr.msk.bf16.gmra.mxu0 %vm3071_vm15, %v3030_v11 }
 0x18a   : > { %v5904_v38 = vpop.permute.xlu1 %2177 }
 0x18b   : > { %v2819_v15 = vsel %vm2771_vm6, %v3628_v27, %v5904_v38 }
 0x18e   : > { %v5906_v43 = vpop.permute.xlu0 %2161  ;;  %v2256_v23 = vpop.permute.xlu1 %2255 }
 0x18f   : > { %v2850_v53 = vsel %vm2820_vm7, %v2816_v28, %v2256_v23 }
 0x192   : > { %v5908_v49 = vpop.permute.xlu0 %2239  ;;  %v5910_v10 = vpop.permute.xlu1 %2257 }
 0x193   : > { %v2834_v0 = vsel %vm2820_vm7, %v2792_v54, %v5908_v49  ;;  %v2852_v11 = vsel %vm2820_vm7, %v2819_v15, %v5910_v10 }
 0x196   : > { %v5912_v7 = vpop.permute.xlu0 %2241  ;;  %v2352_v19 = vpop.permute.xlu1 %2351 }
 0x197   : > { %v2883_v60 = vsel %vm2853_vm8, %v2850_v53, %v2352_v19 }
 0x19a   : > { %v5914_v1 = vpop.permute.xlu0 %2335  ;;  %v5916_v52 = vpop.permute.xlu1 %2353 }
 0x19b   : > { %v2867_v23 = vsel %vm2853_vm8, %v2834_v0, %v5914_v1  ;;  %v2885_v62 = vsel %vm2853_vm8, %v2852_v11, %v5916_v52 }
 0x19e   : > { %v5918_v20 = vpop.permute.xlu0 %2337 }
 0x1a2   : > { %v2432_v48 = vpop.permute.xlu1 %2431 }
 0x1a3   : > { %v5920_v4 = vpop.permute.xlu0 %2415  ;;  %v2916_v5 = vsel %vm2886_vm9, %v2883_v60, %v2432_v48 }
 0x1a4   : > { %v2900_v38 = vsel %vm2886_vm9, %v2867_v23, %v5920_v4 }
 0x1a6   : > { %v5922_v35 = vpop.permute.xlu1 %2433 }
 0x1a7   : > { %v2918_v10 = vsel %vm2886_vm9, %v2885_v62, %v5922_v35 }
 0x1a8   : > { %v5924_v21 = vpop.permute.xlu0 %2417 }
 0x1aa   : > { %v2512_v14 = vpop.permute.xlu1 %2511 }
 0x1ab   : > { %v2949_v45 = vsel %vm2919_vm10, %v2916_v5, %v2512_v14  ;;  %v2795_v14 = vsel %vm2771_vm6, %v3620_v6, %v5906_v43 }
 0x1ac   : > { %v5926_v24 = vpop.permute.xlu0 %2495  ;;  %v2836_v52 = vsel %vm2820_vm7, %v2795_v14, %v5912_v7 }
 0x1ad   : > { %v2933_v1 = vsel %vm2919_vm10, %v2900_v38, %v5926_v24  ;;  %v2869_v43 = vsel %vm2853_vm8, %v2836_v52, %v5918_v20 }
 0x1ae   : > { %v5928_v47 = vpop.permute.xlu1 %2513  ;;  %v2902_v7 = vsel %vm2886_vm9, %v2869_v43, %v5924_v21 }
 0x1af   : > { %v2951_v4 = vsel %vm2919_vm10, %v2918_v10, %v5928_v47 }
 0x1b0   : > { %v5931_v46 = vpop.permute.xlu0 %2497 }
 0x1b2   : > { %v2608_v29 = vpop.permute.xlu1 %2607 }
 0x1b3   : > { %v2982_v36 = vsel %vm2952_vm11, %v2949_v45, %v2608_v29 }
 0x1b4   : > { %v5940_v12 = vpop.permute.xlu0 %2591 }
 0x1b6   : > { %v5943_v26 = vpop.permute.xlu1 %2609 }
 0x1b7   : > { %v3809_v58 = vpop.f32.mrf.mxu0  ;;  %v3825_v55 = vpop.f32.mrf.mxu1  ;;  %v2984_v35 = vsel %vm2952_vm11, %v2951_v4, %v5943_v26 }
 0x1b8   : > { %v3271_v3 = vadd.f32 %v3809_v58, %v5938_v40  ;;  %v3287_v9 = vadd.f32 %v3825_v55, %v5938_v40  ;;  %v5950_v17 = vpop.permute.xlu0 %2593  ;;  %v2966_v58 = vsel %vm2952_vm11, %v2933_v1, %v5940_v12 }
 0x1b9   : > { %v3142_v57 = vpop.f32.mrf.mxu0  ;;  %v3206_v50 = vpop.f32.mrf.mxu1 }
 0x1ba   : > { %3303 = vst [vmem:[%s5946_s7 + $0x10] sm:$0xff] %v3271_v3  ;;  %v3269_v22 = vadd.f32 %v5938_v40, %v3142_v57  ;;  %3319 = vst [vmem:[%s5946_s7 + $0x90] sm:$0xff] %v3287_v9  ;;  %v3285_v63 = vadd.f32 %v5938_v40, %v3206_v50  ;;  %v2935_v9 = vsel %vm2919_vm10, %v2902_v7, %v5931_v46 }
 0x1bb   : > { %v3810_v51 = vpop.f32.mrf.mxu0  ;;  %v3826_v25 = vpop.f32.mrf.mxu1  ;;  %v2968_v26 = vsel %vm2952_vm11, %v2935_v9, %v5950_v17 }
 0x1bc   : > { %3301 = vst [vmem:[%s5946_s7] sm:$0xff] %v3269_v22  ;;  %v3272_v37 = vadd.f32 %v3810_v51, %v5938_v40  ;;  %3317 = vst [vmem:[%s5946_s7 + $0x80] sm:$0xff] %v3285_v63  ;;  %v3288_v8 = vadd.f32 %v3826_v25, %v5938_v40 }
 0x1bd   : > { %v3145_v61 = vpop.f32.mrf.mxu0  ;;  %v3209_v34 = vpop.f32.mrf.mxu1 }
 0x1be   : > { %3304 = vst [vmem:[%s5946_s7 + $0x18] sm:$0xff] %v3272_v37  ;;  %v3270_v16 = vadd.f32 %v5938_v40, %v3145_v61  ;;  %v2688_v2 = vpop.permute.xlu1 %2687  ;;  %3320 = vst [vmem:[%s5946_s7 + $0x98] sm:$0xff] %v3288_v8  ;;  %v3286_v42 = vadd.f32 %v5938_v40, %v3209_v34 }
 0x1bf   : > { %v2672_v13 = vpop.permute.xlu0 %2671  ;;  %v3015_v48 = vsel %vm2985_vm12, %v2982_v36, %v2688_v2 }
 0x1c0   : > { %3302 = vst [vmem:[%s5946_s7 + $0x8] sm:$0xff] %v3270_v16  ;;  %3318 = vst [vmem:[%s5946_s7 + $0x88] sm:$0xff] %v3286_v42  ;;  %v2999_v24 = vsel %vm2985_vm12, %v2966_v58, %v2672_v13 }
 0x1c2   : > { %v2690_v44 = vpop.permute.xlu1 %2689 }
 0x1c3   : > { %v3017_v55 = vsel %vm2985_vm12, %v2984_v35, %v2690_v44 }
 0x1c5   : > { %v2674_v19 = vpop.permute.xlu0 %2673 }
 0x1c6   : > { %v2768_v49 = vpop.permute.xlu1 %2767  ;;  %v3001_v21 = vsel %vm2985_vm12, %v2968_v26, %v2674_v19 }
 0x1c7   : > { %v3048_v29 = vsel %vm3018_vm14, %v3015_v48, %v2768_v49 }
 0x1c8   : > { %3835 = vmatprep.mubr.msk.bf16.mxu1 %vm3071_vm15, %v3048_v29 }
 0x1c9   : > { %v2752_v3 = vpop.permute.xlu0 %2751 }
 0x1ca   : > { %v3032_v47 = vsel %vm3018_vm14, %v2999_v24, %v2752_v3  ;;  %v2770_v12 = vpop.permute.xlu1 %2769 }
 0x1cb   : > { %3819 = vmatprep.mubr.msk.bf16.mxu0 %vm3071_vm15, %v3032_v47  ;;  %v3050_v20 = vsel %vm3018_vm14, %v3017_v55, %v2770_v12 }
 0x1cc   : > { %3836 = vmatmul.mubr.msk.bf16.gmra.mxu1 %vm3071_vm15, %v3050_v20 }
 0x1cd   : > { %v2754_v57 = vpop.permute.xlu0 %2753 }
 0x1ce   : > { %v3034_v22 = vsel %vm3018_vm14, %v3001_v21, %v2754_v57 }
 0x1cf   : > { %3820 = vmatmul.mubr.msk.bf16.gmra.mxu0 %vm3071_vm15, %v3034_v22 }
 0x204   : > { %v3829_v46 = vpop.f32.mrf.mxu1 }
 0x205   : > { %v3291_v63 = vadd.f32 %v3829_v46, %v5938_v40 }
 0x206   : > { %v3813_v50 = vpop.f32.mrf.mxu0  ;;  %v3222_v37 = vpop.f32.mrf.mxu1 }
 0x207   : > { %v3275_v51 = vadd.f32 %v3813_v50, %v5938_v40  ;;  %3323 = vst [vmem:[%s5946_s7 + $0xb0] sm:$0xff] %v3291_v63  ;;  %v3289_v25 = vadd.f32 %v5938_v40, %v3222_v37 }
 0x208   : > { %v3158_v17 = vpop.f32.mrf.mxu0  ;;  %v3830_v61 = vpop.f32.mrf.mxu1 }
 0x209   : > { %3307 = vst [vmem:[%s5946_s7 + $0x30] sm:$0xff] %v3275_v51  ;;  %v3273_v8 = vadd.f32 %v5938_v40, %v3158_v17  ;;  %3321 = vst [vmem:[%s5946_s7 + $0xa0] sm:$0xff] %v3289_v25  ;;  %v3292_v59 = vadd.f32 %v3830_v61, %v5938_v40 }
 0x20a   : > { %v3814_v56 = vpop.f32.mrf.mxu0  ;;  %v3225_v16 = vpop.f32.mrf.mxu1 }
 0x20b   : > { %3305 = vst [vmem:[%s5946_s7 + $0x20] sm:$0xff] %v3273_v8  ;;  %v3276_v32 = vadd.f32 %v3814_v56, %v5938_v40  ;;  %3324 = vst [vmem:[%s5946_s7 + $0xb8] sm:$0xff] %v3292_v59  ;;  %v3290_v2 = vadd.f32 %v5938_v40, %v3225_v16 }
 0x20c   : > { %v3161_v34 = vpop.f32.mrf.mxu0 }
 0x20d   : > { %3308 = vst [vmem:[%s5946_s7 + $0x38] sm:$0xff] %v3276_v32  ;;  %v3274_v42 = vadd.f32 %v5938_v40, %v3161_v34  ;;  %3322 = vst [vmem:[%s5946_s7 + $0xa8] sm:$0xff] %v3290_v2 }
 0x20f   : > { %3306 = vst [vmem:[%s5946_s7 + $0x28] sm:$0xff] %v3274_v42 }
 0x243   : > { %v3833_v33 = vpop.f32.mrf.mxu1 }
 0x244   : > { %v3295_v18 = vadd.f32 %v3833_v33, %v5938_v40 }
 0x245   : > { %v3238_v30 = vpop.f32.mrf.mxu1 }
 0x246   : > { %3327 = vst [vmem:[%s5946_s7 + $0xd0] sm:$0xff] %v3295_v18  ;;  %v3293_v13 = vadd.f32 %v5938_v40, %v3238_v30 }
 0x247   : > { %v3817_v28 = vpop.f32.mrf.mxu0  ;;  %v3834_v41 = vpop.f32.mrf.mxu1 }
 0x248   : > { %v3279_v39 = vadd.f32 %v3817_v28, %v5938_v40  ;;  %3325 = vst [vmem:[%s5946_s7 + $0xc0] sm:$0xff] %v3293_v13  ;;  %v3296_v27 = vadd.f32 %v3834_v41, %v5938_v40 }
 0x249   : > { %v3174_v53 = vpop.f32.mrf.mxu0  ;;  %v3241_v60 = vpop.f32.mrf.mxu1 }
 0x24a   : > { %3311 = vst [vmem:[%s5946_s7 + $0x50] sm:$0xff] %v3279_v39  ;;  %v3277_v44 = vadd.f32 %v5938_v40, %v3174_v53  ;;  %3328 = vst [vmem:[%s5946_s7 + $0xd8] sm:$0xff] %v3296_v27  ;;  %v3294_v54 = vadd.f32 %v5938_v40, %v3241_v60 }
 0x24b   : > { %v3818_v31 = vpop.f32.mrf.mxu0 }
 0x24c   : > { %3309 = vst [vmem:[%s5946_s7 + $0x40] sm:$0xff] %v3277_v44  ;;  %v3280_v6 = vadd.f32 %v3818_v31, %v5938_v40  ;;  %3326 = vst [vmem:[%s5946_s7 + $0xc8] sm:$0xff] %v3294_v54 }
 0x24d   : > { %v3177_v5 = vpop.f32.mrf.mxu0 }
 0x24e   : > { %3312 = vst [vmem:[%s5946_s7 + $0x58] sm:$0xff] %v3280_v6  ;;  %v3278_v15 = vadd.f32 %v5938_v40, %v3177_v5 }
 0x250   : > { %3310 = vst [vmem:[%s5946_s7 + $0x48] sm:$0xff] %v3278_v15 }
 0x28c   : > { %v3837_v0 = vpop.f32.mrf.mxu1 }
 0x28d   : > { %v3299_v45 = vadd.f32 %v3837_v0, %v5938_v40 }
 0x28e   : > { %v3254_v11 = vpop.f32.mrf.mxu1 }
 0x28f   : > { %v3821_v23 = vpop.f32.mrf.mxu0  ;;  %3331 = vst [vmem:[%s5946_s7 + $0xf0] sm:$0xff] %v3299_v45  ;;  %v3297_v36 = vadd.f32 %v5938_v40, %v3254_v11 }
 0x290   : > { %v3283_v19 = vadd.f32 %v3821_v23, %v5938_v40  ;;  %v3838_v62 = vpop.f32.mrf.mxu1 }
 0x291   : > { %v3190_v38 = vpop.f32.mrf.mxu0  ;;  %3329 = vst [vmem:[%s5946_s7 + $0xe0] sm:$0xff] %v3297_v36  ;;  %v3300_v48 = vadd.f32 %v3838_v62, %v5938_v40 }
 0x292   : > { %3315 = vst [vmem:[%s5946_s7 + $0x70] sm:$0xff] %v3283_v19  ;;  %v3281_v49 = vadd.f32 %v5938_v40, %v3190_v38  ;;  %v3257_v14 = vpop.f32.mrf.mxu1 }
 0x293   : > { %v3822_v10 = vpop.f32.mrf.mxu0  ;;  %3332 = vst [vmem:[%s5946_s7 + $0xf8] sm:$0xff] %v3300_v48  ;;  %v3298_v1 = vadd.f32 %v5938_v40, %v3257_v14 }
 0x294   : > { %3313 = vst [vmem:[%s5946_s7 + $0x60] sm:$0xff] %v3281_v49  ;;  %v3284_v29 = vadd.f32 %v3822_v10, %v5938_v40 }
 0x295   : > { %v3193_v52 = vpop.f32.mrf.mxu0  ;;  %3330 = vst [vmem:[%s5946_s7 + $0xe8] sm:$0xff] %v3298_v1 }
 0x296   : > { %3316 = vst [vmem:[%s5946_s7 + $0x78] sm:$0xff] %v3284_v29  ;;  %v3282_v4 = vadd.f32 %v5938_v40, %v3193_v52 }
 0x298   : > { %3314 = vst [vmem:[%s5946_s7 + $0x68] sm:$0xff] %v3282_v4 }
 0x299   : > { %4007 = shalt.err (!%p4004_p5)
}
 0x29a   : > { %s4008_s26 = scalar_lea.hbm %s6077_s11, 4096  ;;  %s4012_s29 = scalar_lea.hbm %s6135_s3, 8192 }
 0x29b   : > { %p4009_p6 = scmp.ne.s32.totalorder %s6077_s11, %s4008_s26  ;;  %p4013_p10 = scmp.lt.s32.totalorder %s6077_s11, %s6135_s3 }
 0x29c   : > { %p4014_p11 = scmp.lt.s32.totalorder %s4012_s29, %s4008_s26 }
 0x29d   : > { %p4010_p7 = pnand %p4009_p6, %p4142_p4 }
 0x29e   : > { %p4015_p12 = por %p4014_p11, %p4013_p10 }
 0x29f   : > { %p4011_p9 = pneg %p4010_p7 }
 0x2a1   : > { %p4016_p13 = pnand %p4015_p12, %p4011_p9 }
 0x2a3   : > { %4019 = shalt.err (!%p4016_p13)
}
 0x2a4   : > { %s4081_s7 = smov 128  }
 0x2a5   : > { %3848 = dma.vmem_to_hbm [thread:$0]  (%p4142_p4), %s6081_s8, 4096, %s6077_s11, %s6086_s15, %s4081_s7, %s4081_s7, %s4073_s5  }
 0x2a6 PF: > { %p3854_p0 = scmp.ge.s32.totalorder %s4070_s17, 2  ;;  %s3363_s30 = sand.u32 1, %s4050_s12  }
 0x2a7   : > { %s3364_s9 = scalar_lea.sflag [#allocation3], %s3363_s30 }
 0x2a8   : > { %p3851_p1 = pnand %p3854_p0, %p4149_p8 }
 0x2aa   : > { %p3852_p2 = pneg %p3851_p1 }
 0x2ac   : > { %4045 = dma.done.wait (%p3852_p2), %s3364_s9, 4096  }
 0x2ad   : > { %4047 = vsyncadd (%p3852_p2), %s3364_s9, 4294963200  ;;  %s16_s17 = sadd.s32 1, %s4070_s17   ;;  %s6142_s12 = smov %s4054_s13 }
 0x2ae   : > { %p13_p3 = scmp.ge.s32.totalorder %s16_s17, 4   ;;  %s6143_s13 = smov %s4058_s14 }
 0x2af   : > { %s6144_s14 = smov %s4155_s25  ;;  %s6145_s15 = smov %s4066_s16 }
 0x2b0   : > { %s6146_s16 = smov %s6148_s20  ;;  %15 = sbr.rel (!%p13_p3) target bundleno = 4 (0x4), region = 70 }
 0x2b5   :  { %3369 = vsyncpa [#allocation3], 1 }
 0x2b6   :  { %3371 = vsyncpa [#allocation3 + $0x1], 1 }

</bundles_post_ra>
